<compile_context>
chip_gen: v7x
topology: tpu7x:2x2x1
jax: 0.10.0
libtpu: 0.0.40
codegen_flags: <defaults>
</compile_context>

<pallas_src>
from typing import NamedTuple

import jax
import jax.numpy as jnp
from jax import lax
from jax.experimental import pallas as pl
from jax.experimental.pallas import tpu as pltpu

COMPUTE_DTYPE = jnp.bfloat16      # activations & weights; accumulation is f32
_SUBLANE = 16                     # sublane tile rows for bf16
LANE = 128
VMEM_LIMIT_BYTES = 32 * 1024 * 1024


def _round_up(a, m):
    return -(-a // m) * m


def _cdiv(a, b):
    return -(-a // b)


def _pick_t_tile(chan, t_out):
    """Lane-aligned time tile, larger for low-channel (later) stages."""
    if chan <= 64:
        tile = 2048
    elif chan <= 192:
        tile = 1024
    else:
        tile = 512
    return max(LANE, min(tile, _round_up(max(t_out, 1), LANE)))


class Act(NamedTuple):
    """Activation stored (B, C, L_stored) in COMPUTE_DTYPE; only [:, :, :length] is real."""
    data: jax.Array
    length: int


# ----------------------------------------------------------------------------
# Pallas conv1d kernel (dilated, stride 1, fused lrelu / bias / residual / tanh)
# ----------------------------------------------------------------------------
def _make_conv_kernel(K, dilation, t_tile, t_out, pre_lrelu, relu_constant,
                      post_tanh, has_residual, needs_mask, fold_taps):
    def kernel(*refs):
        if has_residual:
            x_ref, h_ref, w_ref, b_ref, r_ref, o_ref = refs
        else:
            x_ref, h_ref, w_ref, b_ref, o_ref = refs
            r_ref = None

        # (C_in, t_tile + 128): current tile + 128-column right halo.
        x = jnp.concatenate([x_ref[...], h_ref[...]], axis=-1)
        if pre_lrelu:
            # LeakyReLU(0) == 0, so applying it after zero padding is fine.
            x = jnp.where(x >= 0, x, relu_constant * x)

        c_in = x_ref.shape[0]
        if K == 1:
            acc = jnp.dot(w_ref[...], x[:, :t_tile],
                          preferred_element_type=jnp.float32)
        elif fold_taps:
            # Fold the K taps into the contraction dim: one (C_out, K*C_in) x
            # (K*C_in, t_tile) MXU matmul (better MXU fill for small C_in).
            xs = jnp.concatenate(
                [x[:, k * dilation:k * dilation + t_tile] for k in range(K)],
                axis=0)
            acc = jnp.dot(w_ref[...], xs, preferred_element_type=jnp.float32)
        else:
            acc = jnp.zeros(o_ref.shape, jnp.float32)
            for k in range(K):
                wk = w_ref[:, k * c_in:(k + 1) * c_in]
                acc = acc + jnp.dot(wk, x[:, k * dilation:k * dilation + t_tile],
                                    preferred_element_type=jnp.float32)

        acc = acc + b_ref[...]                       # (C_out, 1) f32 bias
        if has_residual:
            acc = acc + r_ref[...].astype(jnp.float32)
        if post_tanh:
            acc = jnp.tanh(acc)
        if needs_mask:
            # zero the padded tail so stored activations are clean beyond t_out
            col = pl.program_id(1) * t_tile + lax.broadcasted_iota(
                jnp.int32, acc.shape, 1)
            acc = jnp.where(col < t_out, acc, 0.0)
        o_ref[...] = acc.astype(o_ref.dtype)

    return kernel


def conv1d(act, layer, *, dilation=1, pad_left=0, pad_right=0,
           pre_lrelu=False, relu_constant=0.1, post_tanh=False, residual=None):
    """Stride-1 dilated conv on an Act.  layer: prepared {"w","b","k","c_in","c_out"}."""
    x, T = act.data, act.length
    B, C_in, _ = x.shape
    w, b, K = layer["w"], layer["b"], layer["k"]
    C_out = layer["c_out"]
    assert C_in == layer["c_in"], (C_in, layer["c_in"])

    halo = dilation * (K - 1)
    assert 0 <= halo <= LANE, f"receptive field {halo} exceeds the {LANE}-column halo budget"
    T_out = T + pad_left + pad_right - halo
    assert T_out > 0, "input too short for this conv configuration"

    t_tile = _pick_t_tile(max(C_in, C_out), T_out)
    nt = _cdiv(T_out, t_tile)
    l_need = nt * t_tile + LANE                       # + one halo block at the end

    # One fused slice+pad producing the zero-padded, kernel-ready input (bf16).
    xp = jnp.pad(x[:, :, :T],
                 ((0, 0), (0, 0), (pad_left, l_need - pad_left - T)))

    r_blocks = t_tile // LANE
    in_specs = [
        pl.BlockSpec((None, C_in, t_tile), lambda bi, ti: (bi, 0, ti)),
        pl.BlockSpec((None, C_in, LANE), lambda bi, ti: (bi, 0, (ti + 1) * r_blocks)),
        pl.BlockSpec((C_out, K * C_in), lambda bi, ti: (0, 0)),
        pl.BlockSpec((C_out, 1), lambda bi, ti: (0, 0)),
    ]
    args = [xp, xp, w, b]

    has_res = residual is not None
    if has_res:
        rd = residual.data
        assert rd.shape[0] == B and rd.shape[1] == C_out
        assert residual.length == T_out
        if rd.shape[2] < nt * t_tile:
            rd = jnp.pad(rd, ((0, 0), (0, 0), (0, nt * t_tile - rd.shape[2])))
        in_specs.append(pl.BlockSpec((None, C_out, t_tile), lambda bi, ti: (bi, 0, ti)))
        args.append(rd)

    fold_taps = (K > 1) and (C_in % _SUBLANE == 0)
    kernel = _make_conv_kernel(K, dilation, t_tile, T_out, pre_lrelu,
                               relu_constant, post_tanh, has_res,
                               needs_mask=(nt * t_tile != T_out),
                               fold_taps=fold_taps)

    out = pl.pallas_call(
        kernel,
        out_shape=jax.ShapeDtypeStruct((B, C_out, nt * t_tile), COMPUTE_DTYPE),
        grid=(B, nt),
        in_specs=in_specs,
        out_specs=pl.BlockSpec((None, C_out, t_tile), lambda bi, ti: (bi, 0, ti)),
        compiler_params=pltpu.CompilerParams(
            dimension_semantics=("parallel", "parallel"),
            vmem_limit_bytes=VMEM_LIMIT_BYTES),
    )(*args)
    return Act(out, T_out)


# ----------------------------------------------------------------------------
# Polyphase ConvTranspose1d (no zero-inserted intermediate)
# ----------------------------------------------------------------------------
def conv_transpose1d(act, layer, *, relu_constant):
    T = act.length
    B = act.data.shape[0]
    s, p, K = layer["stride"], layer["padding"], layer["kernel_size"]
    C_out = layer["c_out"]
    T_out = (T - 1) * s + K - 2 * p
    assert T_out > 0

    U = _cdiv(T_out, s)
    off_max = (s - 1 + p) // s
    M = U + off_max                      # outputs needed per phase
    pad_r = max(0, M - T)

    phase_outs = []
    for ph in layer["phases"]:
        Kr = ph["k"]
        z = conv1d(act, ph, dilation=1, pad_left=Kr - 1, pad_right=pad_r,
                   pre_lrelu=True, relu_constant=relu_constant)
        assert z.length >= M
        phase_outs.append(z)

    # Interleave the phases:  y[u*s + c] = phase[(c+p) % s][u + (c+p)//s]
    cols = []
    for c in range(s):
        r = (c + p) % s
        off = (c + p) // s
        cols.append(phase_outs[r].data[:, :, off:off + U])
    y = jnp.stack(cols, axis=-1).reshape(B, C_out, U * s)

    # Pad stored length to the layout the following ResBlock convs use so the
    # fused residual-add can consume `h` directly.
    t_tile = _pick_t_tile(C_out, T_out)
    target = _round_up(T_out, t_tile)
    if y.shape[2] < target:
        y = jnp.pad(y, ((0, 0), (0, 0), (0, target - y.shape[2])))
    return Act(y, T_out)


# ----------------------------------------------------------------------------
# Parameters (PyTorch layout) and one-time preprocessing into kernel layout
# ----------------------------------------------------------------------------
def init_hifigan_params(key, input_dim, hidden_dim, transposed_kernels,
                        mrf_kernels, dilations):
    keys = iter(jax.random.split(key, 512))

    def conv_param(co, ci, k):
        return {"w": 0.1 * jax.random.normal(next(keys), (co, ci, k), jnp.float32),
                "b": 0.01 * jax.random.normal(next(keys), (co,), jnp.float32)}

    def convT_param(ci, co, k):
        return {"w": 0.1 * jax.random.normal(next(keys), (ci, co, k), jnp.float32),
                "b": 0.01 * jax.random.normal(next(keys), (co,), jnp.float32)}

    params = {"conv_pre": conv_param(hidden_dim, input_dim, 7), "ups": [], "mrf": []}
    ch = hidden_dim
    for ku in transposed_kernels:
        stride = ku // 2
        params["ups"].append({"p": convT_param(ch, ch // 2, ku),
                              "stride": stride, "padding": (ku - stride) // 2})
        ch //= 2
        layer_blocks = []
        for j, kr in enumerate(mrf_kernels):
            block = [{"c1": conv_param(ch, ch, kr), "d1": d1,
                      "c2": conv_param(ch, ch, kr), "d2": d2, "k": kr}
                     for (d1, d2) in dilations[j]]
            layer_blocks.append(block)
        params["mrf"].append(layer_blocks)
    params["conv_post"] = conv_param(1, ch, 7)
    return params


def prepare_params(params):
    """Pre-transpose / pre-cast weights once (hot path does no layout work)."""
    def prep_conv(w, b):
        co, ci, k = w.shape
        wk = jnp.transpose(w, (0, 2, 1)).reshape(co, k * ci).astype(COMPUTE_DTYPE)
        return {"w": wk, "b": b.reshape(co, 1).astype(jnp.float32),
                "k": k, "c_in": ci, "c_out": co}

    def prep_convT(w, b, stride, padding):
        ci, co, k = w.shape
        phases = []
        for r in range(stride):
            taps = list(range(r, k, stride))
            sub = jnp.flip(w[:, :, taps], axis=2)       # reverse tap order
            sub = jnp.transpose(sub, (1, 0, 2))         # (C_out, C_in, Kr)
            phases.append(prep_conv(sub, b))
        return {"stride": stride, "padding": padding, "kernel_size": k,
                "c_out": co, "phases": phases}

    prep = {"conv_pre": prep_conv(params["conv_pre"]["w"], params["conv_pre"]["b"]),
            "conv_post": prep_conv(params["conv_post"]["w"], params["conv_post"]["b"]),
            "levels": []}
    for up, blocks in zip(params["ups"], params["mrf"]):
        lvl = {"up": prep_convT(up["p"]["w"], up["p"]["b"],
                                up["stride"], up["padding"]),
               "mrf": []}
        for block in blocks:
            lvl["mrf"].append([{"c1": prep_conv(s["c1"]["w"], s["c1"]["b"]),
                                "c2": prep_conv(s["c2"]["w"], s["c2"]["b"]),
                                "d1": s["d1"], "d2": s["d2"], "k": s["k"]}
                               for s in block])
        prep["levels"].append(lvl)
    return prep


# ----------------------------------------------------------------------------
# HiFiGAN generator forward (== HiFiGAN.forward == Generator.forward)
# ----------------------------------------------------------------------------
def hifigan_forward(prep, x, relu_constant):
    """x: melspectrogram (B, F, T) -> dict with generated wav (B, 1, T')."""
    _, _, T = x.shape
    h = Act(x.astype(COMPUTE_DTYPE), T)
    h = conv1d(h, prep["conv_pre"], dilation=1, pad_left=3, pad_right=3)

    for level in prep["levels"]:
        h = conv_transpose1d(h, level["up"], relu_constant=relu_constant)
        acc = None
        for block in level["mrf"]:
            r = h
            for sub in block:
                k, d1, d2 = sub["k"], sub["d1"], sub["d2"]
                p1 = (k - 1) * d1 // 2
                p2 = (k - 1) * d2 // 2
                xt = conv1d(r, sub["c1"], dilation=d1, pad_left=p1, pad_right=p1,
                            pre_lrelu=True, relu_constant=relu_constant)
                # second conv with the residual add fused into the kernel
                r = conv1d(xt, sub["c2"], dilation=d2, pad_left=p2, pad_right=p2,
                           pre_lrelu=True, relu_constant=relu_constant,
                           residual=r)
            acc = r if acc is None else Act(acc.data + r.data, r.length)
        h = Act(acc.data / float(len(level["mrf"])), acc.length)

    out = conv1d(h, prep["conv_post"], dilation=1, pad_left=3, pad_right=3,
                 pre_lrelu=True, relu_constant=relu_constant, post_tanh=True)
    wav = out.data[:, :, :out.length].astype(jnp.float32)
    return {"generated_wav": wav}


# ----------------------------------------------------------------------------
# Pure-JAX reference (PyTorch semantics, mirrors the bf16 casting points)
# ----------------------------------------------------------------------------
def reference_forward(params, x, relu_constant):
    cd = COMPUTE_DTYPE

    def lrelu(v):
        return jnp.where(v >= 0, v, relu_constant * v)

    def conv(xv, w, b, dilation, padding):
        B, _, T = xv.shape
        co, _, K = w.shape
        wf = w.astype(cd).astype(jnp.float32)
        xf = jnp.pad(xv, ((0, 0), (0, 0), (padding, padding))).astype(jnp.float32)
        t_out = T + 2 * padding - dilation * (K - 1)
        acc = jnp.zeros((B, co, t_out), jnp.float32)
        for k in range(K):
            acc = acc + jnp.einsum("oc,bct->bot", wf[:, :, k],
                                   xf[:, :, k * dilation:k * dilation + t_out])
        return acc + b[None, :, None]

    def convT(xv, w, b, stride, padding):
        B, ci, T = xv.shape
        _, _, K = w.shape
        xu = jnp.zeros((B, ci, (T - 1) * stride + 1), xv.dtype)
        xu = xu.at[:, :, ::stride].set(xv)
        wc = jnp.transpose(jnp.flip(w, 2), (1, 0, 2))
        return conv(xu, wc, b, 1, K - 1 - padding)

    h = conv(x.astype(cd), params["conv_pre"]["w"], params["conv_pre"]["b"], 1, 3).astype(cd)
    for up, blocks in zip(params["ups"], params["mrf"]):
        h = convT(lrelu(h), up["p"]["w"], up["p"]["b"],
                  up["stride"], up["padding"]).astype(cd)
        acc = None
        for block in blocks:
            r = h
            for sub in block:
                k = sub["k"]
                xt = conv(lrelu(r), sub["c1"]["w"], sub["c1"]["b"], sub["d1"],
                          (k - 1) * sub["d1"] // 2).astype(cd)
                xt = conv(lrelu(xt), sub["c2"]["w"], sub["c2"]["b"], sub["d2"],
                          (k - 1) * sub["d2"] // 2)
                r = (xt + r.astype(jnp.float32)).astype(cd)
            acc = r if acc is None else acc + r
        h = (acc / float(len(blocks))).astype(cd)
    out = conv(lrelu(h), params["conv_post"]["w"], params["conv_post"]["b"], 1, 3)
    return jnp.tanh(out).astype(cd).astype(jnp.float32)


if __name__ == "__main__":
    # Small, deterministic configuration consistent with the module signature.
    B, N_MELS, T = 2, 8, 8
    HIDDEN = 32
    TRANSPOSED_KERNELS = [4, 4]          # strides [2, 2]  -> T' = 4 * T
    MRF_KERNELS = [3, 5]
    DILATIONS = [[[1, 1], [3, 1]],       # 3-D dilation list (per mrf kernel)
                 [[1, 1], [3, 1]]]
    RELU_CONSTANT = 0.1

    key = jax.random.PRNGKey(0)
    pkey, xkey = jax.random.split(key)
    raw_params = init_hifigan_params(pkey, N_MELS, HIDDEN, TRANSPOSED_KERNELS,
                                     MRF_KERNELS, DILATIONS)
    prep = prepare_params(raw_params)
    x = jax.random.normal(xkey, (B, N_MELS, T), jnp.float32)

    fwd = jax.jit(lambda xv: hifigan_forward(prep, xv, RELU_CONSTANT))
    wav = jax.block_until_ready(fwd(x)["generated_wav"])
    assert wav.shape == (B, 1, T * 4), wav.shape
    assert bool(jnp.all(jnp.isfinite(wav)))

    # Numerical check against a plain-JAX reference of the PyTorch module.
    ref = reference_forward(raw_params, x, RELU_CONSTANT)
    err = float(jnp.max(jnp.abs(wav - ref)))
    assert err < 3e-2, f"Pallas forward mismatch vs reference: max abs err {err}"

    print("KERNEL_OK")
</pallas_src>

<mosaic_0001>
module attributes {stable_mosaic.version = 11 : i64} {
  func.func @kernel(%arg0: i32, %arg1: i32, %arg2: memref<1x8x128xbf16, #tpu.memory_space<vmem>>, %arg3: memref<1x8x128xbf16, #tpu.memory_space<vmem>>, %arg4: memref<32x56xbf16, #tpu.memory_space<vmem>>, %arg5: memref<32x1xf32, #tpu.memory_space<vmem>>, %arg6: memref<1x32x128xbf16, #tpu.memory_space<vmem>>) attributes {dimension_semantics = [#tpu.dimension_semantics<parallel>, #tpu.dimension_semantics<parallel>], iteration_bounds = array<i64: 2, 1>, scalar_prefetch = 0 : i64, scratch_operands = 0 : i64, tpu.core_type = #tpu.core_type<tc>, window_params = [{transform_indices = @transform_0, window_bounds = array<i64: 1, 8, 128>}, {transform_indices = @transform_1, window_bounds = array<i64: 1, 8, 128>}, {pipeline_mode = #tpu.pipeline_mode<synchronous>, transform_indices = @transform_2, window_bounds = array<i64: 32, 56>}, {pipeline_mode = #tpu.pipeline_mode<synchronous>, transform_indices = @transform_3, window_bounds = array<i64: 32, 1>}, {transform_indices = @transform_4, window_bounds = array<i64: 1, 32, 128>}]} {
    %c0 = arith.constant 0 : index
    %c0_0 = arith.constant 0 : index
    %c0_1 = arith.constant 0 : index
    %0 = vector.load %arg2[%c0, %c0_0, %c0_1] : memref<1x8x128xbf16, #tpu.memory_space<vmem>>, vector<1x8x128xbf16>
    %1 = vector.shape_cast %0 : vector<1x8x128xbf16> to vector<8x128xbf16>
    %c0_2 = arith.constant 0 : index
    %c0_3 = arith.constant 0 : index
    %c0_4 = arith.constant 0 : index
    %2 = vector.load %arg3[%c0_2, %c0_3, %c0_4] : memref<1x8x128xbf16, #tpu.memory_space<vmem>>, vector<1x8x128xbf16>
    %3 = vector.shape_cast %2 : vector<1x8x128xbf16> to vector<8x128xbf16>
    %4 = tpu.concatenate %1, %3 in 1 : vector<8x128xbf16>, vector<8x128xbf16> -> vector<8x256xbf16>
    %cst = arith.constant 0.000000e+00 : f32
    %5 = vector.broadcast %cst : f32 to vector<32x128xf32>
    %c0_5 = arith.constant 0 : index
    %c0_6 = arith.constant 0 : index
    %6 = vector.load %arg4[%c0_5, %c0_6] : memref<32x56xbf16, #tpu.memory_space<vmem>>, vector<32x8xbf16>
    %7 = vector.extract_strided_slice %4 {offsets = [0, 0], sizes = [8, 128], strides = [1, 1]} : vector<8x256xbf16> to vector<8x128xbf16>
    %cst_7 = arith.constant dense<0.000000e+00> : vector<32x128xf32>
    %8 = tpu.matmul %6, %7, %cst_7 {dimension_numbers = #tpu.dot_dimension_numbers<[1], [0], [0], [1], [0, 0, 1, 1], [], []>} : vector<32x8xbf16>, vector<8x128xbf16>, vector<32x128xf32> -> vector<32x128xf32>
    %9 = arith.addf %5, %8 : vector<32x128xf32>
    %c0_8 = arith.constant 0 : index
    %c8 = arith.constant 8 : index
    %10 = vector.load %arg4[%c0_8, %c8] : memref<32x56xbf16, #tpu.memory_space<vmem>>, vector<32x8xbf16>
    %11 = vector.extract_strided_slice %4 {offsets = [0, 1], sizes = [8, 128], strides = [1, 1]} : vector<8x256xbf16> to vector<8x128xbf16>
    %cst_9 = arith.constant dense<0.000000e+00> : vector<32x128xf32>
    %12 = tpu.matmul %10, %11, %cst_9 {dimension_numbers = #tpu.dot_dimension_numbers<[1], [0], [0], [1], [0, 0, 1, 1], [], []>} : vector<32x8xbf16>, vector<8x128xbf16>, vector<32x128xf32> -> vector<32x128xf32>
    %13 = arith.addf %9, %12 : vector<32x128xf32>
    %c0_10 = arith.constant 0 : index
    %c16 = arith.constant 16 : index
    %14 = vector.load %arg4[%c0_10, %c16] : memref<32x56xbf16, #tpu.memory_space<vmem>>, vector<32x8xbf16>
    %15 = vector.extract_strided_slice %4 {offsets = [0, 2], sizes = [8, 128], strides = [1, 1]} : vector<8x256xbf16> to vector<8x128xbf16>
    %cst_11 = arith.constant dense<0.000000e+00> : vector<32x128xf32>
    %16 = tpu.matmul %14, %15, %cst_11 {dimension_numbers = #tpu.dot_dimension_numbers<[1], [0], [0], [1], [0, 0, 1, 1], [], []>} : vector<32x8xbf16>, vector<8x128xbf16>, vector<32x128xf32> -> vector<32x128xf32>
    %17 = arith.addf %13, %16 : vector<32x128xf32>
    %c0_12 = arith.constant 0 : index
    %c24 = arith.constant 24 : index
    %18 = vector.load %arg4[%c0_12, %c24] : memref<32x56xbf16, #tpu.memory_space<vmem>>, vector<32x8xbf16>
    %19 = vector.extract_strided_slice %4 {offsets = [0, 3], sizes = [8, 128], strides = [1, 1]} : vector<8x256xbf16> to vector<8x128xbf16>
    %cst_13 = arith.constant dense<0.000000e+00> : vector<32x128xf32>
    %20 = tpu.matmul %18, %19, %cst_13 {dimension_numbers = #tpu.dot_dimension_numbers<[1], [0], [0], [1], [0, 0, 1, 1], [], []>} : vector<32x8xbf16>, vector<8x128xbf16>, vector<32x128xf32> -> vector<32x128xf32>
    %21 = arith.addf %17, %20 : vector<32x128xf32>
    %c0_14 = arith.constant 0 : index
    %c32 = arith.constant 32 : index
    %22 = vector.load %arg4[%c0_14, %c32] : memref<32x56xbf16, #tpu.memory_space<vmem>>, vector<32x8xbf16>
    %23 = vector.extract_strided_slice %4 {offsets = [0, 4], sizes = [8, 128], strides = [1, 1]} : vector<8x256xbf16> to vector<8x128xbf16>
    %cst_15 = arith.constant dense<0.000000e+00> : vector<32x128xf32>
    %24 = tpu.matmul %22, %23, %cst_15 {dimension_numbers = #tpu.dot_dimension_numbers<[1], [0], [0], [1], [0, 0, 1, 1], [], []>} : vector<32x8xbf16>, vector<8x128xbf16>, vector<32x128xf32> -> vector<32x128xf32>
    %25 = arith.addf %21, %24 : vector<32x128xf32>
    %c0_16 = arith.constant 0 : index
    %c40 = arith.constant 40 : index
    %26 = vector.load %arg4[%c0_16, %c40] : memref<32x56xbf16, #tpu.memory_space<vmem>>, vector<32x8xbf16>
    %27 = vector.extract_strided_slice %4 {offsets = [0, 5], sizes = [8, 128], strides = [1, 1]} : vector<8x256xbf16> to vector<8x128xbf16>
    %cst_17 = arith.constant dense<0.000000e+00> : vector<32x128xf32>
    %28 = tpu.matmul %26, %27, %cst_17 {dimension_numbers = #tpu.dot_dimension_numbers<[1], [0], [0], [1], [0, 0, 1, 1], [], []>} : vector<32x8xbf16>, vector<8x128xbf16>, vector<32x128xf32> -> vector<32x128xf32>
    %29 = arith.addf %25, %28 : vector<32x128xf32>
    %c0_18 = arith.constant 0 : index
    %c48 = arith.constant 48 : index
    %30 = vector.load %arg4[%c0_18, %c48] : memref<32x56xbf16, #tpu.memory_space<vmem>>, vector<32x8xbf16>
    %31 = vector.extract_strided_slice %4 {offsets = [0, 6], sizes = [8, 128], strides = [1, 1]} : vector<8x256xbf16> to vector<8x128xbf16>
    %cst_19 = arith.constant dense<0.000000e+00> : vector<32x128xf32>
    %32 = tpu.matmul %30, %31, %cst_19 {dimension_numbers = #tpu.dot_dimension_numbers<[1], [0], [0], [1], [0, 0, 1, 1], [], []>} : vector<32x8xbf16>, vector<8x128xbf16>, vector<32x128xf32> -> vector<32x128xf32>
    %33 = arith.addf %29, %32 : vector<32x128xf32>
    %c0_20 = arith.constant 0 : index
    %c0_21 = arith.constant 0 : index
    %34 = vector.load %arg5[%c0_20, %c0_21] : memref<32x1xf32, #tpu.memory_space<vmem>>, vector<32x1xf32>
    %35 = vector.broadcast %34 : vector<32x1xf32> to vector<32x128xf32>
    %36 = arith.addf %33, %35 : vector<32x128xf32>
    %c128_i32 = arith.constant 128 : i32
    %37 = arith.muli %arg1, %c128_i32 : i32
    %38 = tpu.iota {dimensions = array<i32: 1>} : vector<32x128xi32>
    %39 = vector.broadcast %37 : i32 to vector<32x128xi32>
    %40 = arith.addi %39, %38 : vector<32x128xi32>
    %c8_i32 = arith.constant 8 : i32
    %41 = vector.broadcast %c8_i32 : i32 to vector<32x128xi32>
    %42 = arith.cmpi slt, %40, %41 : vector<32x128xi32>
    %cst_22 = arith.constant 0.000000e+00 : f32
    %43 = vector.broadcast %cst_22 : f32 to vector<32x128xf32>
    %44 = arith.select %42, %36, %43 : vector<32x128xi1>, vector<32x128xf32>
    %45 = arith.truncf %44 : vector<32x128xf32> to vector<32x128xbf16>
    %c0_23 = arith.constant 0 : index
    %c0_24 = arith.constant 0 : index
    %c0_25 = arith.constant 0 : index
    %46 = vector.load %arg6[%c0_23, %c0_24, %c0_25] : memref<1x32x128xbf16, #tpu.memory_space<vmem>>, vector<1x32x128xbf16>
    %47 = vector.shape_cast %46 : vector<1x32x128xbf16> to vector<32x128xbf16>
    %48 = vector.shape_cast %45 : vector<32x128xbf16> to vector<1x32x128xbf16>
    tpu.vector_store %arg6[%c0_23, %c0_24, %c0_25], %48 {strides = array<i32>} : memref<1x32x128xbf16, #tpu.memory_space<vmem>>, vector<1x32x128xbf16>,
    return
  }
  func.func @transform_0(%arg0: i32, %arg1: i32) -> (i32, i32, i32) {
    %c0_i32 = arith.constant 0 : i32
    %c0_i32_0 = arith.constant 0 : i32
    return %arg0, %c0_i32, %arg1 : i32, i32, i32
  }
  func.func @transform_1(%arg0: i32, %arg1: i32) -> (i32, i32, i32) {
    %c1_i32 = arith.constant 1 : i32
    %0 = arith.addi %arg1, %c1_i32 : i32
    %c1_i32_0 = arith.constant 1 : i32
    %1 = arith.muli %0, %c1_i32_0 : i32
    %c0_i32 = arith.constant 0 : i32
    %c0_i32_1 = arith.constant 0 : i32
    return %arg0, %c0_i32, %1 : i32, i32, i32
  }
  func.func @transform_2(%arg0: i32, %arg1: i32) -> (i32, i32) {
    %c0_i32 = arith.constant 0 : i32
    %c0_i32_0 = arith.constant 0 : i32
    %c0_i32_1 = arith.constant 0 : i32
    return %c0_i32, %c0_i32_0 : i32, i32
  }
  func.func @transform_3(%arg0: i32, %arg1: i32) -> (i32, i32) {
    %c0_i32 = arith.constant 0 : i32
    %c0_i32_0 = arith.constant 0 : i32
    %c0_i32_1 = arith.constant 0 : i32
    return %c0_i32, %c0_i32_0 : i32, i32
  }
  func.func @transform_4(%arg0: i32, %arg1: i32) -> (i32, i32, i32) {
    %c0_i32 = arith.constant 0 : i32
    %c0_i32_0 = arith.constant 0 : i32
    return %arg0, %c0_i32, %arg1 : i32, i32, i32
  }
}

module attributes {stable_mosaic.version = 11 : i64} {
  func.func @kernel(%arg0: i32, %arg1: i32, %arg2: memref<1x16x128xbf16, #tpu.memory_space<vmem>>, %arg3: memref<1x16x128xbf16, #tpu.memory_space<vmem>>, %arg4: memref<16x48xbf16, #tpu.memory_space<vmem>>, %arg5: memref<16x1xf32, #tpu.memory_space<vmem>>, %arg6: memref<1x16x128xbf16, #tpu.memory_space<vmem>>) attributes {dimension_semantics = [#tpu.dimension_semantics<parallel>, #tpu.dimension_semantics<parallel>], iteration_bounds = array<i64: 2, 1>, scalar_prefetch = 0 : i64, scratch_operands = 0 : i64, tpu.core_type = #tpu.core_type<tc>, window_params = [{transform_indices = @transform_0, window_bounds = array<i64: 1, 16, 128>}, {transform_indices = @transform_1, window_bounds = array<i64: 1, 16, 128>}, {pipeline_mode = #tpu.pipeline_mode<synchronous>, transform_indices = @transform_2, window_bounds = array<i64: 16, 48>}, {pipeline_mode = #tpu.pipeline_mode<synchronous>, transform_indices = @transform_3, window_bounds = array<i64: 16, 1>}, {transform_indices = @transform_4, window_bounds = array<i64: 1, 16, 128>}]} {
    %c0 = arith.constant 0 : index
    %c0_0 = arith.constant 0 : index
    %c0_1 = arith.constant 0 : index
    %0 = vector.load %arg2[%c0, %c0_0, %c0_1] : memref<1x16x128xbf16, #tpu.memory_space<vmem>>, vector<1x16x128xbf16>
    %1 = vector.shape_cast %0 : vector<1x16x128xbf16> to vector<16x128xbf16>
    %c0_2 = arith.constant 0 : index
    %c0_3 = arith.constant 0 : index
    %c0_4 = arith.constant 0 : index
    %2 = vector.load %arg3[%c0_2, %c0_3, %c0_4] : memref<1x16x128xbf16, #tpu.memory_space<vmem>>, vector<1x16x128xbf16>
    %3 = vector.shape_cast %2 : vector<1x16x128xbf16> to vector<16x128xbf16>
    %4 = tpu.concatenate %1, %3 in 1 : vector<16x128xbf16>, vector<16x128xbf16> -> vector<16x256xbf16>
    %cst = arith.constant 0.000000e+00 : bf16
    %5 = vector.broadcast %cst : bf16 to vector<16x256xbf16>
    %6 = arith.cmpf oge, %4, %5 : vector<16x256xbf16>
    %cst_5 = arith.constant 1.000980e-01 : bf16
    %7 = vector.broadcast %cst_5 : bf16 to vector<16x256xbf16>
    %8 = arith.mulf %7, %4 : vector<16x256xbf16>
    %9 = arith.select %6, %4, %8 : vector<16x256xi1>, vector<16x256xbf16>
    %10 = vector.extract_strided_slice %9 {offsets = [0, 0], sizes = [16, 128], strides = [1, 1]} : vector<16x256xbf16> to vector<16x128xbf16>
    %11 = vector.extract_strided_slice %9 {offsets = [0, 1], sizes = [16, 128], strides = [1, 1]} : vector<16x256xbf16> to vector<16x128xbf16>
    %12 = vector.extract_strided_slice %9 {offsets = [0, 2], sizes = [16, 128], strides = [1, 1]} : vector<16x256xbf16> to vector<16x128xbf16>
    %13 = tpu.concatenate %10, %11, %12 in 0 : vector<16x128xbf16>, vector<16x128xbf16>, vector<16x128xbf16> -> vector<48x128xbf16>
    %c0_6 = arith.constant 0 : index
    %c0_7 = arith.constant 0 : index
    %14 = vector.load %arg4[%c0_6, %c0_7] : memref<16x48xbf16, #tpu.memory_space<vmem>>, vector<16x48xbf16>
    %cst_8 = arith.constant dense<0.000000e+00> : vector<16x128xf32>
    %15 = tpu.matmul %14, %13, %cst_8 {dimension_numbers = #tpu.dot_dimension_numbers<[1], [0], [0], [1], [0, 0, 1, 1], [], []>} : vector<16x48xbf16>, vector<48x128xbf16>, vector<16x128xf32> -> vector<16x128xf32>
    %c0_9 = arith.constant 0 : index
    %c0_10 = arith.constant 0 : index
    %16 = vector.load %arg5[%c0_9, %c0_10] : memref<16x1xf32, #tpu.memory_space<vmem>>, vector<16x1xf32>
    %17 = vector.broadcast %16 : vector<16x1xf32> to vector<16x128xf32>
    %18 = arith.addf %15, %17 : vector<16x128xf32>
    %c128_i32 = arith.constant 128 : i32
    %19 = arith.muli %arg1, %c128_i32 : i32
    %20 = tpu.iota {dimensions = array<i32: 1>} : vector<16x128xi32>
    %21 = vector.broadcast %19 : i32 to vector<16x128xi32>
    %22 = arith.addi %21, %20 : vector<16x128xi32>
    %c16_i32 = arith.constant 16 : i32
    %23 = vector.broadcast %c16_i32 : i32 to vector<16x128xi32>
    %24 = arith.cmpi slt, %22, %23 : vector<16x128xi32>
    %cst_11 = arith.constant 0.000000e+00 : f32
    %25 = vector.broadcast %cst_11 : f32 to vector<16x128xf32>
    %26 = arith.select %24, %18, %25 : vector<16x128xi1>, vector<16x128xf32>
    %27 = arith.truncf %26 : vector<16x128xf32> to vector<16x128xbf16>
    %c0_12 = arith.constant 0 : index
    %c0_13 = arith.constant 0 : index
    %c0_14 = arith.constant 0 : index
    %28 = vector.load %arg6[%c0_12, %c0_13, %c0_14] : memref<1x16x128xbf16, #tpu.memory_space<vmem>>, vector<1x16x128xbf16>
    %29 = vector.shape_cast %28 : vector<1x16x128xbf16> to vector<16x128xbf16>
    %30 = vector.shape_cast %27 : vector<16x128xbf16> to vector<1x16x128xbf16>
    tpu.vector_store %arg6[%c0_12, %c0_13, %c0_14], %30 {strides = array<i32>} : memref<1x16x128xbf16, #tpu.memory_space<vmem>>, vector<1x16x128xbf16>,
    return
  }
  func.func @transform_0(%arg0: i32, %arg1: i32) -> (i32, i32, i32) {
    %c0_i32 = arith.constant 0 : i32
    %c0_i32_0 = arith.constant 0 : i32
    return %arg0, %c0_i32, %arg1 : i32, i32, i32
  }
  func.func @transform_1(%arg0: i32, %arg1: i32) -> (i32, i32, i32) {
    %c1_i32 = arith.constant 1 : i32
    %0 = arith.addi %arg1, %c1_i32 : i32
    %c1_i32_0 = arith.constant 1 : i32
    %1 = arith.muli %0, %c1_i32_0 : i32
    %c0_i32 = arith.constant 0 : i32
    %c0_i32_1 = arith.constant 0 : i32
    return %arg0, %c0_i32, %1 : i32, i32, i32
  }
  func.func @transform_2(%arg0: i32, %arg1: i32) -> (i32, i32) {
    %c0_i32 = arith.constant 0 : i32
    %c0_i32_0 = arith.constant 0 : i32
    %c0_i32_1 = arith.constant 0 : i32
    return %c0_i32, %c0_i32_0 : i32, i32
  }
  func.func @transform_3(%arg0: i32, %arg1: i32) -> (i32, i32) {
    %c0_i32 = arith.constant 0 : i32
    %c0_i32_0 = arith.constant 0 : i32
    %c0_i32_1 = arith.constant 0 : i32
    return %c0_i32, %c0_i32_0 : i32, i32
  }
  func.func @transform_4(%arg0: i32, %arg1: i32) -> (i32, i32, i32) {
    %c0_i32 = arith.constant 0 : i32
    %c0_i32_0 = arith.constant 0 : i32
    return %arg0, %c0_i32, %arg1 : i32, i32, i32
  }
}

module attributes {stable_mosaic.version = 11 : i64} {
  func.func @kernel(%arg0: i32, %arg1: i32, %arg2: memref<1x32x128xbf16, #tpu.memory_space<vmem>>, %arg3: memref<1x32x128xbf16, #tpu.memory_space<vmem>>, %arg4: memref<16x64xbf16, #tpu.memory_space<vmem>>, %arg5: memref<16x1xf32, #tpu.memory_space<vmem>>, %arg6: memref<1x16x128xbf16, #tpu.memory_space<vmem>>) attributes {dimension_semantics = [#tpu.dimension_semantics<parallel>, #tpu.dimension_semantics<parallel>], iteration_bounds = array<i64: 2, 1>, scalar_prefetch = 0 : i64, scratch_operands = 0 : i64, tpu.core_type = #tpu.core_type<tc>, window_params = [{transform_indices = @transform_0, window_bounds = array<i64: 1, 32, 128>}, {transform_indices = @transform_1, window_bounds = array<i64: 1, 32, 128>}, {pipeline_mode = #tpu.pipeline_mode<synchronous>, transform_indices = @transform_2, window_bounds = array<i64: 16, 64>}, {pipeline_mode = #tpu.pipeline_mode<synchronous>, transform_indices = @transform_3, window_bounds = array<i64: 16, 1>}, {transform_indices = @transform_4, window_bounds = array<i64: 1, 16, 128>}]} {
    %c0 = arith.constant 0 : index
    %c0_0 = arith.constant 0 : index
    %c0_1 = arith.constant 0 : index
    %0 = vector.load %arg2[%c0, %c0_0, %c0_1] : memref<1x32x128xbf16, #tpu.memory_space<vmem>>, vector<1x32x128xbf16>
    %1 = vector.shape_cast %0 : vector<1x32x128xbf16> to vector<32x128xbf16>
    %c0_2 = arith.constant 0 : index
    %c0_3 = arith.constant 0 : index
    %c0_4 = arith.constant 0 : index
    %2 = vector.load %arg3[%c0_2, %c0_3, %c0_4] : memref<1x32x128xbf16, #tpu.memory_space<vmem>>, vector<1x32x128xbf16>
    %3 = vector.shape_cast %2 : vector<1x32x128xbf16> to vector<32x128xbf16>
    %4 = tpu.concatenate %1, %3 in 1 : vector<32x128xbf16>, vector<32x128xbf16> -> vector<32x256xbf16>
    %cst = arith.constant 0.000000e+00 : bf16
    %5 = vector.broadcast %cst : bf16 to vector<32x256xbf16>
    %6 = arith.cmpf oge, %4, %5 : vector<32x256xbf16>
    %cst_5 = arith.constant 1.000980e-01 : bf16
    %7 = vector.broadcast %cst_5 : bf16 to vector<32x256xbf16>
    %8 = arith.mulf %7, %4 : vector<32x256xbf16>
    %9 = arith.select %6, %4, %8 : vector<32x256xi1>, vector<32x256xbf16>
    %10 = vector.extract_strided_slice %9 {offsets = [0, 0], sizes = [32, 128], strides = [1, 1]} : vector<32x256xbf16> to vector<32x128xbf16>
    %11 = vector.extract_strided_slice %9 {offsets = [0, 1], sizes = [32, 128], strides = [1, 1]} : vector<32x256xbf16> to vector<32x128xbf16>
    %12 = tpu.concatenate %10, %11 in 0 : vector<32x128xbf16>, vector<32x128xbf16> -> vector<64x128xbf16>
    %c0_6 = arith.constant 0 : index
    %c0_7 = arith.constant 0 : index
    %13 = vector.load %arg4[%c0_6, %c0_7] : memref<16x64xbf16, #tpu.memory_space<vmem>>, vector<16x64xbf16>
    %cst_8 = arith.constant dense<0.000000e+00> : vector<16x128xf32>
    %14 = tpu.matmul %13, %12, %cst_8 {dimension_numbers = #tpu.dot_dimension_numbers<[1], [0], [0], [1], [0, 0, 1, 1], [], []>} : vector<16x64xbf16>, vector<64x128xbf16>, vector<16x128xf32> -> vector<16x128xf32>
    %c0_9 = arith.constant 0 : index
    %c0_10 = arith.constant 0 : index
    %15 = vector.load %arg5[%c0_9, %c0_10] : memref<16x1xf32, #tpu.memory_space<vmem>>, vector<16x1xf32>
    %16 = vector.broadcast %15 : vector<16x1xf32> to vector<16x128xf32>
    %17 = arith.addf %14, %16 : vector<16x128xf32>
    %c128_i32 = arith.constant 128 : i32
    %18 = arith.muli %arg1, %c128_i32 : i32
    %19 = tpu.iota {dimensions = array<i32: 1>} : vector<16x128xi32>
    %20 = vector.broadcast %18 : i32 to vector<16x128xi32>
    %21 = arith.addi %20, %19 : vector<16x128xi32>
    %c9_i32 = arith.constant 9 : i32
    %22 = vector.broadcast %c9_i32 : i32 to vector<16x128xi32>
    %23 = arith.cmpi slt, %21, %22 : vector<16x128xi32>
    %cst_11 = arith.constant 0.000000e+00 : f32
    %24 = vector.broadcast %cst_11 : f32 to vector<16x128xf32>
    %25 = arith.select %23, %17, %24 : vector<16x128xi1>, vector<16x128xf32>
    %26 = arith.truncf %25 : vector<16x128xf32> to vector<16x128xbf16>
    %c0_12 = arith.constant 0 : index
    %c0_13 = arith.constant 0 : index
    %c0_14 = arith.constant 0 : index
    %27 = vector.load %arg6[%c0_12, %c0_13, %c0_14] : memref<1x16x128xbf16, #tpu.memory_space<vmem>>, vector<1x16x128xbf16>
    %28 = vector.shape_cast %27 : vector<1x16x128xbf16> to vector<16x128xbf16>
    %29 = vector.shape_cast %26 : vector<16x128xbf16> to vector<1x16x128xbf16>
    tpu.vector_store %arg6[%c0_12, %c0_13, %c0_14], %29 {strides = array<i32>} : memref<1x16x128xbf16, #tpu.memory_space<vmem>>, vector<1x16x128xbf16>,
    return
  }
  func.func @transform_0(%arg0: i32, %arg1: i32) -> (i32, i32, i32) {
    %c0_i32 = arith.constant 0 : i32
    %c0_i32_0 = arith.constant 0 : i32
    return %arg0, %c0_i32, %arg1 : i32, i32, i32
  }
  func.func @transform_1(%arg0: i32, %arg1: i32) -> (i32, i32, i32) {
    %c1_i32 = arith.constant 1 : i32
    %0 = arith.addi %arg1, %c1_i32 : i32
    %c1_i32_0 = arith.constant 1 : i32
    %1 = arith.muli %0, %c1_i32_0 : i32
    %c0_i32 = arith.constant 0 : i32
    %c0_i32_1 = arith.constant 0 : i32
    return %arg0, %c0_i32, %1 : i32, i32, i32
  }
  func.func @transform_2(%arg0: i32, %arg1: i32) -> (i32, i32) {
    %c0_i32 = arith.constant 0 : i32
    %c0_i32_0 = arith.constant 0 : i32
    %c0_i32_1 = arith.constant 0 : i32
    return %c0_i32, %c0_i32_0 : i32, i32
  }
  func.func @transform_3(%arg0: i32, %arg1: i32) -> (i32, i32) {
    %c0_i32 = arith.constant 0 : i32
    %c0_i32_0 = arith.constant 0 : i32
    %c0_i32_1 = arith.constant 0 : i32
    return %c0_i32, %c0_i32_0 : i32, i32
  }
  func.func @transform_4(%arg0: i32, %arg1: i32) -> (i32, i32, i32) {
    %c0_i32 = arith.constant 0 : i32
    %c0_i32_0 = arith.constant 0 : i32
    return %arg0, %c0_i32, %arg1 : i32, i32, i32
  }
}

module attributes {stable_mosaic.version = 11 : i64} {
  func.func @kernel(%arg0: i32, %arg1: i32, %arg2: memref<1x16x128xbf16, #tpu.memory_space<vmem>>, %arg3: memref<1x16x128xbf16, #tpu.memory_space<vmem>>, %arg4: memref<16x48xbf16, #tpu.memory_space<vmem>>, %arg5: memref<16x1xf32, #tpu.memory_space<vmem>>, %arg6: memref<1x16x128xbf16, #tpu.memory_space<vmem>>, %arg7: memref<1x16x128xbf16, #tpu.memory_space<vmem>>) attributes {dimension_semantics = [#tpu.dimension_semantics<parallel>, #tpu.dimension_semantics<parallel>], iteration_bounds = array<i64: 2, 1>, scalar_prefetch = 0 : i64, scratch_operands = 0 : i64, tpu.core_type = #tpu.core_type<tc>, window_params = [{transform_indices = @transform_0, window_bounds = array<i64: 1, 16, 128>}, {transform_indices = @transform_1, window_bounds = array<i64: 1, 16, 128>}, {pipeline_mode = #tpu.pipeline_mode<synchronous>, transform_indices = @transform_2, window_bounds = array<i64: 16, 48>}, {pipeline_mode = #tpu.pipeline_mode<synchronous>, transform_indices = @transform_3, window_bounds = array<i64: 16, 1>}, {transform_indices = @transform_4, window_bounds = array<i64: 1, 16, 128>}, {transform_indices = @transform_5, window_bounds = array<i64: 1, 16, 128>}]} {
    %c0 = arith.constant 0 : index
    %c0_0 = arith.constant 0 : index
    %c0_1 = arith.constant 0 : index
    %0 = vector.load %arg2[%c0, %c0_0, %c0_1] : memref<1x16x128xbf16, #tpu.memory_space<vmem>>, vector<1x16x128xbf16>
    %1 = vector.shape_cast %0 : vector<1x16x128xbf16> to vector<16x128xbf16>
    %c0_2 = arith.constant 0 : index
    %c0_3 = arith.constant 0 : index
    %c0_4 = arith.constant 0 : index
    %2 = vector.load %arg3[%c0_2, %c0_3, %c0_4] : memref<1x16x128xbf16, #tpu.memory_space<vmem>>, vector<1x16x128xbf16>
    %3 = vector.shape_cast %2 : vector<1x16x128xbf16> to vector<16x128xbf16>
    %4 = tpu.concatenate %1, %3 in 1 : vector<16x128xbf16>, vector<16x128xbf16> -> vector<16x256xbf16>
    %cst = arith.constant 0.000000e+00 : bf16
    %5 = vector.broadcast %cst : bf16 to vector<16x256xbf16>
    %6 = arith.cmpf oge, %4, %5 : vector<16x256xbf16>
    %cst_5 = arith.constant 1.000980e-01 : bf16
    %7 = vector.broadcast %cst_5 : bf16 to vector<16x256xbf16>
    %8 = arith.mulf %7, %4 : vector<16x256xbf16>
    %9 = arith.select %6, %4, %8 : vector<16x256xi1>, vector<16x256xbf16>
    %10 = vector.extract_strided_slice %9 {offsets = [0, 0], sizes = [16, 128], strides = [1, 1]} : vector<16x256xbf16> to vector<16x128xbf16>
    %11 = vector.extract_strided_slice %9 {offsets = [0, 1], sizes = [16, 128], strides = [1, 1]} : vector<16x256xbf16> to vector<16x128xbf16>
    %12 = vector.extract_strided_slice %9 {offsets = [0, 2], sizes = [16, 128], strides = [1, 1]} : vector<16x256xbf16> to vector<16x128xbf16>
    %13 = tpu.concatenate %10, %11, %12 in 0 : vector<16x128xbf16>, vector<16x128xbf16>, vector<16x128xbf16> -> vector<48x128xbf16>
    %c0_6 = arith.constant 0 : index
    %c0_7 = arith.constant 0 : index
    %14 = vector.load %arg4[%c0_6, %c0_7] : memref<16x48xbf16, #tpu.memory_space<vmem>>, vector<16x48xbf16>
    %cst_8 = arith.constant dense<0.000000e+00> : vector<16x128xf32>
    %15 = tpu.matmul %14, %13, %cst_8 {dimension_numbers = #tpu.dot_dimension_numbers<[1], [0], [0], [1], [0, 0, 1, 1], [], []>} : vector<16x48xbf16>, vector<48x128xbf16>, vector<16x128xf32> -> vector<16x128xf32>
    %c0_9 = arith.constant 0 : index
    %c0_10 = arith.constant 0 : index
    %16 = vector.load %arg5[%c0_9, %c0_10] : memref<16x1xf32, #tpu.memory_space<vmem>>, vector<16x1xf32>
    %17 = vector.broadcast %16 : vector<16x1xf32> to vector<16x128xf32>
    %18 = arith.addf %15, %17 : vector<16x128xf32>
    %c0_11 = arith.constant 0 : index
    %c0_12 = arith.constant 0 : index
    %c0_13 = arith.constant 0 : index
    %19 = vector.load %arg6[%c0_11, %c0_12, %c0_13] : memref<1x16x128xbf16, #tpu.memory_space<vmem>>, vector<1x16x128xbf16>
    %20 = vector.shape_cast %19 : vector<1x16x128xbf16> to vector<16x128xbf16>
    %21 = arith.extf %20 : vector<16x128xbf16> to vector<16x128xf32>
    %22 = arith.addf %18, %21 : vector<16x128xf32>
    %c128_i32 = arith.constant 128 : i32
    %23 = arith.muli %arg1, %c128_i32 : i32
    %24 = tpu.iota {dimensions = array<i32: 1>} : vector<16x128xi32>
    %25 = vector.broadcast %23 : i32 to vector<16x128xi32>
    %26 = arith.addi %25, %24 : vector<16x128xi32>
    %c16_i32 = arith.constant 16 : i32
    %27 = vector.broadcast %c16_i32 : i32 to vector<16x128xi32>
    %28 = arith.cmpi slt, %26, %27 : vector<16x128xi32>
    %cst_14 = arith.constant 0.000000e+00 : f32
    %29 = vector.broadcast %cst_14 : f32 to vector<16x128xf32>
    %30 = arith.select %28, %22, %29 : vector<16x128xi1>, vector<16x128xf32>
    %31 = arith.truncf %30 : vector<16x128xf32> to vector<16x128xbf16>
    %c0_15 = arith.constant 0 : index
    %c0_16 = arith.constant 0 : index
    %c0_17 = arith.constant 0 : index
    %32 = vector.load %arg7[%c0_15, %c0_16, %c0_17] : memref<1x16x128xbf16, #tpu.memory_space<vmem>>, vector<1x16x128xbf16>
    %33 = vector.shape_cast %32 : vector<1x16x128xbf16> to vector<16x128xbf16>
    %34 = vector.shape_cast %31 : vector<16x128xbf16> to vector<1x16x128xbf16>
    tpu.vector_store %arg7[%c0_15, %c0_16, %c0_17], %34 {strides = array<i32>} : memref<1x16x128xbf16, #tpu.memory_space<vmem>>, vector<1x16x128xbf16>,
    return
  }
  func.func @transform_0(%arg0: i32, %arg1: i32) -> (i32, i32, i32) {
    %c0_i32 = arith.constant 0 : i32
    %c0_i32_0 = arith.constant 0 : i32
    return %arg0, %c0_i32, %arg1 : i32, i32, i32
  }
  func.func @transform_1(%arg0: i32, %arg1: i32) -> (i32, i32, i32) {
    %c1_i32 = arith.constant 1 : i32
    %0 = arith.addi %arg1, %c1_i32 : i32
    %c1_i32_0 = arith.constant 1 : i32
    %1 = arith.muli %0, %c1_i32_0 : i32
    %c0_i32 = arith.constant 0 : i32
    %c0_i32_1 = arith.constant 0 : i32
    return %arg0, %c0_i32, %1 : i32, i32, i32
  }
  func.func @transform_2(%arg0: i32, %arg1: i32) -> (i32, i32) {
    %c0_i32 = arith.constant 0 : i32
    %c0_i32_0 = arith.constant 0 : i32
    %c0_i32_1 = arith.constant 0 : i32
    return %c0_i32, %c0_i32_0 : i32, i32
  }
  func.func @transform_3(%arg0: i32, %arg1: i32) -> (i32, i32) {
    %c0_i32 = arith.constant 0 : i32
    %c0_i32_0 = arith.constant 0 : i32
    %c0_i32_1 = arith.constant 0 : i32
    return %c0_i32, %c0_i32_0 : i32, i32
  }
  func.func @transform_4(%arg0: i32, %arg1: i32) -> (i32, i32, i32) {
    %c0_i32 = arith.constant 0 : i32
    %c0_i32_0 = arith.constant 0 : i32
    return %arg0, %c0_i32, %arg1 : i32, i32, i32
  }
  func.func @transform_5(%arg0: i32, %arg1: i32) -> (i32, i32, i32) {
    %c0_i32 = arith.constant 0 : i32
    %c0_i32_0 = arith.constant 0 : i32
    return %arg0, %c0_i32, %arg1 : i32, i32, i32
  }
}

module attributes {stable_mosaic.version = 11 : i64} {
  func.func @kernel(%arg0: i32, %arg1: i32, %arg2: memref<1x16x128xbf16, #tpu.memory_space<vmem>>, %arg3: memref<1x16x128xbf16, #tpu.memory_space<vmem>>, %arg4: memref<16x80xbf16, #tpu.memory_space<vmem>>, %arg5: memref<16x1xf32, #tpu.memory_space<vmem>>, %arg6: memref<1x16x128xbf16, #tpu.memory_space<vmem>>) attributes {dimension_semantics = [#tpu.dimension_semantics<parallel>, #tpu.dimension_semantics<parallel>], iteration_bounds = array<i64: 2, 1>, scalar_prefetch = 0 : i64, scratch_operands = 0 : i64, tpu.core_type = #tpu.core_type<tc>, window_params = [{transform_indices = @transform_0, window_bounds = array<i64: 1, 16, 128>}, {transform_indices = @transform_1, window_bounds = array<i64: 1, 16, 128>}, {pipeline_mode = #tpu.pipeline_mode<synchronous>, transform_indices = @transform_2, window_bounds = array<i64: 16, 80>}, {pipeline_mode = #tpu.pipeline_mode<synchronous>, transform_indices = @transform_3, window_bounds = array<i64: 16, 1>}, {transform_indices = @transform_4, window_bounds = array<i64: 1, 16, 128>}]} {
    %c0 = arith.constant 0 : index
    %c0_0 = arith.constant 0 : index
    %c0_1 = arith.constant 0 : index
    %0 = vector.load %arg2[%c0, %c0_0, %c0_1] : memref<1x16x128xbf16, #tpu.memory_space<vmem>>, vector<1x16x128xbf16>
    %1 = vector.shape_cast %0 : vector<1x16x128xbf16> to vector<16x128xbf16>
    %c0_2 = arith.constant 0 : index
    %c0_3 = arith.constant 0 : index
    %c0_4 = arith.constant 0 : index
    %2 = vector.load %arg3[%c0_2, %c0_3, %c0_4] : memref<1x16x128xbf16, #tpu.memory_space<vmem>>, vector<1x16x128xbf16>
    %3 = vector.shape_cast %2 : vector<1x16x128xbf16> to vector<16x128xbf16>
    %4 = tpu.concatenate %1, %3 in 1 : vector<16x128xbf16>, vector<16x128xbf16> -> vector<16x256xbf16>
    %cst = arith.constant 0.000000e+00 : bf16
    %5 = vector.broadcast %cst : bf16 to vector<16x256xbf16>
    %6 = arith.cmpf oge, %4, %5 : vector<16x256xbf16>
    %cst_5 = arith.constant 1.000980e-01 : bf16
    %7 = vector.broadcast %cst_5 : bf16 to vector<16x256xbf16>
    %8 = arith.mulf %7, %4 : vector<16x256xbf16>
    %9 = arith.select %6, %4, %8 : vector<16x256xi1>, vector<16x256xbf16>
    %10 = vector.extract_strided_slice %9 {offsets = [0, 0], sizes = [16, 128], strides = [1, 1]} : vector<16x256xbf16> to vector<16x128xbf16>
    %11 = vector.extract_strided_slice %9 {offsets = [0, 1], sizes = [16, 128], strides = [1, 1]} : vector<16x256xbf16> to vector<16x128xbf16>
    %12 = vector.extract_strided_slice %9 {offsets = [0, 2], sizes = [16, 128], strides = [1, 1]} : vector<16x256xbf16> to vector<16x128xbf16>
    %13 = vector.extract_strided_slice %9 {offsets = [0, 3], sizes = [16, 128], strides = [1, 1]} : vector<16x256xbf16> to vector<16x128xbf16>
    %14 = vector.extract_strided_slice %9 {offsets = [0, 4], sizes = [16, 128], strides = [1, 1]} : vector<16x256xbf16> to vector<16x128xbf16>
    %15 = tpu.concatenate %10, %11, %12, %13, %14 in 0 : vector<16x128xbf16>, vector<16x128xbf16>, vector<16x128xbf16>, vector<16x128xbf16>, vector<16x128xbf16> -> vector<80x128xbf16>
    %c0_6 = arith.constant 0 : index
    %c0_7 = arith.constant 0 : index
    %16 = vector.load %arg4[%c0_6, %c0_7] : memref<16x80xbf16, #tpu.memory_space<vmem>>, vector<16x80xbf16>
    %cst_8 = arith.constant dense<0.000000e+00> : vector<16x128xf32>
    %17 = tpu.matmul %16, %15, %cst_8 {dimension_numbers = #tpu.dot_dimension_numbers<[1], [0], [0], [1], [0, 0, 1, 1], [], []>} : vector<16x80xbf16>, vector<80x128xbf16>, vector<16x128xf32> -> vector<16x128xf32>
    %c0_9 = arith.constant 0 : index
    %c0_10 = arith.constant 0 : index
    %18 = vector.load %arg5[%c0_9, %c0_10] : memref<16x1xf32, #tpu.memory_space<vmem>>, vector<16x1xf32>
    %19 = vector.broadcast %18 : vector<16x1xf32> to vector<16x128xf32>
    %20 = arith.addf %17, %19 : vector<16x128xf32>
    %c128_i32 = arith.constant 128 : i32
    %21 = arith.muli %arg1, %c128_i32 : i32
    %22 = tpu.iota {dimensions = array<i32: 1>} : vector<16x128xi32>
    %23 = vector.broadcast %21 : i32 to vector<16x128xi32>
    %24 = arith.addi %23, %22 : vector<16x128xi32>
    %c16_i32 = arith.constant 16 : i32
    %25 = vector.broadcast %c16_i32 : i32 to vector<16x128xi32>
    %26 = arith.cmpi slt, %24, %25 : vector<16x128xi32>
    %cst_11 = arith.constant 0.000000e+00 : f32
    %27 = vector.broadcast %cst_11 : f32 to vector<16x128xf32>
    %28 = arith.select %26, %20, %27 : vector<16x128xi1>, vector<16x128xf32>
    %29 = arith.truncf %28 : vector<16x128xf32> to vector<16x128xbf16>
    %c0_12 = arith.constant 0 : index
    %c0_13 = arith.constant 0 : index
    %c0_14 = arith.constant 0 : index
    %30 = vector.load %arg6[%c0_12, %c0_13, %c0_14] : memref<1x16x128xbf16, #tpu.memory_space<vmem>>, vector<1x16x128xbf16>
    %31 = vector.shape_cast %30 : vector<1x16x128xbf16> to vector<16x128xbf16>
    %32 = vector.shape_cast %29 : vector<16x128xbf16> to vector<1x16x128xbf16>
    tpu.vector_store %arg6[%c0_12, %c0_13, %c0_14], %32 {strides = array<i32>} : memref<1x16x128xbf16, #tpu.memory_space<vmem>>, vector<1x16x128xbf16>,
    return
  }
  func.func @transform_0(%arg0: i32, %arg1: i32) -> (i32, i32, i32) {
    %c0_i32 = arith.constant 0 : i32
    %c0_i32_0 = arith.constant 0 : i32
    return %arg0, %c0_i32, %arg1 : i32, i32, i32
  }
  func.func @transform_1(%arg0: i32, %arg1: i32) -> (i32, i32, i32) {
    %c1_i32 = arith.constant 1 : i32
    %0 = arith.addi %arg1, %c1_i32 : i32
    %c1_i32_0 = arith.constant 1 : i32
    %1 = arith.muli %0, %c1_i32_0 : i32
    %c0_i32 = arith.constant 0 : i32
    %c0_i32_1 = arith.constant 0 : i32
    return %arg0, %c0_i32, %1 : i32, i32, i32
  }
  func.func @transform_2(%arg0: i32, %arg1: i32) -> (i32, i32) {
    %c0_i32 = arith.constant 0 : i32
    %c0_i32_0 = arith.constant 0 : i32
    %c0_i32_1 = arith.constant 0 : i32
    return %c0_i32, %c0_i32_0 : i32, i32
  }
  func.func @transform_3(%arg0: i32, %arg1: i32) -> (i32, i32) {
    %c0_i32 = arith.constant 0 : i32
    %c0_i32_0 = arith.constant 0 : i32
    %c0_i32_1 = arith.constant 0 : i32
    return %c0_i32, %c0_i32_0 : i32, i32
  }
  func.func @transform_4(%arg0: i32, %arg1: i32) -> (i32, i32, i32) {
    %c0_i32 = arith.constant 0 : i32
    %c0_i32_0 = arith.constant 0 : i32
    return %arg0, %c0_i32, %arg1 : i32, i32, i32
  }
}

module attributes {stable_mosaic.version = 11 : i64} {
  func.func @kernel(%arg0: i32, %arg1: i32, %arg2: memref<1x16x128xbf16, #tpu.memory_space<vmem>>, %arg3: memref<1x16x128xbf16, #tpu.memory_space<vmem>>, %arg4: memref<16x80xbf16, #tpu.memory_space<vmem>>, %arg5: memref<16x1xf32, #tpu.memory_space<vmem>>, %arg6: memref<1x16x128xbf16, #tpu.memory_space<vmem>>, %arg7: memref<1x16x128xbf16, #tpu.memory_space<vmem>>) attributes {dimension_semantics = [#tpu.dimension_semantics<parallel>, #tpu.dimension_semantics<parallel>], iteration_bounds = array<i64: 2, 1>, scalar_prefetch = 0 : i64, scratch_operands = 0 : i64, tpu.core_type = #tpu.core_type<tc>, window_params = [{transform_indices = @transform_0, window_bounds = array<i64: 1, 16, 128>}, {transform_indices = @transform_1, window_bounds = array<i64: 1, 16, 128>}, {pipeline_mode = #tpu.pipeline_mode<synchronous>, transform_indices = @transform_2, window_bounds = array<i64: 16, 80>}, {pipeline_mode = #tpu.pipeline_mode<synchronous>, transform_indices = @transform_3, window_bounds = array<i64: 16, 1>}, {transform_indices = @transform_4, window_bounds = array<i64: 1, 16, 128>}, {transform_indices = @transform_5, window_bounds = array<i64: 1, 16, 128>}]} {
    %c0 = arith.constant 0 : index
    %c0_0 = arith.constant 0 : index
    %c0_1 = arith.constant 0 : index
    %0 = vector.load %arg2[%c0, %c0_0, %c0_1] : memref<1x16x128xbf16, #tpu.memory_space<vmem>>, vector<1x16x128xbf16>
    %1 = vector.shape_cast %0 : vector<1x16x128xbf16> to vector<16x128xbf16>
    %c0_2 = arith.constant 0 : index
    %c0_3 = arith.constant 0 : index
    %c0_4 = arith.constant 0 : index
    %2 = vector.load %arg3[%c0_2, %c0_3, %c0_4] : memref<1x16x128xbf16, #tpu.memory_space<vmem>>, vector<1x16x128xbf16>
    %3 = vector.shape_cast %2 : vector<1x16x128xbf16> to vector<16x128xbf16>
    %4 = tpu.concatenate %1, %3 in 1 : vector<16x128xbf16>, vector<16x128xbf16> -> vector<16x256xbf16>
    %cst = arith.constant 0.000000e+00 : bf16
    %5 = vector.broadcast %cst : bf16 to vector<16x256xbf16>
    %6 = arith.cmpf oge, %4, %5 : vector<16x256xbf16>
    %cst_5 = arith.constant 1.000980e-01 : bf16
    %7 = vector.broadcast %cst_5 : bf16 to vector<16x256xbf16>
    %8 = arith.mulf %7, %4 : vector<16x256xbf16>
    %9 = arith.select %6, %4, %8 : vector<16x256xi1>, vector<16x256xbf16>
    %10 = vector.extract_strided_slice %9 {offsets = [0, 0], sizes = [16, 128], strides = [1, 1]} : vector<16x256xbf16> to vector<16x128xbf16>
    %11 = vector.extract_strided_slice %9 {offsets = [0, 1], sizes = [16, 128], strides = [1, 1]} : vector<16x256xbf16> to vector<16x128xbf16>
    %12 = vector.extract_strided_slice %9 {offsets = [0, 2], sizes = [16, 128], strides = [1, 1]} : vector<16x256xbf16> to vector<16x128xbf16>
    %13 = vector.extract_strided_slice %9 {offsets = [0, 3], sizes = [16, 128], strides = [1, 1]} : vector<16x256xbf16> to vector<16x128xbf16>
    %14 = vector.extract_strided_slice %9 {offsets = [0, 4], sizes = [16, 128], strides = [1, 1]} : vector<16x256xbf16> to vector<16x128xbf16>
    %15 = tpu.concatenate %10, %11, %12, %13, %14 in 0 : vector<16x128xbf16>, vector<16x128xbf16>, vector<16x128xbf16>, vector<16x128xbf16>, vector<16x128xbf16> -> vector<80x128xbf16>
    %c0_6 = arith.constant 0 : index
    %c0_7 = arith.constant 0 : index
    %16 = vector.load %arg4[%c0_6, %c0_7] : memref<16x80xbf16, #tpu.memory_space<vmem>>, vector<16x80xbf16>
    %cst_8 = arith.constant dense<0.000000e+00> : vector<16x128xf32>
    %17 = tpu.matmul %16, %15, %cst_8 {dimension_numbers = #tpu.dot_dimension_numbers<[1], [0], [0], [1], [0, 0, 1, 1], [], []>} : vector<16x80xbf16>, vector<80x128xbf16>, vector<16x128xf32> -> vector<16x128xf32>
    %c0_9 = arith.constant 0 : index
    %c0_10 = arith.constant 0 : index
    %18 = vector.load %arg5[%c0_9, %c0_10] : memref<16x1xf32, #tpu.memory_space<vmem>>, vector<16x1xf32>
    %19 = vector.broadcast %18 : vector<16x1xf32> to vector<16x128xf32>
    %20 = arith.addf %17, %19 : vector<16x128xf32>
    %c0_11 = arith.constant 0 : index
    %c0_12 = arith.constant 0 : index
    %c0_13 = arith.constant 0 : index
    %21 = vector.load %arg6[%c0_11, %c0_12, %c0_13] : memref<1x16x128xbf16, #tpu.memory_space<vmem>>, vector<1x16x128xbf16>
    %22 = vector.shape_cast %21 : vector<1x16x128xbf16> to vector<16x128xbf16>
    %23 = arith.extf %22 : vector<16x128xbf16> to vector<16x128xf32>
    %24 = arith.addf %20, %23 : vector<16x128xf32>
    %c128_i32 = arith.constant 128 : i32
    %25 = arith.muli %arg1, %c128_i32 : i32
    %26 = tpu.iota {dimensions = array<i32: 1>} : vector<16x128xi32>
    %27 = vector.broadcast %25 : i32 to vector<16x128xi32>
    %28 = arith.addi %27, %26 : vector<16x128xi32>
    %c16_i32 = arith.constant 16 : i32
    %29 = vector.broadcast %c16_i32 : i32 to vector<16x128xi32>
    %30 = arith.cmpi slt, %28, %29 : vector<16x128xi32>
    %cst_14 = arith.constant 0.000000e+00 : f32
    %31 = vector.broadcast %cst_14 : f32 to vector<16x128xf32>
    %32 = arith.select %30, %24, %31 : vector<16x128xi1>, vector<16x128xf32>
    %33 = arith.truncf %32 : vector<16x128xf32> to vector<16x128xbf16>
    %c0_15 = arith.constant 0 : index
    %c0_16 = arith.constant 0 : index
    %c0_17 = arith.constant 0 : index
    %34 = vector.load %arg7[%c0_15, %c0_16, %c0_17] : memref<1x16x128xbf16, #tpu.memory_space<vmem>>, vector<1x16x128xbf16>
    %35 = vector.shape_cast %34 : vector<1x16x128xbf16> to vector<16x128xbf16>
    %36 = vector.shape_cast %33 : vector<16x128xbf16> to vector<1x16x128xbf16>
    tpu.vector_store %arg7[%c0_15, %c0_16, %c0_17], %36 {strides = array<i32>} : memref<1x16x128xbf16, #tpu.memory_space<vmem>>, vector<1x16x128xbf16>,
    return
  }
  func.func @transform_0(%arg0: i32, %arg1: i32) -> (i32, i32, i32) {
    %c0_i32 = arith.constant 0 : i32
    %c0_i32_0 = arith.constant 0 : i32
    return %arg0, %c0_i32, %arg1 : i32, i32, i32
  }
  func.func @transform_1(%arg0: i32, %arg1: i32) -> (i32, i32, i32) {
    %c1_i32 = arith.constant 1 : i32
    %0 = arith.addi %arg1, %c1_i32 : i32
    %c1_i32_0 = arith.constant 1 : i32
    %1 = arith.muli %0, %c1_i32_0 : i32
    %c0_i32 = arith.constant 0 : i32
    %c0_i32_1 = arith.constant 0 : i32
    return %arg0, %c0_i32, %1 : i32, i32, i32
  }
  func.func @transform_2(%arg0: i32, %arg1: i32) -> (i32, i32) {
    %c0_i32 = arith.constant 0 : i32
    %c0_i32_0 = arith.constant 0 : i32
    %c0_i32_1 = arith.constant 0 : i32
    return %c0_i32, %c0_i32_0 : i32, i32
  }
  func.func @transform_3(%arg0: i32, %arg1: i32) -> (i32, i32) {
    %c0_i32 = arith.constant 0 : i32
    %c0_i32_0 = arith.constant 0 : i32
    %c0_i32_1 = arith.constant 0 : i32
    return %c0_i32, %c0_i32_0 : i32, i32
  }
  func.func @transform_4(%arg0: i32, %arg1: i32) -> (i32, i32, i32) {
    %c0_i32 = arith.constant 0 : i32
    %c0_i32_0 = arith.constant 0 : i32
    return %arg0, %c0_i32, %arg1 : i32, i32, i32
  }
  func.func @transform_5(%arg0: i32, %arg1: i32) -> (i32, i32, i32) {
    %c0_i32 = arith.constant 0 : i32
    %c0_i32_0 = arith.constant 0 : i32
    return %arg0, %c0_i32, %arg1 : i32, i32, i32
  }
}

module attributes {stable_mosaic.version = 11 : i64} {
  func.func @kernel(%arg0: i32, %arg1: i32, %arg2: memref<1x16x128xbf16, #tpu.memory_space<vmem>>, %arg3: memref<1x16x128xbf16, #tpu.memory_space<vmem>>, %arg4: memref<16x80xbf16, #tpu.memory_space<vmem>>, %arg5: memref<16x1xf32, #tpu.memory_space<vmem>>, %arg6: memref<1x16x128xbf16, #tpu.memory_space<vmem>>) attributes {dimension_semantics = [#tpu.dimension_semantics<parallel>, #tpu.dimension_semantics<parallel>], iteration_bounds = array<i64: 2, 1>, scalar_prefetch = 0 : i64, scratch_operands = 0 : i64, tpu.core_type = #tpu.core_type<tc>, window_params = [{transform_indices = @transform_0, window_bounds = array<i64: 1, 16, 128>}, {transform_indices = @transform_1, window_bounds = array<i64: 1, 16, 128>}, {pipeline_mode = #tpu.pipeline_mode<synchronous>, transform_indices = @transform_2, window_bounds = array<i64: 16, 80>}, {pipeline_mode = #tpu.pipeline_mode<synchronous>, transform_indices = @transform_3, window_bounds = array<i64: 16, 1>}, {transform_indices = @transform_4, window_bounds = array<i64: 1, 16, 128>}]} {
    %c0 = arith.constant 0 : index
    %c0_0 = arith.constant 0 : index
    %c0_1 = arith.constant 0 : index
    %0 = vector.load %arg2[%c0, %c0_0, %c0_1] : memref<1x16x128xbf16, #tpu.memory_space<vmem>>, vector<1x16x128xbf16>
    %1 = vector.shape_cast %0 : vector<1x16x128xbf16> to vector<16x128xbf16>
    %c0_2 = arith.constant 0 : index
    %c0_3 = arith.constant 0 : index
    %c0_4 = arith.constant 0 : index
    %2 = vector.load %arg3[%c0_2, %c0_3, %c0_4] : memref<1x16x128xbf16, #tpu.memory_space<vmem>>, vector<1x16x128xbf16>
    %3 = vector.shape_cast %2 : vector<1x16x128xbf16> to vector<16x128xbf16>
    %4 = tpu.concatenate %1, %3 in 1 : vector<16x128xbf16>, vector<16x128xbf16> -> vector<16x256xbf16>
    %cst = arith.constant 0.000000e+00 : bf16
    %5 = vector.broadcast %cst : bf16 to vector<16x256xbf16>
    %6 = arith.cmpf oge, %4, %5 : vector<16x256xbf16>
    %cst_5 = arith.constant 1.000980e-01 : bf16
    %7 = vector.broadcast %cst_5 : bf16 to vector<16x256xbf16>
    %8 = arith.mulf %7, %4 : vector<16x256xbf16>
    %9 = arith.select %6, %4, %8 : vector<16x256xi1>, vector<16x256xbf16>
    %10 = vector.extract_strided_slice %9 {offsets = [0, 0], sizes = [16, 128], strides = [1, 1]} : vector<16x256xbf16> to vector<16x128xbf16>
    %11 = vector.extract_strided_slice %9 {offsets = [0, 3], sizes = [16, 128], strides = [1, 1]} : vector<16x256xbf16> to vector<16x128xbf16>
    %12 = vector.extract_strided_slice %9 {offsets = [0, 6], sizes = [16, 128], strides = [1, 1]} : vector<16x256xbf16> to vector<16x128xbf16>
    %13 = vector.extract_strided_slice %9 {offsets = [0, 9], sizes = [16, 128], strides = [1, 1]} : vector<16x256xbf16> to vector<16x128xbf16>
    %14 = vector.extract_strided_slice %9 {offsets = [0, 12], sizes = [16, 128], strides = [1, 1]} : vector<16x256xbf16> to vector<16x128xbf16>
    %15 = tpu.concatenate %10, %11, %12, %13, %14 in 0 : vector<16x128xbf16>, vector<16x128xbf16>, vector<16x128xbf16>, vector<16x128xbf16>, vector<16x128xbf16> -> vector<80x128xbf16>
    %c0_6 = arith.constant 0 : index
    %c0_7 = arith.constant 0 : index
    %16 = vector.load %arg4[%c0_6, %c0_7] : memref<16x80xbf16, #tpu.memory_space<vmem>>, vector<16x80xbf16>
    %cst_8 = arith.constant dense<0.000000e+00> : vector<16x128xf32>
    %17 = tpu.matmul %16, %15, %cst_8 {dimension_numbers = #tpu.dot_dimension_numbers<[1], [0], [0], [1], [0, 0, 1, 1], [], []>} : vector<16x80xbf16>, vector<80x128xbf16>, vector<16x128xf32> -> vector<16x128xf32>
    %c0_9 = arith.constant 0 : index
    %c0_10 = arith.constant 0 : index
    %18 = vector.load %arg5[%c0_9, %c0_10] : memref<16x1xf32, #tpu.memory_space<vmem>>, vector<16x1xf32>
    %19 = vector.broadcast %18 : vector<16x1xf32> to vector<16x128xf32>
    %20 = arith.addf %17, %19 : vector<16x128xf32>
    %c128_i32 = arith.constant 128 : i32
    %21 = arith.muli %arg1, %c128_i32 : i32
    %22 = tpu.iota {dimensions = array<i32: 1>} : vector<16x128xi32>
    %23 = vector.broadcast %21 : i32 to vector<16x128xi32>
    %24 = arith.addi %23, %22 : vector<16x128xi32>
    %c16_i32 = arith.constant 16 : i32
    %25 = vector.broadcast %c16_i32 : i32 to vector<16x128xi32>
    %26 = arith.cmpi slt, %24, %25 : vector<16x128xi32>
    %cst_11 = arith.constant 0.000000e+00 : f32
    %27 = vector.broadcast %cst_11 : f32 to vector<16x128xf32>
    %28 = arith.select %26, %20, %27 : vector<16x128xi1>, vector<16x128xf32>
    %29 = arith.truncf %28 : vector<16x128xf32> to vector<16x128xbf16>
    %c0_12 = arith.constant 0 : index
    %c0_13 = arith.constant 0 : index
    %c0_14 = arith.constant 0 : index
    %30 = vector.load %arg6[%c0_12, %c0_13, %c0_14] : memref<1x16x128xbf16, #tpu.memory_space<vmem>>, vector<1x16x128xbf16>
    %31 = vector.shape_cast %30 : vector<1x16x128xbf16> to vector<16x128xbf16>
    %32 = vector.shape_cast %29 : vector<16x128xbf16> to vector<1x16x128xbf16>
    tpu.vector_store %arg6[%c0_12, %c0_13, %c0_14], %32 {strides = array<i32>} : memref<1x16x128xbf16, #tpu.memory_space<vmem>>, vector<1x16x128xbf16>,
    return
  }
  func.func @transform_0(%arg0: i32, %arg1: i32) -> (i32, i32, i32) {
    %c0_i32 = arith.constant 0 : i32
    %c0_i32_0 = arith.constant 0 : i32
    return %arg0, %c0_i32, %arg1 : i32, i32, i32
  }
  func.func @transform_1(%arg0: i32, %arg1: i32) -> (i32, i32, i32) {
    %c1_i32 = arith.constant 1 : i32
    %0 = arith.addi %arg1, %c1_i32 : i32
    %c1_i32_0 = arith.constant 1 : i32
    %1 = arith.muli %0, %c1_i32_0 : i32
    %c0_i32 = arith.constant 0 : i32
    %c0_i32_1 = arith.constant 0 : i32
    return %arg0, %c0_i32, %1 : i32, i32, i32
  }
  func.func @transform_2(%arg0: i32, %arg1: i32) -> (i32, i32) {
    %c0_i32 = arith.constant 0 : i32
    %c0_i32_0 = arith.constant 0 : i32
    %c0_i32_1 = arith.constant 0 : i32
    return %c0_i32, %c0_i32_0 : i32, i32
  }
  func.func @transform_3(%arg0: i32, %arg1: i32) -> (i32, i32) {
    %c0_i32 = arith.constant 0 : i32
    %c0_i32_0 = arith.constant 0 : i32
    %c0_i32_1 = arith.constant 0 : i32
    return %c0_i32, %c0_i32_0 : i32, i32
  }
  func.func @transform_4(%arg0: i32, %arg1: i32) -> (i32, i32, i32) {
    %c0_i32 = arith.constant 0 : i32
    %c0_i32_0 = arith.constant 0 : i32
    return %arg0, %c0_i32, %arg1 : i32, i32, i32
  }
}

module attributes {stable_mosaic.version = 11 : i64} {
  func.func @kernel(%arg0: i32, %arg1: i32, %arg2: memref<1x16x128xbf16, #tpu.memory_space<vmem>>, %arg3: memref<1x16x128xbf16, #tpu.memory_space<vmem>>, %arg4: memref<16x48xbf16, #tpu.memory_space<vmem>>, %arg5: memref<16x1xf32, #tpu.memory_space<vmem>>, %arg6: memref<1x16x128xbf16, #tpu.memory_space<vmem>>) attributes {dimension_semantics = [#tpu.dimension_semantics<parallel>, #tpu.dimension_semantics<parallel>], iteration_bounds = array<i64: 2, 1>, scalar_prefetch = 0 : i64, scratch_operands = 0 : i64, tpu.core_type = #tpu.core_type<tc>, window_params = [{transform_indices = @transform_0, window_bounds = array<i64: 1, 16, 128>}, {transform_indices = @transform_1, window_bounds = array<i64: 1, 16, 128>}, {pipeline_mode = #tpu.pipeline_mode<synchronous>, transform_indices = @transform_2, window_bounds = array<i64: 16, 48>}, {pipeline_mode = #tpu.pipeline_mode<synchronous>, transform_indices = @transform_3, window_bounds = array<i64: 16, 1>}, {transform_indices = @transform_4, window_bounds = array<i64: 1, 16, 128>}]} {
    %c0 = arith.constant 0 : index
    %c0_0 = arith.constant 0 : index
    %c0_1 = arith.constant 0 : index
    %0 = vector.load %arg2[%c0, %c0_0, %c0_1] : memref<1x16x128xbf16, #tpu.memory_space<vmem>>, vector<1x16x128xbf16>
    %1 = vector.shape_cast %0 : vector<1x16x128xbf16> to vector<16x128xbf16>
    %c0_2 = arith.constant 0 : index
    %c0_3 = arith.constant 0 : index
    %c0_4 = arith.constant 0 : index
    %2 = vector.load %arg3[%c0_2, %c0_3, %c0_4] : memref<1x16x128xbf16, #tpu.memory_space<vmem>>, vector<1x16x128xbf16>
    %3 = vector.shape_cast %2 : vector<1x16x128xbf16> to vector<16x128xbf16>
    %4 = tpu.concatenate %1, %3 in 1 : vector<16x128xbf16>, vector<16x128xbf16> -> vector<16x256xbf16>
    %cst = arith.constant 0.000000e+00 : bf16
    %5 = vector.broadcast %cst : bf16 to vector<16x256xbf16>
    %6 = arith.cmpf oge, %4, %5 : vector<16x256xbf16>
    %cst_5 = arith.constant 1.000980e-01 : bf16
    %7 = vector.broadcast %cst_5 : bf16 to vector<16x256xbf16>
    %8 = arith.mulf %7, %4 : vector<16x256xbf16>
    %9 = arith.select %6, %4, %8 : vector<16x256xi1>, vector<16x256xbf16>
    %10 = vector.extract_strided_slice %9 {offsets = [0, 0], sizes = [16, 128], strides = [1, 1]} : vector<16x256xbf16> to vector<16x128xbf16>
    %11 = vector.extract_strided_slice %9 {offsets = [0, 3], sizes = [16, 128], strides = [1, 1]} : vector<16x256xbf16> to vector<16x128xbf16>
    %12 = vector.extract_strided_slice %9 {offsets = [0, 6], sizes = [16, 128], strides = [1, 1]} : vector<16x256xbf16> to vector<16x128xbf16>
    %13 = tpu.concatenate %10, %11, %12 in 0 : vector<16x128xbf16>, vector<16x128xbf16>, vector<16x128xbf16> -> vector<48x128xbf16>
    %c0_6 = arith.constant 0 : index
    %c0_7 = arith.constant 0 : index
    %14 = vector.load %arg4[%c0_6, %c0_7] : memref<16x48xbf16, #tpu.memory_space<vmem>>, vector<16x48xbf16>
    %cst_8 = arith.constant dense<0.000000e+00> : vector<16x128xf32>
    %15 = tpu.matmul %14, %13, %cst_8 {dimension_numbers = #tpu.dot_dimension_numbers<[1], [0], [0], [1], [0, 0, 1, 1], [], []>} : vector<16x48xbf16>, vector<48x128xbf16>, vector<16x128xf32> -> vector<16x128xf32>
    %c0_9 = arith.constant 0 : index
    %c0_10 = arith.constant 0 : index
    %16 = vector.load %arg5[%c0_9, %c0_10] : memref<16x1xf32, #tpu.memory_space<vmem>>, vector<16x1xf32>
    %17 = vector.broadcast %16 : vector<16x1xf32> to vector<16x128xf32>
    %18 = arith.addf %15, %17 : vector<16x128xf32>
    %c128_i32 = arith.constant 128 : i32
    %19 = arith.muli %arg1, %c128_i32 : i32
    %20 = tpu.iota {dimensions = array<i32: 1>} : vector<16x128xi32>
    %21 = vector.broadcast %19 : i32 to vector<16x128xi32>
    %22 = arith.addi %21, %20 : vector<16x128xi32>
    %c16_i32 = arith.constant 16 : i32
    %23 = vector.broadcast %c16_i32 : i32 to vector<16x128xi32>
    %24 = arith.cmpi slt, %22, %23 : vector<16x128xi32>
    %cst_11 = arith.constant 0.000000e+00 : f32
    %25 = vector.broadcast %cst_11 : f32 to vector<16x128xf32>
    %26 = arith.select %24, %18, %25 : vector<16x128xi1>, vector<16x128xf32>
    %27 = arith.truncf %26 : vector<16x128xf32> to vector<16x128xbf16>
    %c0_12 = arith.constant 0 : index
    %c0_13 = arith.constant 0 : index
    %c0_14 = arith.constant 0 : index
    %28 = vector.load %arg6[%c0_12, %c0_13, %c0_14] : memref<1x16x128xbf16, #tpu.memory_space<vmem>>, vector<1x16x128xbf16>
    %29 = vector.shape_cast %28 : vector<1x16x128xbf16> to vector<16x128xbf16>
    %30 = vector.shape_cast %27 : vector<16x128xbf16> to vector<1x16x128xbf16>
    tpu.vector_store %arg6[%c0_12, %c0_13, %c0_14], %30 {strides = array<i32>} : memref<1x16x128xbf16, #tpu.memory_space<vmem>>, vector<1x16x128xbf16>,
    return
  }
  func.func @transform_0(%arg0: i32, %arg1: i32) -> (i32, i32, i32) {
    %c0_i32 = arith.constant 0 : i32
    %c0_i32_0 = arith.constant 0 : i32
    return %arg0, %c0_i32, %arg1 : i32, i32, i32
  }
  func.func @transform_1(%arg0: i32, %arg1: i32) -> (i32, i32, i32) {
    %c1_i32 = arith.constant 1 : i32
    %0 = arith.addi %arg1, %c1_i32 : i32
    %c1_i32_0 = arith.constant 1 : i32
    %1 = arith.muli %0, %c1_i32_0 : i32
    %c0_i32 = arith.constant 0 : i32
    %c0_i32_1 = arith.constant 0 : i32
    return %arg0, %c0_i32, %1 : i32, i32, i32
  }
  func.func @transform_2(%arg0: i32, %arg1: i32) -> (i32, i32) {
    %c0_i32 = arith.constant 0 : i32
    %c0_i32_0 = arith.constant 0 : i32
    %c0_i32_1 = arith.constant 0 : i32
    return %c0_i32, %c0_i32_0 : i32, i32
  }
  func.func @transform_3(%arg0: i32, %arg1: i32) -> (i32, i32) {
    %c0_i32 = arith.constant 0 : i32
    %c0_i32_0 = arith.constant 0 : i32
    %c0_i32_1 = arith.constant 0 : i32
    return %c0_i32, %c0_i32_0 : i32, i32
  }
  func.func @transform_4(%arg0: i32, %arg1: i32) -> (i32, i32, i32) {
    %c0_i32 = arith.constant 0 : i32
    %c0_i32_0 = arith.constant 0 : i32
    return %arg0, %c0_i32, %arg1 : i32, i32, i32
  }
}

module attributes {stable_mosaic.version = 11 : i64} {
  func.func @kernel(%arg0: i32, %arg1: i32, %arg2: memref<1x16x128xbf16, #tpu.memory_space<vmem>>, %arg3: memref<1x16x128xbf16, #tpu.memory_space<vmem>>, %arg4: memref<8x32xbf16, #tpu.memory_space<vmem>>, %arg5: memref<8x1xf32, #tpu.memory_space<vmem>>, %arg6: memref<1x8x128xbf16, #tpu.memory_space<vmem>>) attributes {dimension_semantics = [#tpu.dimension_semantics<parallel>, #tpu.dimension_semantics<parallel>], iteration_bounds = array<i64: 2, 1>, scalar_prefetch = 0 : i64, scratch_operands = 0 : i64, tpu.core_type = #tpu.core_type<tc>, window_params = [{transform_indices = @transform_0, window_bounds = array<i64: 1, 16, 128>}, {transform_indices = @transform_1, window_bounds = array<i64: 1, 16, 128>}, {pipeline_mode = #tpu.pipeline_mode<synchronous>, transform_indices = @transform_2, window_bounds = array<i64: 8, 32>}, {pipeline_mode = #tpu.pipeline_mode<synchronous>, transform_indices = @transform_3, window_bounds = array<i64: 8, 1>}, {transform_indices = @transform_4, window_bounds = array<i64: 1, 8, 128>}]} {
    %c0 = arith.constant 0 : index
    %c0_0 = arith.constant 0 : index
    %c0_1 = arith.constant 0 : index
    %0 = vector.load %arg2[%c0, %c0_0, %c0_1] : memref<1x16x128xbf16, #tpu.memory_space<vmem>>, vector<1x16x128xbf16>
    %1 = vector.shape_cast %0 : vector<1x16x128xbf16> to vector<16x128xbf16>
    %c0_2 = arith.constant 0 : index
    %c0_3 = arith.constant 0 : index
    %c0_4 = arith.constant 0 : index
    %2 = vector.load %arg3[%c0_2, %c0_3, %c0_4] : memref<1x16x128xbf16, #tpu.memory_space<vmem>>, vector<1x16x128xbf16>
    %3 = vector.shape_cast %2 : vector<1x16x128xbf16> to vector<16x128xbf16>
    %4 = tpu.concatenate %1, %3 in 1 : vector<16x128xbf16>, vector<16x128xbf16> -> vector<16x256xbf16>
    %cst = arith.constant 0.000000e+00 : bf16
    %5 = vector.broadcast %cst : bf16 to vector<16x256xbf16>
    %6 = arith.cmpf oge, %4, %5 : vector<16x256xbf16>
    %cst_5 = arith.constant 1.000980e-01 : bf16
    %7 = vector.broadcast %cst_5 : bf16 to vector<16x256xbf16>
    %8 = arith.mulf %7, %4 : vector<16x256xbf16>
    %9 = arith.select %6, %4, %8 : vector<16x256xi1>, vector<16x256xbf16>
    %10 = vector.extract_strided_slice %9 {offsets = [0, 0], sizes = [16, 128], strides = [1, 1]} : vector<16x256xbf16> to vector<16x128xbf16>
    %11 = vector.extract_strided_slice %9 {offsets = [0, 1], sizes = [16, 128], strides = [1, 1]} : vector<16x256xbf16> to vector<16x128xbf16>
    %12 = tpu.concatenate %10, %11 in 0 : vector<16x128xbf16>, vector<16x128xbf16> -> vector<32x128xbf16>
    %c0_6 = arith.constant 0 : index
    %c0_7 = arith.constant 0 : index
    %13 = vector.load %arg4[%c0_6, %c0_7] : memref<8x32xbf16, #tpu.memory_space<vmem>>, vector<8x32xbf16>
    %cst_8 = arith.constant dense<0.000000e+00> : vector<8x128xf32>
    %14 = tpu.matmul %13, %12, %cst_8 {dimension_numbers = #tpu.dot_dimension_numbers<[1], [0], [0], [1], [0, 0, 1, 1], [], []>} : vector<8x32xbf16>, vector<32x128xbf16>, vector<8x128xf32> -> vector<8x128xf32>
    %c0_9 = arith.constant 0 : index
    %c0_10 = arith.constant 0 : index
    %15 = vector.load %arg5[%c0_9, %c0_10] : memref<8x1xf32, #tpu.memory_space<vmem>>, vector<8x1xf32>
    %16 = vector.broadcast %15 : vector<8x1xf32> to vector<8x128xf32>
    %17 = arith.addf %14, %16 : vector<8x128xf32>
    %c128_i32 = arith.constant 128 : i32
    %18 = arith.muli %arg1, %c128_i32 : i32
    %19 = tpu.iota {dimensions = array<i32: 1>} : vector<8x128xi32>
    %20 = vector.broadcast %18 : i32 to vector<8x128xi32>
    %21 = arith.addi %20, %19 : vector<8x128xi32>
    %c17_i32 = arith.constant 17 : i32
    %22 = vector.broadcast %c17_i32 : i32 to vector<8x128xi32>
    %23 = arith.cmpi slt, %21, %22 : vector<8x128xi32>
    %cst_11 = arith.constant 0.000000e+00 : f32
    %24 = vector.broadcast %cst_11 : f32 to vector<8x128xf32>
    %25 = arith.select %23, %17, %24 : vector<8x128xi1>, vector<8x128xf32>
    %26 = arith.truncf %25 : vector<8x128xf32> to vector<8x128xbf16>
    %c0_12 = arith.constant 0 : index
    %c0_13 = arith.constant 0 : index
    %c0_14 = arith.constant 0 : index
    %27 = vector.load %arg6[%c0_12, %c0_13, %c0_14] : memref<1x8x128xbf16, #tpu.memory_space<vmem>>, vector<1x8x128xbf16>
    %28 = vector.shape_cast %27 : vector<1x8x128xbf16> to vector<8x128xbf16>
    %29 = vector.shape_cast %26 : vector<8x128xbf16> to vector<1x8x128xbf16>
    tpu.vector_store %arg6[%c0_12, %c0_13, %c0_14], %29 {strides = array<i32>} : memref<1x8x128xbf16, #tpu.memory_space<vmem>>, vector<1x8x128xbf16>,
    return
  }
  func.func @transform_0(%arg0: i32, %arg1: i32) -> (i32, i32, i32) {
    %c0_i32 = arith.constant 0 : i32
    %c0_i32_0 = arith.constant 0 : i32
    return %arg0, %c0_i32, %arg1 : i32, i32, i32
  }
  func.func @transform_1(%arg0: i32, %arg1: i32) -> (i32, i32, i32) {
    %c1_i32 = arith.constant 1 : i32
    %0 = arith.addi %arg1, %c1_i32 : i32
    %c1_i32_0 = arith.constant 1 : i32
    %1 = arith.muli %0, %c1_i32_0 : i32
    %c0_i32 = arith.constant 0 : i32
    %c0_i32_1 = arith.constant 0 : i32
    return %arg0, %c0_i32, %1 : i32, i32, i32
  }
  func.func @transform_2(%arg0: i32, %arg1: i32) -> (i32, i32) {
    %c0_i32 = arith.constant 0 : i32
    %c0_i32_0 = arith.constant 0 : i32
    %c0_i32_1 = arith.constant 0 : i32
    return %c0_i32, %c0_i32_0 : i32, i32
  }
  func.func @transform_3(%arg0: i32, %arg1: i32) -> (i32, i32) {
    %c0_i32 = arith.constant 0 : i32
    %c0_i32_0 = arith.constant 0 : i32
    %c0_i32_1 = arith.constant 0 : i32
    return %c0_i32, %c0_i32_0 : i32, i32
  }
  func.func @transform_4(%arg0: i32, %arg1: i32) -> (i32, i32, i32) {
    %c0_i32 = arith.constant 0 : i32
    %c0_i32_0 = arith.constant 0 : i32
    return %arg0, %c0_i32, %arg1 : i32, i32, i32
  }
}

module attributes {stable_mosaic.version = 11 : i64} {
  func.func @kernel(%arg0: i32, %arg1: i32, %arg2: memref<1x8x128xbf16, #tpu.memory_space<vmem>>, %arg3: memref<1x8x128xbf16, #tpu.memory_space<vmem>>, %arg4: memref<8x24xbf16, #tpu.memory_space<vmem>>, %arg5: memref<8x1xf32, #tpu.memory_space<vmem>>, %arg6: memref<1x8x128xbf16, #tpu.memory_space<vmem>>) attributes {dimension_semantics = [#tpu.dimension_semantics<parallel>, #tpu.dimension_semantics<parallel>], iteration_bounds = array<i64: 2, 1>, scalar_prefetch = 0 : i64, scratch_operands = 0 : i64, tpu.core_type = #tpu.core_type<tc>, window_params = [{transform_indices = @transform_0, window_bounds = array<i64: 1, 8, 128>}, {transform_indices = @transform_1, window_bounds = array<i64: 1, 8, 128>}, {pipeline_mode = #tpu.pipeline_mode<synchronous>, transform_indices = @transform_2, window_bounds = array<i64: 8, 24>}, {pipeline_mode = #tpu.pipeline_mode<synchronous>, transform_indices = @transform_3, window_bounds = array<i64: 8, 1>}, {transform_indices = @transform_4, window_bounds = array<i64: 1, 8, 128>}]} {
    %c0 = arith.constant 0 : index
    %c0_0 = arith.constant 0 : index
    %c0_1 = arith.constant 0 : index
    %0 = vector.load %arg2[%c0, %c0_0, %c0_1] : memref<1x8x128xbf16, #tpu.memory_space<vmem>>, vector<1x8x128xbf16>
    %1 = vector.shape_cast %0 : vector<1x8x128xbf16> to vector<8x128xbf16>
    %c0_2 = arith.constant 0 : index
    %c0_3 = arith.constant 0 : index
    %c0_4 = arith.constant 0 : index
    %2 = vector.load %arg3[%c0_2, %c0_3, %c0_4] : memref<1x8x128xbf16, #tpu.memory_space<vmem>>, vector<1x8x128xbf16>
    %3 = vector.shape_cast %2 : vector<1x8x128xbf16> to vector<8x128xbf16>
    %4 = tpu.concatenate %1, %3 in 1 : vector<8x128xbf16>, vector<8x128xbf16> -> vector<8x256xbf16>
    %cst = arith.constant 0.000000e+00 : bf16
    %5 = vector.broadcast %cst : bf16 to vector<8x256xbf16>
    %6 = arith.cmpf oge, %4, %5 : vector<8x256xbf16>
    %cst_5 = arith.constant 1.000980e-01 : bf16
    %7 = vector.broadcast %cst_5 : bf16 to vector<8x256xbf16>
    %8 = arith.mulf %7, %4 : vector<8x256xbf16>
    %9 = arith.select %6, %4, %8 : vector<8x256xi1>, vector<8x256xbf16>
    %cst_6 = arith.constant 0.000000e+00 : f32
    %10 = vector.broadcast %cst_6 : f32 to vector<8x128xf32>
    %c0_7 = arith.constant 0 : index
    %c0_8 = arith.constant 0 : index
    %11 = vector.load %arg4[%c0_7, %c0_8] : memref<8x24xbf16, #tpu.memory_space<vmem>>, vector<8x8xbf16>
    %12 = vector.extract_strided_slice %9 {offsets = [0, 0], sizes = [8, 128], strides = [1, 1]} : vector<8x256xbf16> to vector<8x128xbf16>
    %cst_9 = arith.constant dense<0.000000e+00> : vector<8x128xf32>
    %13 = tpu.matmul %11, %12, %cst_9 {dimension_numbers = #tpu.dot_dimension_numbers<[1], [0], [0], [1], [0, 0, 1, 1], [], []>} : vector<8x8xbf16>, vector<8x128xbf16>, vector<8x128xf32> -> vector<8x128xf32>
    %14 = arith.addf %10, %13 : vector<8x128xf32>
    %c0_10 = arith.constant 0 : index
    %c8 = arith.constant 8 : index
    %15 = vector.load %arg4[%c0_10, %c8] : memref<8x24xbf16, #tpu.memory_space<vmem>>, vector<8x8xbf16>
    %16 = vector.extract_strided_slice %9 {offsets = [0, 1], sizes = [8, 128], strides = [1, 1]} : vector<8x256xbf16> to vector<8x128xbf16>
    %cst_11 = arith.constant dense<0.000000e+00> : vector<8x128xf32>
    %17 = tpu.matmul %15, %16, %cst_11 {dimension_numbers = #tpu.dot_dimension_numbers<[1], [0], [0], [1], [0, 0, 1, 1], [], []>} : vector<8x8xbf16>, vector<8x128xbf16>, vector<8x128xf32> -> vector<8x128xf32>
    %18 = arith.addf %14, %17 : vector<8x128xf32>
    %c0_12 = arith.constant 0 : index
    %c16 = arith.constant 16 : index
    %19 = vector.load %arg4[%c0_12, %c16] : memref<8x24xbf16, #tpu.memory_space<vmem>>, vector<8x8xbf16>
    %20 = vector.extract_strided_slice %9 {offsets = [0, 2], sizes = [8, 128], strides = [1, 1]} : vector<8x256xbf16> to vector<8x128xbf16>
    %cst_13 = arith.constant dense<0.000000e+00> : vector<8x128xf32>
    %21 = tpu.matmul %19, %20, %cst_13 {dimension_numbers = #tpu.dot_dimension_numbers<[1], [0], [0], [1], [0, 0, 1, 1], [], []>} : vector<8x8xbf16>, vector<8x128xbf16>, vector<8x128xf32> -> vector<8x128xf32>
    %22 = arith.addf %18, %21 : vector<8x128xf32>
    %c0_14 = arith.constant 0 : index
    %c0_15 = arith.constant 0 : index
    %23 = vector.load %arg5[%c0_14, %c0_15] : memref<8x1xf32, #tpu.memory_space<vmem>>, vector<8x1xf32>
    %24 = vector.broadcast %23 : vector<8x1xf32> to vector<8x128xf32>
    %25 = arith.addf %22, %24 : vector<8x128xf32>
    %c128_i32 = arith.constant 128 : i32
    %26 = arith.muli %arg1, %c128_i32 : i32
    %27 = tpu.iota {dimensions = array<i32: 1>} : vector<8x128xi32>
    %28 = vector.broadcast %26 : i32 to vector<8x128xi32>
    %29 = arith.addi %28, %27 : vector<8x128xi32>
    %c32_i32 = arith.constant 32 : i32
    %30 = vector.broadcast %c32_i32 : i32 to vector<8x128xi32>
    %31 = arith.cmpi slt, %29, %30 : vector<8x128xi32>
    %cst_16 = arith.constant 0.000000e+00 : f32
    %32 = vector.broadcast %cst_16 : f32 to vector<8x128xf32>
    %33 = arith.select %31, %25, %32 : vector<8x128xi1>, vector<8x128xf32>
    %34 = arith.truncf %33 : vector<8x128xf32> to vector<8x128xbf16>
    %c0_17 = arith.constant 0 : index
    %c0_18 = arith.constant 0 : index
    %c0_19 = arith.constant 0 : index
    %35 = vector.load %arg6[%c0_17, %c0_18, %c0_19] : memref<1x8x128xbf16, #tpu.memory_space<vmem>>, vector<1x8x128xbf16>
    %36 = vector.shape_cast %35 : vector<1x8x128xbf16> to vector<8x128xbf16>
    %37 = vector.shape_cast %34 : vector<8x128xbf16> to vector<1x8x128xbf16>
    tpu.vector_store %arg6[%c0_17, %c0_18, %c0_19], %37 {strides = array<i32>} : memref<1x8x128xbf16, #tpu.memory_space<vmem>>, vector<1x8x128xbf16>,
    return
  }
  func.func @transform_0(%arg0: i32, %arg1: i32) -> (i32, i32, i32) {
    %c0_i32 = arith.constant 0 : i32
    %c0_i32_0 = arith.constant 0 : i32
    return %arg0, %c0_i32, %arg1 : i32, i32, i32
  }
  func.func @transform_1(%arg0: i32, %arg1: i32) -> (i32, i32, i32) {
    %c1_i32 = arith.constant 1 : i32
    %0 = arith.addi %arg1, %c1_i32 : i32
    %c1_i32_0 = arith.constant 1 : i32
    %1 = arith.muli %0, %c1_i32_0 : i32
    %c0_i32 = arith.constant 0 : i32
    %c0_i32_1 = arith.constant 0 : i32
    return %arg0, %c0_i32, %1 : i32, i32, i32
  }
  func.func @transform_2(%arg0: i32, %arg1: i32) -> (i32, i32) {
    %c0_i32 = arith.constant 0 : i32
    %c0_i32_0 = arith.constant 0 : i32
    %c0_i32_1 = arith.constant 0 : i32
    return %c0_i32, %c0_i32_0 : i32, i32
  }
  func.func @transform_3(%arg0: i32, %arg1: i32) -> (i32, i32) {
    %c0_i32 = arith.constant 0 : i32
    %c0_i32_0 = arith.constant 0 : i32
    %c0_i32_1 = arith.constant 0 : i32
    return %c0_i32, %c0_i32_0 : i32, i32
  }
  func.func @transform_4(%arg0: i32, %arg1: i32) -> (i32, i32, i32) {
    %c0_i32 = arith.constant 0 : i32
    %c0_i32_0 = arith.constant 0 : i32
    return %arg0, %c0_i32, %arg1 : i32, i32, i32
  }
}

module attributes {stable_mosaic.version = 11 : i64} {
  func.func @kernel(%arg0: i32, %arg1: i32, %arg2: memref<1x8x128xbf16, #tpu.memory_space<vmem>>, %arg3: memref<1x8x128xbf16, #tpu.memory_space<vmem>>, %arg4: memref<8x24xbf16, #tpu.memory_space<vmem>>, %arg5: memref<8x1xf32, #tpu.memory_space<vmem>>, %arg6: memref<1x8x128xbf16, #tpu.memory_space<vmem>>, %arg7: memref<1x8x128xbf16, #tpu.memory_space<vmem>>) attributes {dimension_semantics = [#tpu.dimension_semantics<parallel>, #tpu.dimension_semantics<parallel>], iteration_bounds = array<i64: 2, 1>, scalar_prefetch = 0 : i64, scratch_operands = 0 : i64, tpu.core_type = #tpu.core_type<tc>, window_params = [{transform_indices = @transform_0, window_bounds = array<i64: 1, 8, 128>}, {transform_indices = @transform_1, window_bounds = array<i64: 1, 8, 128>}, {pipeline_mode = #tpu.pipeline_mode<synchronous>, transform_indices = @transform_2, window_bounds = array<i64: 8, 24>}, {pipeline_mode = #tpu.pipeline_mode<synchronous>, transform_indices = @transform_3, window_bounds = array<i64: 8, 1>}, {transform_indices = @transform_4, window_bounds = array<i64: 1, 8, 128>}, {transform_indices = @transform_5, window_bounds = array<i64: 1, 8, 128>}]} {
    %c0 = arith.constant 0 : index
    %c0_0 = arith.constant 0 : index
    %c0_1 = arith.constant 0 : index
    %0 = vector.load %arg2[%c0, %c0_0, %c0_1] : memref<1x8x128xbf16, #tpu.memory_space<vmem>>, vector<1x8x128xbf16>
    %1 = vector.shape_cast %0 : vector<1x8x128xbf16> to vector<8x128xbf16>
    %c0_2 = arith.constant 0 : index
    %c0_3 = arith.constant 0 : index
    %c0_4 = arith.constant 0 : index
    %2 = vector.load %arg3[%c0_2, %c0_3, %c0_4] : memref<1x8x128xbf16, #tpu.memory_space<vmem>>, vector<1x8x128xbf16>
    %3 = vector.shape_cast %2 : vector<1x8x128xbf16> to vector<8x128xbf16>
    %4 = tpu.concatenate %1, %3 in 1 : vector<8x128xbf16>, vector<8x128xbf16> -> vector<8x256xbf16>
    %cst = arith.constant 0.000000e+00 : bf16
    %5 = vector.broadcast %cst : bf16 to vector<8x256xbf16>
    %6 = arith.cmpf oge, %4, %5 : vector<8x256xbf16>
    %cst_5 = arith.constant 1.000980e-01 : bf16
    %7 = vector.broadcast %cst_5 : bf16 to vector<8x256xbf16>
    %8 = arith.mulf %7, %4 : vector<8x256xbf16>
    %9 = arith.select %6, %4, %8 : vector<8x256xi1>, vector<8x256xbf16>
    %cst_6 = arith.constant 0.000000e+00 : f32
    %10 = vector.broadcast %cst_6 : f32 to vector<8x128xf32>
    %c0_7 = arith.constant 0 : index
    %c0_8 = arith.constant 0 : index
    %11 = vector.load %arg4[%c0_7, %c0_8] : memref<8x24xbf16, #tpu.memory_space<vmem>>, vector<8x8xbf16>
    %12 = vector.extract_strided_slice %9 {offsets = [0, 0], sizes = [8, 128], strides = [1, 1]} : vector<8x256xbf16> to vector<8x128xbf16>
    %cst_9 = arith.constant dense<0.000000e+00> : vector<8x128xf32>
    %13 = tpu.matmul %11, %12, %cst_9 {dimension_numbers = #tpu.dot_dimension_numbers<[1], [0], [0], [1], [0, 0, 1, 1], [], []>} : vector<8x8xbf16>, vector<8x128xbf16>, vector<8x128xf32> -> vector<8x128xf32>
    %14 = arith.addf %10, %13 : vector<8x128xf32>
    %c0_10 = arith.constant 0 : index
    %c8 = arith.constant 8 : index
    %15 = vector.load %arg4[%c0_10, %c8] : memref<8x24xbf16, #tpu.memory_space<vmem>>, vector<8x8xbf16>
    %16 = vector.extract_strided_slice %9 {offsets = [0, 1], sizes = [8, 128], strides = [1, 1]} : vector<8x256xbf16> to vector<8x128xbf16>
    %cst_11 = arith.constant dense<0.000000e+00> : vector<8x128xf32>
    %17 = tpu.matmul %15, %16, %cst_11 {dimension_numbers = #tpu.dot_dimension_numbers<[1], [0], [0], [1], [0, 0, 1, 1], [], []>} : vector<8x8xbf16>, vector<8x128xbf16>, vector<8x128xf32> -> vector<8x128xf32>
    %18 = arith.addf %14, %17 : vector<8x128xf32>
    %c0_12 = arith.constant 0 : index
    %c16 = arith.constant 16 : index
    %19 = vector.load %arg4[%c0_12, %c16] : memref<8x24xbf16, #tpu.memory_space<vmem>>, vector<8x8xbf16>
    %20 = vector.extract_strided_slice %9 {offsets = [0, 2], sizes = [8, 128], strides = [1, 1]} : vector<8x256xbf16> to vector<8x128xbf16>
    %cst_13 = arith.constant dense<0.000000e+00> : vector<8x128xf32>
    %21 = tpu.matmul %19, %20, %cst_13 {dimension_numbers = #tpu.dot_dimension_numbers<[1], [0], [0], [1], [0, 0, 1, 1], [], []>} : vector<8x8xbf16>, vector<8x128xbf16>, vector<8x128xf32> -> vector<8x128xf32>
    %22 = arith.addf %18, %21 : vector<8x128xf32>
    %c0_14 = arith.constant 0 : index
    %c0_15 = arith.constant 0 : index
    %23 = vector.load %arg5[%c0_14, %c0_15] : memref<8x1xf32, #tpu.memory_space<vmem>>, vector<8x1xf32>
    %24 = vector.broadcast %23 : vector<8x1xf32> to vector<8x128xf32>
    %25 = arith.addf %22, %24 : vector<8x128xf32>
    %c0_16 = arith.constant 0 : index
    %c0_17 = arith.constant 0 : index
    %c0_18 = arith.constant 0 : index
    %26 = vector.load %arg6[%c0_16, %c0_17, %c0_18] : memref<1x8x128xbf16, #tpu.memory_space<vmem>>, vector<1x8x128xbf16>
    %27 = vector.shape_cast %26 : vector<1x8x128xbf16> to vector<8x128xbf16>
    %28 = arith.extf %27 : vector<8x128xbf16> to vector<8x128xf32>
    %29 = arith.addf %25, %28 : vector<8x128xf32>
    %c128_i32 = arith.constant 128 : i32
    %30 = arith.muli %arg1, %c128_i32 : i32
    %31 = tpu.iota {dimensions = array<i32: 1>} : vector<8x128xi32>
    %32 = vector.broadcast %30 : i32 to vector<8x128xi32>
    %33 = arith.addi %32, %31 : vector<8x128xi32>
    %c32_i32 = arith.constant 32 : i32
    %34 = vector.broadcast %c32_i32 : i32 to vector<8x128xi32>
    %35 = arith.cmpi slt, %33, %34 : vector<8x128xi32>
    %cst_19 = arith.constant 0.000000e+00 : f32
    %36 = vector.broadcast %cst_19 : f32 to vector<8x128xf32>
    %37 = arith.select %35, %29, %36 : vector<8x128xi1>, vector<8x128xf32>
    %38 = arith.truncf %37 : vector<8x128xf32> to vector<8x128xbf16>
    %c0_20 = arith.constant 0 : index
    %c0_21 = arith.constant 0 : index
    %c0_22 = arith.constant 0 : index
    %39 = vector.load %arg7[%c0_20, %c0_21, %c0_22] : memref<1x8x128xbf16, #tpu.memory_space<vmem>>, vector<1x8x128xbf16>
    %40 = vector.shape_cast %39 : vector<1x8x128xbf16> to vector<8x128xbf16>
    %41 = vector.shape_cast %38 : vector<8x128xbf16> to vector<1x8x128xbf16>
    tpu.vector_store %arg7[%c0_20, %c0_21, %c0_22], %41 {strides = array<i32>} : memref<1x8x128xbf16, #tpu.memory_space<vmem>>, vector<1x8x128xbf16>,
    return
  }
  func.func @transform_0(%arg0: i32, %arg1: i32) -> (i32, i32, i32) {
    %c0_i32 = arith.constant 0 : i32
    %c0_i32_0 = arith.constant 0 : i32
    return %arg0, %c0_i32, %arg1 : i32, i32, i32
  }
  func.func @transform_1(%arg0: i32, %arg1: i32) -> (i32, i32, i32) {
    %c1_i32 = arith.constant 1 : i32
    %0 = arith.addi %arg1, %c1_i32 : i32
    %c1_i32_0 = arith.constant 1 : i32
    %1 = arith.muli %0, %c1_i32_0 : i32
    %c0_i32 = arith.constant 0 : i32
    %c0_i32_1 = arith.constant 0 : i32
    return %arg0, %c0_i32, %1 : i32, i32, i32
  }
  func.func @transform_2(%arg0: i32, %arg1: i32) -> (i32, i32) {
    %c0_i32 = arith.constant 0 : i32
    %c0_i32_0 = arith.constant 0 : i32
    %c0_i32_1 = arith.constant 0 : i32
    return %c0_i32, %c0_i32_0 : i32, i32
  }
  func.func @transform_3(%arg0: i32, %arg1: i32) -> (i32, i32) {
    %c0_i32 = arith.constant 0 : i32
    %c0_i32_0 = arith.constant 0 : i32
    %c0_i32_1 = arith.constant 0 : i32
    return %c0_i32, %c0_i32_0 : i32, i32
  }
  func.func @transform_4(%arg0: i32, %arg1: i32) -> (i32, i32, i32) {
    %c0_i32 = arith.constant 0 : i32
    %c0_i32_0 = arith.constant 0 : i32
    return %arg0, %c0_i32, %arg1 : i32, i32, i32
  }
  func.func @transform_5(%arg0: i32, %arg1: i32) -> (i32, i32, i32) {
    %c0_i32 = arith.constant 0 : i32
    %c0_i32_0 = arith.constant 0 : i32
    return %arg0, %c0_i32, %arg1 : i32, i32, i32
  }
}

module attributes {stable_mosaic.version = 11 : i64} {
  func.func @kernel(%arg0: i32, %arg1: i32, %arg2: memref<1x8x128xbf16, #tpu.memory_space<vmem>>, %arg3: memref<1x8x128xbf16, #tpu.memory_space<vmem>>, %arg4: memref<8x40xbf16, #tpu.memory_space<vmem>>, %arg5: memref<8x1xf32, #tpu.memory_space<vmem>>, %arg6: memref<1x8x128xbf16, #tpu.memory_space<vmem>>) attributes {dimension_semantics = [#tpu.dimension_semantics<parallel>, #tpu.dimension_semantics<parallel>], iteration_bounds = array<i64: 2, 1>, scalar_prefetch = 0 : i64, scratch_operands = 0 : i64, tpu.core_type = #tpu.core_type<tc>, window_params = [{transform_indices = @transform_0, window_bounds = array<i64: 1, 8, 128>}, {transform_indices = @transform_1, window_bounds = array<i64: 1, 8, 128>}, {pipeline_mode = #tpu.pipeline_mode<synchronous>, transform_indices = @transform_2, window_bounds = array<i64: 8, 40>}, {pipeline_mode = #tpu.pipeline_mode<synchronous>, transform_indices = @transform_3, window_bounds = array<i64: 8, 1>}, {transform_indices = @transform_4, window_bounds = array<i64: 1, 8, 128>}]} {
    %c0 = arith.constant 0 : index
    %c0_0 = arith.constant 0 : index
    %c0_1 = arith.constant 0 : index
    %0 = vector.load %arg2[%c0, %c0_0, %c0_1] : memref<1x8x128xbf16, #tpu.memory_space<vmem>>, vector<1x8x128xbf16>
    %1 = vector.shape_cast %0 : vector<1x8x128xbf16> to vector<8x128xbf16>
    %c0_2 = arith.constant 0 : index
    %c0_3 = arith.constant 0 : index
    %c0_4 = arith.constant 0 : index
    %2 = vector.load %arg3[%c0_2, %c0_3, %c0_4] : memref<1x8x128xbf16, #tpu.memory_space<vmem>>, vector<1x8x128xbf16>
    %3 = vector.shape_cast %2 : vector<1x8x128xbf16> to vector<8x128xbf16>
    %4 = tpu.concatenate %1, %3 in 1 : vector<8x128xbf16>, vector<8x128xbf16> -> vector<8x256xbf16>
    %cst = arith.constant 0.000000e+00 : bf16
    %5 = vector.broadcast %cst : bf16 to vector<8x256xbf16>
    %6 = arith.cmpf oge, %4, %5 : vector<8x256xbf16>
    %cst_5 = arith.constant 1.000980e-01 : bf16
    %7 = vector.broadcast %cst_5 : bf16 to vector<8x256xbf16>
    %8 = arith.mulf %7, %4 : vector<8x256xbf16>
    %9 = arith.select %6, %4, %8 : vector<8x256xi1>, vector<8x256xbf16>
    %cst_6 = arith.constant 0.000000e+00 : f32
    %10 = vector.broadcast %cst_6 : f32 to vector<8x128xf32>
    %c0_7 = arith.constant 0 : index
    %c0_8 = arith.constant 0 : index
    %11 = vector.load %arg4[%c0_7, %c0_8] : memref<8x40xbf16, #tpu.memory_space<vmem>>, vector<8x8xbf16>
    %12 = vector.extract_strided_slice %9 {offsets = [0, 0], sizes = [8, 128], strides = [1, 1]} : vector<8x256xbf16> to vector<8x128xbf16>
    %cst_9 = arith.constant dense<0.000000e+00> : vector<8x128xf32>
    %13 = tpu.matmul %11, %12, %cst_9 {dimension_numbers = #tpu.dot_dimension_numbers<[1], [0], [0], [1], [0, 0, 1, 1], [], []>} : vector<8x8xbf16>, vector<8x128xbf16>, vector<8x128xf32> -> vector<8x128xf32>
    %14 = arith.addf %10, %13 : vector<8x128xf32>
    %c0_10 = arith.constant 0 : index
    %c8 = arith.constant 8 : index
    %15 = vector.load %arg4[%c0_10, %c8] : memref<8x40xbf16, #tpu.memory_space<vmem>>, vector<8x8xbf16>
    %16 = vector.extract_strided_slice %9 {offsets = [0, 1], sizes = [8, 128], strides = [1, 1]} : vector<8x256xbf16> to vector<8x128xbf16>
    %cst_11 = arith.constant dense<0.000000e+00> : vector<8x128xf32>
    %17 = tpu.matmul %15, %16, %cst_11 {dimension_numbers = #tpu.dot_dimension_numbers<[1], [0], [0], [1], [0, 0, 1, 1], [], []>} : vector<8x8xbf16>, vector<8x128xbf16>, vector<8x128xf32> -> vector<8x128xf32>
    %18 = arith.addf %14, %17 : vector<8x128xf32>
    %c0_12 = arith.constant 0 : index
    %c16 = arith.constant 16 : index
    %19 = vector.load %arg4[%c0_12, %c16] : memref<8x40xbf16, #tpu.memory_space<vmem>>, vector<8x8xbf16>
    %20 = vector.extract_strided_slice %9 {offsets = [0, 2], sizes = [8, 128], strides = [1, 1]} : vector<8x256xbf16> to vector<8x128xbf16>
    %cst_13 = arith.constant dense<0.000000e+00> : vector<8x128xf32>
    %21 = tpu.matmul %19, %20, %cst_13 {dimension_numbers = #tpu.dot_dimension_numbers<[1], [0], [0], [1], [0, 0, 1, 1], [], []>} : vector<8x8xbf16>, vector<8x128xbf16>, vector<8x128xf32> -> vector<8x128xf32>
    %22 = arith.addf %18, %21 : vector<8x128xf32>
    %c0_14 = arith.constant 0 : index
    %c24 = arith.constant 24 : index
    %23 = vector.load %arg4[%c0_14, %c24] : memref<8x40xbf16, #tpu.memory_space<vmem>>, vector<8x8xbf16>
    %24 = vector.extract_strided_slice %9 {offsets = [0, 3], sizes = [8, 128], strides = [1, 1]} : vector<8x256xbf16> to vector<8x128xbf16>
    %cst_15 = arith.constant dense<0.000000e+00> : vector<8x128xf32>
    %25 = tpu.matmul %23, %24, %cst_15 {dimension_numbers = #tpu.dot_dimension_numbers<[1], [0], [0], [1], [0, 0, 1, 1], [], []>} : vector<8x8xbf16>, vector<8x128xbf16>, vector<8x128xf32> -> vector<8x128xf32>
    %26 = arith.addf %22, %25 : vector<8x128xf32>
    %c0_16 = arith.constant 0 : index
    %c32 = arith.constant 32 : index
    %27 = vector.load %arg4[%c0_16, %c32] : memref<8x40xbf16, #tpu.memory_space<vmem>>, vector<8x8xbf16>
    %28 = vector.extract_strided_slice %9 {offsets = [0, 4], sizes = [8, 128], strides = [1, 1]} : vector<8x256xbf16> to vector<8x128xbf16>
    %cst_17 = arith.constant dense<0.000000e+00> : vector<8x128xf32>
    %29 = tpu.matmul %27, %28, %cst_17 {dimension_numbers = #tpu.dot_dimension_numbers<[1], [0], [0], [1], [0, 0, 1, 1], [], []>} : vector<8x8xbf16>, vector<8x128xbf16>, vector<8x128xf32> -> vector<8x128xf32>
    %30 = arith.addf %26, %29 : vector<8x128xf32>
    %c0_18 = arith.constant 0 : index
    %c0_19 = arith.constant 0 : index
    %31 = vector.load %arg5[%c0_18, %c0_19] : memref<8x1xf32, #tpu.memory_space<vmem>>, vector<8x1xf32>
    %32 = vector.broadcast %31 : vector<8x1xf32> to vector<8x128xf32>
    %33 = arith.addf %30, %32 : vector<8x128xf32>
    %c128_i32 = arith.constant 128 : i32
    %34 = arith.muli %arg1, %c128_i32 : i32
    %35 = tpu.iota {dimensions = array<i32: 1>} : vector<8x128xi32>
    %36 = vector.broadcast %34 : i32 to vector<8x128xi32>
    %37 = arith.addi %36, %35 : vector<8x128xi32>
    %c32_i32 = arith.constant 32 : i32
    %38 = vector.broadcast %c32_i32 : i32 to vector<8x128xi32>
    %39 = arith.cmpi slt, %37, %38 : vector<8x128xi32>
    %cst_20 = arith.constant 0.000000e+00 : f32
    %40 = vector.broadcast %cst_20 : f32 to vector<8x128xf32>
    %41 = arith.select %39, %33, %40 : vector<8x128xi1>, vector<8x128xf32>
    %42 = arith.truncf %41 : vector<8x128xf32> to vector<8x128xbf16>
    %c0_21 = arith.constant 0 : index
    %c0_22 = arith.constant 0 : index
    %c0_23 = arith.constant 0 : index
    %43 = vector.load %arg6[%c0_21, %c0_22, %c0_23] : memref<1x8x128xbf16, #tpu.memory_space<vmem>>, vector<1x8x128xbf16>
    %44 = vector.shape_cast %43 : vector<1x8x128xbf16> to vector<8x128xbf16>
    %45 = vector.shape_cast %42 : vector<8x128xbf16> to vector<1x8x128xbf16>
    tpu.vector_store %arg6[%c0_21, %c0_22, %c0_23], %45 {strides = array<i32>} : memref<1x8x128xbf16, #tpu.memory_space<vmem>>, vector<1x8x128xbf16>,
    return
  }
  func.func @transform_0(%arg0: i32, %arg1: i32) -> (i32, i32, i32) {
    %c0_i32 = arith.constant 0 : i32
    %c0_i32_0 = arith.constant 0 : i32
    return %arg0, %c0_i32, %arg1 : i32, i32, i32
  }
  func.func @transform_1(%arg0: i32, %arg1: i32) -> (i32, i32, i32) {
    %c1_i32 = arith.constant 1 : i32
    %0 = arith.addi %arg1, %c1_i32 : i32
    %c1_i32_0 = arith.constant 1 : i32
    %1 = arith.muli %0, %c1_i32_0 : i32
    %c0_i32 = arith.constant 0 : i32
    %c0_i32_1 = arith.constant 0 : i32
    return %arg0, %c0_i32, %1 : i32, i32, i32
  }
  func.func @transform_2(%arg0: i32, %arg1: i32) -> (i32, i32) {
    %c0_i32 = arith.constant 0 : i32
    %c0_i32_0 = arith.constant 0 : i32
    %c0_i32_1 = arith.constant 0 : i32
    return %c0_i32, %c0_i32_0 : i32, i32
  }
  func.func @transform_3(%arg0: i32, %arg1: i32) -> (i32, i32) {
    %c0_i32 = arith.constant 0 : i32
    %c0_i32_0 = arith.constant 0 : i32
    %c0_i32_1 = arith.constant 0 : i32
    return %c0_i32, %c0_i32_0 : i32, i32
  }
  func.func @transform_4(%arg0: i32, %arg1: i32) -> (i32, i32, i32) {
    %c0_i32 = arith.constant 0 : i32
    %c0_i32_0 = arith.constant 0 : i32
    return %arg0, %c0_i32, %arg1 : i32, i32, i32
  }
}

module attributes {stable_mosaic.version = 11 : i64} {
  func.func @kernel(%arg0: i32, %arg1: i32, %arg2: memref<1x8x128xbf16, #tpu.memory_space<vmem>>, %arg3: memref<1x8x128xbf16, #tpu.memory_space<vmem>>, %arg4: memref<8x40xbf16, #tpu.memory_space<vmem>>, %arg5: memref<8x1xf32, #tpu.memory_space<vmem>>, %arg6: memref<1x8x128xbf16, #tpu.memory_space<vmem>>, %arg7: memref<1x8x128xbf16, #tpu.memory_space<vmem>>) attributes {dimension_semantics = [#tpu.dimension_semantics<parallel>, #tpu.dimension_semantics<parallel>], iteration_bounds = array<i64: 2, 1>, scalar_prefetch = 0 : i64, scratch_operands = 0 : i64, tpu.core_type = #tpu.core_type<tc>, window_params = [{transform_indices = @transform_0, window_bounds = array<i64: 1, 8, 128>}, {transform_indices = @transform_1, window_bounds = array<i64: 1, 8, 128>}, {pipeline_mode = #tpu.pipeline_mode<synchronous>, transform_indices = @transform_2, window_bounds = array<i64: 8, 40>}, {pipeline_mode = #tpu.pipeline_mode<synchronous>, transform_indices = @transform_3, window_bounds = array<i64: 8, 1>}, {transform_indices = @transform_4, window_bounds = array<i64: 1, 8, 128>}, {transform_indices = @transform_5, window_bounds = array<i64: 1, 8, 128>}]} {
    %c0 = arith.constant 0 : index
    %c0_0 = arith.constant 0 : index
    %c0_1 = arith.constant 0 : index
    %0 = vector.load %arg2[%c0, %c0_0, %c0_1] : memref<1x8x128xbf16, #tpu.memory_space<vmem>>, vector<1x8x128xbf16>
    %1 = vector.shape_cast %0 : vector<1x8x128xbf16> to vector<8x128xbf16>
    %c0_2 = arith.constant 0 : index
    %c0_3 = arith.constant 0 : index
    %c0_4 = arith.constant 0 : index
    %2 = vector.load %arg3[%c0_2, %c0_3, %c0_4] : memref<1x8x128xbf16, #tpu.memory_space<vmem>>, vector<1x8x128xbf16>
    %3 = vector.shape_cast %2 : vector<1x8x128xbf16> to vector<8x128xbf16>
    %4 = tpu.concatenate %1, %3 in 1 : vector<8x128xbf16>, vector<8x128xbf16> -> vector<8x256xbf16>
    %cst = arith.constant 0.000000e+00 : bf16
    %5 = vector.broadcast %cst : bf16 to vector<8x256xbf16>
    %6 = arith.cmpf oge, %4, %5 : vector<8x256xbf16>
    %cst_5 = arith.constant 1.000980e-01 : bf16
    %7 = vector.broadcast %cst_5 : bf16 to vector<8x256xbf16>
    %8 = arith.mulf %7, %4 : vector<8x256xbf16>
    %9 = arith.select %6, %4, %8 : vector<8x256xi1>, vector<8x256xbf16>
    %cst_6 = arith.constant 0.000000e+00 : f32
    %10 = vector.broadcast %cst_6 : f32 to vector<8x128xf32>
    %c0_7 = arith.constant 0 : index
    %c0_8 = arith.constant 0 : index
    %11 = vector.load %arg4[%c0_7, %c0_8] : memref<8x40xbf16, #tpu.memory_space<vmem>>, vector<8x8xbf16>
    %12 = vector.extract_strided_slice %9 {offsets = [0, 0], sizes = [8, 128], strides = [1, 1]} : vector<8x256xbf16> to vector<8x128xbf16>
    %cst_9 = arith.constant dense<0.000000e+00> : vector<8x128xf32>
    %13 = tpu.matmul %11, %12, %cst_9 {dimension_numbers = #tpu.dot_dimension_numbers<[1], [0], [0], [1], [0, 0, 1, 1], [], []>} : vector<8x8xbf16>, vector<8x128xbf16>, vector<8x128xf32> -> vector<8x128xf32>
    %14 = arith.addf %10, %13 : vector<8x128xf32>
    %c0_10 = arith.constant 0 : index
    %c8 = arith.constant 8 : index
    %15 = vector.load %arg4[%c0_10, %c8] : memref<8x40xbf16, #tpu.memory_space<vmem>>, vector<8x8xbf16>
    %16 = vector.extract_strided_slice %9 {offsets = [0, 1], sizes = [8, 128], strides = [1, 1]} : vector<8x256xbf16> to vector<8x128xbf16>
    %cst_11 = arith.constant dense<0.000000e+00> : vector<8x128xf32>
    %17 = tpu.matmul %15, %16, %cst_11 {dimension_numbers = #tpu.dot_dimension_numbers<[1], [0], [0], [1], [0, 0, 1, 1], [], []>} : vector<8x8xbf16>, vector<8x128xbf16>, vector<8x128xf32> -> vector<8x128xf32>
    %18 = arith.addf %14, %17 : vector<8x128xf32>
    %c0_12 = arith.constant 0 : index
    %c16 = arith.constant 16 : index
    %19 = vector.load %arg4[%c0_12, %c16] : memref<8x40xbf16, #tpu.memory_space<vmem>>, vector<8x8xbf16>
    %20 = vector.extract_strided_slice %9 {offsets = [0, 2], sizes = [8, 128], strides = [1, 1]} : vector<8x256xbf16> to vector<8x128xbf16>
    %cst_13 = arith.constant dense<0.000000e+00> : vector<8x128xf32>
    %21 = tpu.matmul %19, %20, %cst_13 {dimension_numbers = #tpu.dot_dimension_numbers<[1], [0], [0], [1], [0, 0, 1, 1], [], []>} : vector<8x8xbf16>, vector<8x128xbf16>, vector<8x128xf32> -> vector<8x128xf32>
    %22 = arith.addf %18, %21 : vector<8x128xf32>
    %c0_14 = arith.constant 0 : index
    %c24 = arith.constant 24 : index
    %23 = vector.load %arg4[%c0_14, %c24] : memref<8x40xbf16, #tpu.memory_space<vmem>>, vector<8x8xbf16>
    %24 = vector.extract_strided_slice %9 {offsets = [0, 3], sizes = [8, 128], strides = [1, 1]} : vector<8x256xbf16> to vector<8x128xbf16>
    %cst_15 = arith.constant dense<0.000000e+00> : vector<8x128xf32>
    %25 = tpu.matmul %23, %24, %cst_15 {dimension_numbers = #tpu.dot_dimension_numbers<[1], [0], [0], [1], [0, 0, 1, 1], [], []>} : vector<8x8xbf16>, vector<8x128xbf16>, vector<8x128xf32> -> vector<8x128xf32>
    %26 = arith.addf %22, %25 : vector<8x128xf32>
    %c0_16 = arith.constant 0 : index
    %c32 = arith.constant 32 : index
    %27 = vector.load %arg4[%c0_16, %c32] : memref<8x40xbf16, #tpu.memory_space<vmem>>, vector<8x8xbf16>
    %28 = vector.extract_strided_slice %9 {offsets = [0, 4], sizes = [8, 128], strides = [1, 1]} : vector<8x256xbf16> to vector<8x128xbf16>
    %cst_17 = arith.constant dense<0.000000e+00> : vector<8x128xf32>
    %29 = tpu.matmul %27, %28, %cst_17 {dimension_numbers = #tpu.dot_dimension_numbers<[1], [0], [0], [1], [0, 0, 1, 1], [], []>} : vector<8x8xbf16>, vector<8x128xbf16>, vector<8x128xf32> -> vector<8x128xf32>
    %30 = arith.addf %26, %29 : vector<8x128xf32>
    %c0_18 = arith.constant 0 : index
    %c0_19 = arith.constant 0 : index
    %31 = vector.load %arg5[%c0_18, %c0_19] : memref<8x1xf32, #tpu.memory_space<vmem>>, vector<8x1xf32>
    %32 = vector.broadcast %31 : vector<8x1xf32> to vector<8x128xf32>
    %33 = arith.addf %30, %32 : vector<8x128xf32>
    %c0_20 = arith.constant 0 : index
    %c0_21 = arith.constant 0 : index
    %c0_22 = arith.constant 0 : index
    %34 = vector.load %arg6[%c0_20, %c0_21, %c0_22] : memref<1x8x128xbf16, #tpu.memory_space<vmem>>, vector<1x8x128xbf16>
    %35 = vector.shape_cast %34 : vector<1x8x128xbf16> to vector<8x128xbf16>
    %36 = arith.extf %35 : vector<8x128xbf16> to vector<8x128xf32>
    %37 = arith.addf %33, %36 : vector<8x128xf32>
    %c128_i32 = arith.constant 128 : i32
    %38 = arith.muli %arg1, %c128_i32 : i32
    %39 = tpu.iota {dimensions = array<i32: 1>} : vector<8x128xi32>
    %40 = vector.broadcast %38 : i32 to vector<8x128xi32>
    %41 = arith.addi %40, %39 : vector<8x128xi32>
    %c32_i32 = arith.constant 32 : i32
    %42 = vector.broadcast %c32_i32 : i32 to vector<8x128xi32>
    %43 = arith.cmpi slt, %41, %42 : vector<8x128xi32>
    %cst_23 = arith.constant 0.000000e+00 : f32
    %44 = vector.broadcast %cst_23 : f32 to vector<8x128xf32>
    %45 = arith.select %43, %37, %44 : vector<8x128xi1>, vector<8x128xf32>
    %46 = arith.truncf %45 : vector<8x128xf32> to vector<8x128xbf16>
    %c0_24 = arith.constant 0 : index
    %c0_25 = arith.constant 0 : index
    %c0_26 = arith.constant 0 : index
    %47 = vector.load %arg7[%c0_24, %c0_25, %c0_26] : memref<1x8x128xbf16, #tpu.memory_space<vmem>>, vector<1x8x128xbf16>
    %48 = vector.shape_cast %47 : vector<1x8x128xbf16> to vector<8x128xbf16>
    %49 = vector.shape_cast %46 : vector<8x128xbf16> to vector<1x8x128xbf16>
    tpu.vector_store %arg7[%c0_24, %c0_25, %c0_26], %49 {strides = array<i32>} : memref<1x8x128xbf16, #tpu.memory_space<vmem>>, vector<1x8x128xbf16>,
    return
  }
  func.func @transform_0(%arg0: i32, %arg1: i32) -> (i32, i32, i32) {
    %c0_i32 = arith.constant 0 : i32
    %c0_i32_0 = arith.constant 0 : i32
    return %arg0, %c0_i32, %arg1 : i32, i32, i32
  }
  func.func @transform_1(%arg0: i32, %arg1: i32) -> (i32, i32, i32) {
    %c1_i32 = arith.constant 1 : i32
    %0 = arith.addi %arg1, %c1_i32 : i32
    %c1_i32_0 = arith.constant 1 : i32
    %1 = arith.muli %0, %c1_i32_0 : i32
    %c0_i32 = arith.constant 0 : i32
    %c0_i32_1 = arith.constant 0 : i32
    return %arg0, %c0_i32, %1 : i32, i32, i32
  }
  func.func @transform_2(%arg0: i32, %arg1: i32) -> (i32, i32) {
    %c0_i32 = arith.constant 0 : i32
    %c0_i32_0 = arith.constant 0 : i32
    %c0_i32_1 = arith.constant 0 : i32
    return %c0_i32, %c0_i32_0 : i32, i32
  }
  func.func @transform_3(%arg0: i32, %arg1: i32) -> (i32, i32) {
    %c0_i32 = arith.constant 0 : i32
    %c0_i32_0 = arith.constant 0 : i32
    %c0_i32_1 = arith.constant 0 : i32
    return %c0_i32, %c0_i32_0 : i32, i32
  }
  func.func @transform_4(%arg0: i32, %arg1: i32) -> (i32, i32, i32) {
    %c0_i32 = arith.constant 0 : i32
    %c0_i32_0 = arith.constant 0 : i32
    return %arg0, %c0_i32, %arg1 : i32, i32, i32
  }
  func.func @transform_5(%arg0: i32, %arg1: i32) -> (i32, i32, i32) {
    %c0_i32 = arith.constant 0 : i32
    %c0_i32_0 = arith.constant 0 : i32
    return %arg0, %c0_i32, %arg1 : i32, i32, i32
  }
}

module attributes {stable_mosaic.version = 11 : i64} {
  func.func @kernel(%arg0: i32, %arg1: i32, %arg2: memref<1x8x128xbf16, #tpu.memory_space<vmem>>, %arg3: memref<1x8x128xbf16, #tpu.memory_space<vmem>>, %arg4: memref<8x40xbf16, #tpu.memory_space<vmem>>, %arg5: memref<8x1xf32, #tpu.memory_space<vmem>>, %arg6: memref<1x8x128xbf16, #tpu.memory_space<vmem>>) attributes {dimension_semantics = [#tpu.dimension_semantics<parallel>, #tpu.dimension_semantics<parallel>], iteration_bounds = array<i64: 2, 1>, scalar_prefetch = 0 : i64, scratch_operands = 0 : i64, tpu.core_type = #tpu.core_type<tc>, window_params = [{transform_indices = @transform_0, window_bounds = array<i64: 1, 8, 128>}, {transform_indices = @transform_1, window_bounds = array<i64: 1, 8, 128>}, {pipeline_mode = #tpu.pipeline_mode<synchronous>, transform_indices = @transform_2, window_bounds = array<i64: 8, 40>}, {pipeline_mode = #tpu.pipeline_mode<synchronous>, transform_indices = @transform_3, window_bounds = array<i64: 8, 1>}, {transform_indices = @transform_4, window_bounds = array<i64: 1, 8, 128>}]} {
    %c0 = arith.constant 0 : index
    %c0_0 = arith.constant 0 : index
    %c0_1 = arith.constant 0 : index
    %0 = vector.load %arg2[%c0, %c0_0, %c0_1] : memref<1x8x128xbf16, #tpu.memory_space<vmem>>, vector<1x8x128xbf16>
    %1 = vector.shape_cast %0 : vector<1x8x128xbf16> to vector<8x128xbf16>
    %c0_2 = arith.constant 0 : index
    %c0_3 = arith.constant 0 : index
    %c0_4 = arith.constant 0 : index
    %2 = vector.load %arg3[%c0_2, %c0_3, %c0_4] : memref<1x8x128xbf16, #tpu.memory_space<vmem>>, vector<1x8x128xbf16>
    %3 = vector.shape_cast %2 : vector<1x8x128xbf16> to vector<8x128xbf16>
    %4 = tpu.concatenate %1, %3 in 1 : vector<8x128xbf16>, vector<8x128xbf16> -> vector<8x256xbf16>
    %cst = arith.constant 0.000000e+00 : bf16
    %5 = vector.broadcast %cst : bf16 to vector<8x256xbf16>
    %6 = arith.cmpf oge, %4, %5 : vector<8x256xbf16>
    %cst_5 = arith.constant 1.000980e-01 : bf16
    %7 = vector.broadcast %cst_5 : bf16 to vector<8x256xbf16>
    %8 = arith.mulf %7, %4 : vector<8x256xbf16>
    %9 = arith.select %6, %4, %8 : vector<8x256xi1>, vector<8x256xbf16>
    %cst_6 = arith.constant 0.000000e+00 : f32
    %10 = vector.broadcast %cst_6 : f32 to vector<8x128xf32>
    %c0_7 = arith.constant 0 : index
    %c0_8 = arith.constant 0 : index
    %11 = vector.load %arg4[%c0_7, %c0_8] : memref<8x40xbf16, #tpu.memory_space<vmem>>, vector<8x8xbf16>
    %12 = vector.extract_strided_slice %9 {offsets = [0, 0], sizes = [8, 128], strides = [1, 1]} : vector<8x256xbf16> to vector<8x128xbf16>
    %cst_9 = arith.constant dense<0.000000e+00> : vector<8x128xf32>
    %13 = tpu.matmul %11, %12, %cst_9 {dimension_numbers = #tpu.dot_dimension_numbers<[1], [0], [0], [1], [0, 0, 1, 1], [], []>} : vector<8x8xbf16>, vector<8x128xbf16>, vector<8x128xf32> -> vector<8x128xf32>
    %14 = arith.addf %10, %13 : vector<8x128xf32>
    %c0_10 = arith.constant 0 : index
    %c8 = arith.constant 8 : index
    %15 = vector.load %arg4[%c0_10, %c8] : memref<8x40xbf16, #tpu.memory_space<vmem>>, vector<8x8xbf16>
    %16 = vector.extract_strided_slice %9 {offsets = [0, 3], sizes = [8, 128], strides = [1, 1]} : vector<8x256xbf16> to vector<8x128xbf16>
    %cst_11 = arith.constant dense<0.000000e+00> : vector<8x128xf32>
    %17 = tpu.matmul %15, %16, %cst_11 {dimension_numbers = #tpu.dot_dimension_numbers<[1], [0], [0], [1], [0, 0, 1, 1], [], []>} : vector<8x8xbf16>, vector<8x128xbf16>, vector<8x128xf32> -> vector<8x128xf32>
    %18 = arith.addf %14, %17 : vector<8x128xf32>
    %c0_12 = arith.constant 0 : index
    %c16 = arith.constant 16 : index
    %19 = vector.load %arg4[%c0_12, %c16] : memref<8x40xbf16, #tpu.memory_space<vmem>>, vector<8x8xbf16>
    %20 = vector.extract_strided_slice %9 {offsets = [0, 6], sizes = [8, 128], strides = [1, 1]} : vector<8x256xbf16> to vector<8x128xbf16>
    %cst_13 = arith.constant dense<0.000000e+00> : vector<8x128xf32>
    %21 = tpu.matmul %19, %20, %cst_13 {dimension_numbers = #tpu.dot_dimension_numbers<[1], [0], [0], [1], [0, 0, 1, 1], [], []>} : vector<8x8xbf16>, vector<8x128xbf16>, vector<8x128xf32> -> vector<8x128xf32>
    %22 = arith.addf %18, %21 : vector<8x128xf32>
    %c0_14 = arith.constant 0 : index
    %c24 = arith.constant 24 : index
    %23 = vector.load %arg4[%c0_14, %c24] : memref<8x40xbf16, #tpu.memory_space<vmem>>, vector<8x8xbf16>
    %24 = vector.extract_strided_slice %9 {offsets = [0, 9], sizes = [8, 128], strides = [1, 1]} : vector<8x256xbf16> to vector<8x128xbf16>
    %cst_15 = arith.constant dense<0.000000e+00> : vector<8x128xf32>
    %25 = tpu.matmul %23, %24, %cst_15 {dimension_numbers = #tpu.dot_dimension_numbers<[1], [0], [0], [1], [0, 0, 1, 1], [], []>} : vector<8x8xbf16>, vector<8x128xbf16>, vector<8x128xf32> -> vector<8x128xf32>
    %26 = arith.addf %22, %25 : vector<8x128xf32>
    %c0_16 = arith.constant 0 : index
    %c32 = arith.constant 32 : index
    %27 = vector.load %arg4[%c0_16, %c32] : memref<8x40xbf16, #tpu.memory_space<vmem>>, vector<8x8xbf16>
    %28 = vector.extract_strided_slice %9 {offsets = [0, 12], sizes = [8, 128], strides = [1, 1]} : vector<8x256xbf16> to vector<8x128xbf16>
    %cst_17 = arith.constant dense<0.000000e+00> : vector<8x128xf32>
    %29 = tpu.matmul %27, %28, %cst_17 {dimension_numbers = #tpu.dot_dimension_numbers<[1], [0], [0], [1], [0, 0, 1, 1], [], []>} : vector<8x8xbf16>, vector<8x128xbf16>, vector<8x128xf32> -> vector<8x128xf32>
    %30 = arith.addf %26, %29 : vector<8x128xf32>
    %c0_18 = arith.constant 0 : index
    %c0_19 = arith.constant 0 : index
    %31 = vector.load %arg5[%c0_18, %c0_19] : memref<8x1xf32, #tpu.memory_space<vmem>>, vector<8x1xf32>
    %32 = vector.broadcast %31 : vector<8x1xf32> to vector<8x128xf32>
    %33 = arith.addf %30, %32 : vector<8x128xf32>
    %c128_i32 = arith.constant 128 : i32
    %34 = arith.muli %arg1, %c128_i32 : i32
    %35 = tpu.iota {dimensions = array<i32: 1>} : vector<8x128xi32>
    %36 = vector.broadcast %34 : i32 to vector<8x128xi32>
    %37 = arith.addi %36, %35 : vector<8x128xi32>
    %c32_i32 = arith.constant 32 : i32
    %38 = vector.broadcast %c32_i32 : i32 to vector<8x128xi32>
    %39 = arith.cmpi slt, %37, %38 : vector<8x128xi32>
    %cst_20 = arith.constant 0.000000e+00 : f32
    %40 = vector.broadcast %cst_20 : f32 to vector<8x128xf32>
    %41 = arith.select %39, %33, %40 : vector<8x128xi1>, vector<8x128xf32>
    %42 = arith.truncf %41 : vector<8x128xf32> to vector<8x128xbf16>
    %c0_21 = arith.constant 0 : index
    %c0_22 = arith.constant 0 : index
    %c0_23 = arith.constant 0 : index
    %43 = vector.load %arg6[%c0_21, %c0_22, %c0_23] : memref<1x8x128xbf16, #tpu.memory_space<vmem>>, vector<1x8x128xbf16>
    %44 = vector.shape_cast %43 : vector<1x8x128xbf16> to vector<8x128xbf16>
    %45 = vector.shape_cast %42 : vector<8x128xbf16> to vector<1x8x128xbf16>
    tpu.vector_store %arg6[%c0_21, %c0_22, %c0_23], %45 {strides = array<i32>} : memref<1x8x128xbf16, #tpu.memory_space<vmem>>, vector<1x8x128xbf16>,
    return
  }
  func.func @transform_0(%arg0: i32, %arg1: i32) -> (i32, i32, i32) {
    %c0_i32 = arith.constant 0 : i32
    %c0_i32_0 = arith.constant 0 : i32
    return %arg0, %c0_i32, %arg1 : i32, i32, i32
  }
  func.func @transform_1(%arg0: i32, %arg1: i32) -> (i32, i32, i32) {
    %c1_i32 = arith.constant 1 : i32
    %0 = arith.addi %arg1, %c1_i32 : i32
    %c1_i32_0 = arith.constant 1 : i32
    %1 = arith.muli %0, %c1_i32_0 : i32
    %c0_i32 = arith.constant 0 : i32
    %c0_i32_1 = arith.constant 0 : i32
    return %arg0, %c0_i32, %1 : i32, i32, i32
  }
  func.func @transform_2(%arg0: i32, %arg1: i32) -> (i32, i32) {
    %c0_i32 = arith.constant 0 : i32
    %c0_i32_0 = arith.constant 0 : i32
    %c0_i32_1 = arith.constant 0 : i32
    return %c0_i32, %c0_i32_0 : i32, i32
  }
  func.func @transform_3(%arg0: i32, %arg1: i32) -> (i32, i32) {
    %c0_i32 = arith.constant 0 : i32
    %c0_i32_0 = arith.constant 0 : i32
    %c0_i32_1 = arith.constant 0 : i32
    return %c0_i32, %c0_i32_0 : i32, i32
  }
  func.func @transform_4(%arg0: i32, %arg1: i32) -> (i32, i32, i32) {
    %c0_i32 = arith.constant 0 : i32
    %c0_i32_0 = arith.constant 0 : i32
    return %arg0, %c0_i32, %arg1 : i32, i32, i32
  }
}

module attributes {stable_mosaic.version = 11 : i64} {
  func.func @kernel(%arg0: i32, %arg1: i32, %arg2: memref<1x8x128xbf16, #tpu.memory_space<vmem>>, %arg3: memref<1x8x128xbf16, #tpu.memory_space<vmem>>, %arg4: memref<8x24xbf16, #tpu.memory_space<vmem>>, %arg5: memref<8x1xf32, #tpu.memory_space<vmem>>, %arg6: memref<1x8x128xbf16, #tpu.memory_space<vmem>>) attributes {dimension_semantics = [#tpu.dimension_semantics<parallel>, #tpu.dimension_semantics<parallel>], iteration_bounds = array<i64: 2, 1>, scalar_prefetch = 0 : i64, scratch_operands = 0 : i64, tpu.core_type = #tpu.core_type<tc>, window_params = [{transform_indices = @transform_0, window_bounds = array<i64: 1, 8, 128>}, {transform_indices = @transform_1, window_bounds = array<i64: 1, 8, 128>}, {pipeline_mode = #tpu.pipeline_mode<synchronous>, transform_indices = @transform_2, window_bounds = array<i64: 8, 24>}, {pipeline_mode = #tpu.pipeline_mode<synchronous>, transform_indices = @transform_3, window_bounds = array<i64: 8, 1>}, {transform_indices = @transform_4, window_bounds = array<i64: 1, 8, 128>}]} {
    %c0 = arith.constant 0 : index
    %c0_0 = arith.constant 0 : index
    %c0_1 = arith.constant 0 : index
    %0 = vector.load %arg2[%c0, %c0_0, %c0_1] : memref<1x8x128xbf16, #tpu.memory_space<vmem>>, vector<1x8x128xbf16>
    %1 = vector.shape_cast %0 : vector<1x8x128xbf16> to vector<8x128xbf16>
    %c0_2 = arith.constant 0 : index
    %c0_3 = arith.constant 0 : index
    %c0_4 = arith.constant 0 : index
    %2 = vector.load %arg3[%c0_2, %c0_3, %c0_4] : memref<1x8x128xbf16, #tpu.memory_space<vmem>>, vector<1x8x128xbf16>
    %3 = vector.shape_cast %2 : vector<1x8x128xbf16> to vector<8x128xbf16>
    %4 = tpu.concatenate %1, %3 in 1 : vector<8x128xbf16>, vector<8x128xbf16> -> vector<8x256xbf16>
    %cst = arith.constant 0.000000e+00 : bf16
    %5 = vector.broadcast %cst : bf16 to vector<8x256xbf16>
    %6 = arith.cmpf oge, %4, %5 : vector<8x256xbf16>
    %cst_5 = arith.constant 1.000980e-01 : bf16
    %7 = vector.broadcast %cst_5 : bf16 to vector<8x256xbf16>
    %8 = arith.mulf %7, %4 : vector<8x256xbf16>
    %9 = arith.select %6, %4, %8 : vector<8x256xi1>, vector<8x256xbf16>
    %cst_6 = arith.constant 0.000000e+00 : f32
    %10 = vector.broadcast %cst_6 : f32 to vector<8x128xf32>
    %c0_7 = arith.constant 0 : index
    %c0_8 = arith.constant 0 : index
    %11 = vector.load %arg4[%c0_7, %c0_8] : memref<8x24xbf16, #tpu.memory_space<vmem>>, vector<8x8xbf16>
    %12 = vector.extract_strided_slice %9 {offsets = [0, 0], sizes = [8, 128], strides = [1, 1]} : vector<8x256xbf16> to vector<8x128xbf16>
    %cst_9 = arith.constant dense<0.000000e+00> : vector<8x128xf32>
    %13 = tpu.matmul %11, %12, %cst_9 {dimension_numbers = #tpu.dot_dimension_numbers<[1], [0], [0], [1], [0, 0, 1, 1], [], []>} : vector<8x8xbf16>, vector<8x128xbf16>, vector<8x128xf32> -> vector<8x128xf32>
    %14 = arith.addf %10, %13 : vector<8x128xf32>
    %c0_10 = arith.constant 0 : index
    %c8 = arith.constant 8 : index
    %15 = vector.load %arg4[%c0_10, %c8] : memref<8x24xbf16, #tpu.memory_space<vmem>>, vector<8x8xbf16>
    %16 = vector.extract_strided_slice %9 {offsets = [0, 3], sizes = [8, 128], strides = [1, 1]} : vector<8x256xbf16> to vector<8x128xbf16>
    %cst_11 = arith.constant dense<0.000000e+00> : vector<8x128xf32>
    %17 = tpu.matmul %15, %16, %cst_11 {dimension_numbers = #tpu.dot_dimension_numbers<[1], [0], [0], [1], [0, 0, 1, 1], [], []>} : vector<8x8xbf16>, vector<8x128xbf16>, vector<8x128xf32> -> vector<8x128xf32>
    %18 = arith.addf %14, %17 : vector<8x128xf32>
    %c0_12 = arith.constant 0 : index
    %c16 = arith.constant 16 : index
    %19 = vector.load %arg4[%c0_12, %c16] : memref<8x24xbf16, #tpu.memory_space<vmem>>, vector<8x8xbf16>
    %20 = vector.extract_strided_slice %9 {offsets = [0, 6], sizes = [8, 128], strides = [1, 1]} : vector<8x256xbf16> to vector<8x128xbf16>
    %cst_13 = arith.constant dense<0.000000e+00> : vector<8x128xf32>
    %21 = tpu.matmul %19, %20, %cst_13 {dimension_numbers = #tpu.dot_dimension_numbers<[1], [0], [0], [1], [0, 0, 1, 1], [], []>} : vector<8x8xbf16>, vector<8x128xbf16>, vector<8x128xf32> -> vector<8x128xf32>
    %22 = arith.addf %18, %21 : vector<8x128xf32>
    %c0_14 = arith.constant 0 : index
    %c0_15 = arith.constant 0 : index
    %23 = vector.load %arg5[%c0_14, %c0_15] : memref<8x1xf32, #tpu.memory_space<vmem>>, vector<8x1xf32>
    %24 = vector.broadcast %23 : vector<8x1xf32> to vector<8x128xf32>
    %25 = arith.addf %22, %24 : vector<8x128xf32>
    %c128_i32 = arith.constant 128 : i32
    %26 = arith.muli %arg1, %c128_i32 : i32
    %27 = tpu.iota {dimensions = array<i32: 1>} : vector<8x128xi32>
    %28 = vector.broadcast %26 : i32 to vector<8x128xi32>
    %29 = arith.addi %28, %27 : vector<8x128xi32>
    %c32_i32 = arith.constant 32 : i32
    %30 = vector.broadcast %c32_i32 : i32 to vector<8x128xi32>
    %31 = arith.cmpi slt, %29, %30 : vector<8x128xi32>
    %cst_16 = arith.constant 0.000000e+00 : f32
    %32 = vector.broadcast %cst_16 : f32 to vector<8x128xf32>
    %33 = arith.select %31, %25, %32 : vector<8x128xi1>, vector<8x128xf32>
    %34 = arith.truncf %33 : vector<8x128xf32> to vector<8x128xbf16>
    %c0_17 = arith.constant 0 : index
    %c0_18 = arith.constant 0 : index
    %c0_19 = arith.constant 0 : index
    %35 = vector.load %arg6[%c0_17, %c0_18, %c0_19] : memref<1x8x128xbf16, #tpu.memory_space<vmem>>, vector<1x8x128xbf16>
    %36 = vector.shape_cast %35 : vector<1x8x128xbf16> to vector<8x128xbf16>
    %37 = vector.shape_cast %34 : vector<8x128xbf16> to vector<1x8x128xbf16>
    tpu.vector_store %arg6[%c0_17, %c0_18, %c0_19], %37 {strides = array<i32>} : memref<1x8x128xbf16, #tpu.memory_space<vmem>>, vector<1x8x128xbf16>,
    return
  }
  func.func @transform_0(%arg0: i32, %arg1: i32) -> (i32, i32, i32) {
    %c0_i32 = arith.constant 0 : i32
    %c0_i32_0 = arith.constant 0 : i32
    return %arg0, %c0_i32, %arg1 : i32, i32, i32
  }
  func.func @transform_1(%arg0: i32, %arg1: i32) -> (i32, i32, i32) {
    %c1_i32 = arith.constant 1 : i32
    %0 = arith.addi %arg1, %c1_i32 : i32
    %c1_i32_0 = arith.constant 1 : i32
    %1 = arith.muli %0, %c1_i32_0 : i32
    %c0_i32 = arith.constant 0 : i32
    %c0_i32_1 = arith.constant 0 : i32
    return %arg0, %c0_i32, %1 : i32, i32, i32
  }
  func.func @transform_2(%arg0: i32, %arg1: i32) -> (i32, i32) {
    %c0_i32 = arith.constant 0 : i32
    %c0_i32_0 = arith.constant 0 : i32
    %c0_i32_1 = arith.constant 0 : i32
    return %c0_i32, %c0_i32_0 : i32, i32
  }
  func.func @transform_3(%arg0: i32, %arg1: i32) -> (i32, i32) {
    %c0_i32 = arith.constant 0 : i32
    %c0_i32_0 = arith.constant 0 : i32
    %c0_i32_1 = arith.constant 0 : i32
    return %c0_i32, %c0_i32_0 : i32, i32
  }
  func.func @transform_4(%arg0: i32, %arg1: i32) -> (i32, i32, i32) {
    %c0_i32 = arith.constant 0 : i32
    %c0_i32_0 = arith.constant 0 : i32
    return %arg0, %c0_i32, %arg1 : i32, i32, i32
  }
}

module attributes {stable_mosaic.version = 11 : i64} {
  func.func @kernel(%arg0: i32, %arg1: i32, %arg2: memref<1x8x128xbf16, #tpu.memory_space<vmem>>, %arg3: memref<1x8x128xbf16, #tpu.memory_space<vmem>>, %arg4: memref<1x56xbf16, #tpu.memory_space<vmem>>, %arg5: memref<1x1xf32, #tpu.memory_space<vmem>>, %arg6: memref<1x1x128xbf16, #tpu.memory_space<vmem>>) attributes {dimension_semantics = [#tpu.dimension_semantics<parallel>, #tpu.dimension_semantics<parallel>], iteration_bounds = array<i64: 2, 1>, scalar_prefetch = 0 : i64, scratch_operands = 0 : i64, tpu.core_type = #tpu.core_type<tc>, window_params = [{transform_indices = @transform_0, window_bounds = array<i64: 1, 8, 128>}, {transform_indices = @transform_1, window_bounds = array<i64: 1, 8, 128>}, {pipeline_mode = #tpu.pipeline_mode<synchronous>, transform_indices = @transform_2, window_bounds = array<i64: 1, 56>}, {pipeline_mode = #tpu.pipeline_mode<synchronous>, transform_indices = @transform_3, window_bounds = array<i64: 1, 1>}, {transform_indices = @transform_4, window_bounds = array<i64: 1, 1, 128>}]} {
    %c0 = arith.constant 0 : index
    %c0_0 = arith.constant 0 : index
    %c0_1 = arith.constant 0 : index
    %0 = vector.load %arg2[%c0, %c0_0, %c0_1] : memref<1x8x128xbf16, #tpu.memory_space<vmem>>, vector<1x8x128xbf16>
    %1 = vector.shape_cast %0 : vector<1x8x128xbf16> to vector<8x128xbf16>
    %c0_2 = arith.constant 0 : index
    %c0_3 = arith.constant 0 : index
    %c0_4 = arith.constant 0 : index
    %2 = vector.load %arg3[%c0_2, %c0_3, %c0_4] : memref<1x8x128xbf16, #tpu.memory_space<vmem>>, vector<1x8x128xbf16>
    %3 = vector.shape_cast %2 : vector<1x8x128xbf16> to vector<8x128xbf16>
    %4 = tpu.concatenate %1, %3 in 1 : vector<8x128xbf16>, vector<8x128xbf16> -> vector<8x256xbf16>
    %cst = arith.constant 0.000000e+00 : bf16
    %5 = vector.broadcast %cst : bf16 to vector<8x256xbf16>
    %6 = arith.cmpf oge, %4, %5 : vector<8x256xbf16>
    %cst_5 = arith.constant 1.000980e-01 : bf16
    %7 = vector.broadcast %cst_5 : bf16 to vector<8x256xbf16>
    %8 = arith.mulf %7, %4 : vector<8x256xbf16>
    %9 = arith.select %6, %4, %8 : vector<8x256xi1>, vector<8x256xbf16>
    %cst_6 = arith.constant 0.000000e+00 : f32
    %10 = vector.broadcast %cst_6 : f32 to vector<1x128xf32>
    %c0_7 = arith.constant 0 : index
    %c0_8 = arith.constant 0 : index
    %11 = vector.load %arg4[%c0_7, %c0_8] : memref<1x56xbf16, #tpu.memory_space<vmem>>, vector<1x8xbf16>
    %12 = vector.extract_strided_slice %9 {offsets = [0, 0], sizes = [8, 128], strides = [1, 1]} : vector<8x256xbf16> to vector<8x128xbf16>
    %cst_9 = arith.constant dense<0.000000e+00> : vector<1x128xf32>
    %13 = tpu.matmul %11, %12, %cst_9 {dimension_numbers = #tpu.dot_dimension_numbers<[1], [0], [0], [1], [0, 0, 1, 1], [], []>} : vector<1x8xbf16>, vector<8x128xbf16>, vector<1x128xf32> -> vector<1x128xf32>
    %14 = arith.addf %10, %13 : vector<1x128xf32>
    %c0_10 = arith.constant 0 : index
    %c8 = arith.constant 8 : index
    %15 = vector.load %arg4[%c0_10, %c8] : memref<1x56xbf16, #tpu.memory_space<vmem>>, vector<1x8xbf16>
    %16 = vector.extract_strided_slice %9 {offsets = [0, 1], sizes = [8, 128], strides = [1, 1]} : vector<8x256xbf16> to vector<8x128xbf16>
    %cst_11 = arith.constant dense<0.000000e+00> : vector<1x128xf32>
    %17 = tpu.matmul %15, %16, %cst_11 {dimension_numbers = #tpu.dot_dimension_numbers<[1], [0], [0], [1], [0, 0, 1, 1], [], []>} : vector<1x8xbf16>, vector<8x128xbf16>, vector<1x128xf32> -> vector<1x128xf32>
    %18 = arith.addf %14, %17 : vector<1x128xf32>
    %c0_12 = arith.constant 0 : index
    %c16 = arith.constant 16 : index
    %19 = vector.load %arg4[%c0_12, %c16] : memref<1x56xbf16, #tpu.memory_space<vmem>>, vector<1x8xbf16>
    %20 = vector.extract_strided_slice %9 {offsets = [0, 2], sizes = [8, 128], strides = [1, 1]} : vector<8x256xbf16> to vector<8x128xbf16>
    %cst_13 = arith.constant dense<0.000000e+00> : vector<1x128xf32>
    %21 = tpu.matmul %19, %20, %cst_13 {dimension_numbers = #tpu.dot_dimension_numbers<[1], [0], [0], [1], [0, 0, 1, 1], [], []>} : vector<1x8xbf16>, vector<8x128xbf16>, vector<1x128xf32> -> vector<1x128xf32>
    %22 = arith.addf %18, %21 : vector<1x128xf32>
    %c0_14 = arith.constant 0 : index
    %c24 = arith.constant 24 : index
    %23 = vector.load %arg4[%c0_14, %c24] : memref<1x56xbf16, #tpu.memory_space<vmem>>, vector<1x8xbf16>
    %24 = vector.extract_strided_slice %9 {offsets = [0, 3], sizes = [8, 128], strides = [1, 1]} : vector<8x256xbf16> to vector<8x128xbf16>
    %cst_15 = arith.constant dense<0.000000e+00> : vector<1x128xf32>
    %25 = tpu.matmul %23, %24, %cst_15 {dimension_numbers = #tpu.dot_dimension_numbers<[1], [0], [0], [1], [0, 0, 1, 1], [], []>} : vector<1x8xbf16>, vector<8x128xbf16>, vector<1x128xf32> -> vector<1x128xf32>
    %26 = arith.addf %22, %25 : vector<1x128xf32>
    %c0_16 = arith.constant 0 : index
    %c32 = arith.constant 32 : index
    %27 = vector.load %arg4[%c0_16, %c32] : memref<1x56xbf16, #tpu.memory_space<vmem>>, vector<1x8xbf16>
    %28 = vector.extract_strided_slice %9 {offsets = [0, 4], sizes = [8, 128], strides = [1, 1]} : vector<8x256xbf16> to vector<8x128xbf16>
    %cst_17 = arith.constant dense<0.000000e+00> : vector<1x128xf32>
    %29 = tpu.matmul %27, %28, %cst_17 {dimension_numbers = #tpu.dot_dimension_numbers<[1], [0], [0], [1], [0, 0, 1, 1], [], []>} : vector<1x8xbf16>, vector<8x128xbf16>, vector<1x128xf32> -> vector<1x128xf32>
    %30 = arith.addf %26, %29 : vector<1x128xf32>
    %c0_18 = arith.constant 0 : index
    %c40 = arith.constant 40 : index
    %31 = vector.load %arg4[%c0_18, %c40] : memref<1x56xbf16, #tpu.memory_space<vmem>>, vector<1x8xbf16>
    %32 = vector.extract_strided_slice %9 {offsets = [0, 5], sizes = [8, 128], strides = [1, 1]} : vector<8x256xbf16> to vector<8x128xbf16>
    %cst_19 = arith.constant dense<0.000000e+00> : vector<1x128xf32>
    %33 = tpu.matmul %31, %32, %cst_19 {dimension_numbers = #tpu.dot_dimension_numbers<[1], [0], [0], [1], [0, 0, 1, 1], [], []>} : vector<1x8xbf16>, vector<8x128xbf16>, vector<1x128xf32> -> vector<1x128xf32>
    %34 = arith.addf %30, %33 : vector<1x128xf32>
    %c0_20 = arith.constant 0 : index
    %c48 = arith.constant 48 : index
    %35 = vector.load %arg4[%c0_20, %c48] : memref<1x56xbf16, #tpu.memory_space<vmem>>, vector<1x8xbf16>
    %36 = vector.extract_strided_slice %9 {offsets = [0, 6], sizes = [8, 128], strides = [1, 1]} : vector<8x256xbf16> to vector<8x128xbf16>
    %cst_21 = arith.constant dense<0.000000e+00> : vector<1x128xf32>
    %37 = tpu.matmul %35, %36, %cst_21 {dimension_numbers = #tpu.dot_dimension_numbers<[1], [0], [0], [1], [0, 0, 1, 1], [], []>} : vector<1x8xbf16>, vector<8x128xbf16>, vector<1x128xf32> -> vector<1x128xf32>
    %38 = arith.addf %34, %37 : vector<1x128xf32>
    %c0_22 = arith.constant 0 : index
    %c0_23 = arith.constant 0 : index
    %39 = vector.load %arg5[%c0_22, %c0_23] : memref<1x1xf32, #tpu.memory_space<vmem>>, vector<1x1xf32>
    %40 = vector.broadcast %39 : vector<1x1xf32> to vector<1x128xf32>
    %41 = arith.addf %38, %40 : vector<1x128xf32>
    %42 = math.tanh %41 : vector<1x128xf32>
    %c128_i32 = arith.constant 128 : i32
    %43 = arith.muli %arg1, %c128_i32 : i32
    %44 = tpu.iota {dimensions = array<i32: 1>} : vector<1x128xi32>
    %45 = vector.broadcast %43 : i32 to vector<1x128xi32>
    %46 = arith.addi %45, %44 : vector<1x128xi32>
    %c32_i32 = arith.constant 32 : i32
    %47 = vector.broadcast %c32_i32 : i32 to vector<1x128xi32>
    %48 = arith.cmpi slt, %46, %47 : vector<1x128xi32>
    %cst_24 = arith.constant 0.000000e+00 : f32
    %49 = vector.broadcast %cst_24 : f32 to vector<1x128xf32>
    %50 = arith.select %48, %42, %49 : vector<1x128xi1>, vector<1x128xf32>
    %51 = arith.truncf %50 : vector<1x128xf32> to vector<1x128xbf16>
    %c0_25 = arith.constant 0 : index
    %c0_26 = arith.constant 0 : index
    %c0_27 = arith.constant 0 : index
    %52 = vector.load %arg6[%c0_25, %c0_26, %c0_27] : memref<1x1x128xbf16, #tpu.memory_space<vmem>>, vector<1x1x128xbf16>
    %53 = vector.shape_cast %52 : vector<1x1x128xbf16> to vector<1x128xbf16>
    %54 = vector.shape_cast %51 : vector<1x128xbf16> to vector<1x1x128xbf16>
    tpu.vector_store %arg6[%c0_25, %c0_26, %c0_27], %54 {strides = array<i32>} : memref<1x1x128xbf16, #tpu.memory_space<vmem>>, vector<1x1x128xbf16>,
    return
  }
  func.func @transform_0(%arg0: i32, %arg1: i32) -> (i32, i32, i32) {
    %c0_i32 = arith.constant 0 : i32
    %c0_i32_0 = arith.constant 0 : i32
    return %arg0, %c0_i32, %arg1 : i32, i32, i32
  }
  func.func @transform_1(%arg0: i32, %arg1: i32) -> (i32, i32, i32) {
    %c1_i32 = arith.constant 1 : i32
    %0 = arith.addi %arg1, %c1_i32 : i32
    %c1_i32_0 = arith.constant 1 : i32
    %1 = arith.muli %0, %c1_i32_0 : i32
    %c0_i32 = arith.constant 0 : i32
    %c0_i32_1 = arith.constant 0 : i32
    return %arg0, %c0_i32, %1 : i32, i32, i32
  }
  func.func @transform_2(%arg0: i32, %arg1: i32) -> (i32, i32) {
    %c0_i32 = arith.constant 0 : i32
    %c0_i32_0 = arith.constant 0 : i32
    %c0_i32_1 = arith.constant 0 : i32
    return %c0_i32, %c0_i32_0 : i32, i32
  }
  func.func @transform_3(%arg0: i32, %arg1: i32) -> (i32, i32) {
    %c0_i32 = arith.constant 0 : i32
    %c0_i32_0 = arith.constant 0 : i32
    %c0_i32_1 = arith.constant 0 : i32
    return %c0_i32, %c0_i32_0 : i32, i32
  }
  func.func @transform_4(%arg0: i32, %arg1: i32) -> (i32, i32, i32) {
    %c0_i32 = arith.constant 0 : i32
    %c0_i32_0 = arith.constant 0 : i32
    return %arg0, %c0_i32, %arg1 : i32, i32, i32
  }
}

</mosaic_0001>

<bundles_post_ra>
// kernel: _lambda_.23
= control target key start
LH: loop header
LB: loop body
LE: loop exit
PB: predicated region body
PF: predicated region fallthrough
CT: control target
= control target key end

     0   :  { %s783_s15 = smov 0   ;;  %s785_s16 = smov 0   ;;  %s871_s0 = inlined_call_operand.vmem [shape: bf16[2,32,256], index: 0, kind: input, shape index: {}, may-alias: {0,1}]   ;;  %s872_s1 = inlined_call_operand.vmem [shape: bf16[2,32,256], index: 1, kind: input, shape index: {}, may-alias: {0,1}]   ;;  %s873_s2 = inlined_call_operand.vmem [shape: bf16[16,64], index: 2, kind: input, shape index: {}]   ;;  %s874_s3 = inlined_call_operand.vmem [shape: f32[16,1], index: 3, kind: input, shape index: {}]   ;;  %s875_s4 = inlined_call_operand.vmem [shape: bf16[2,16,128], index: 4, kind: output, shape index: {}]  }
   0x1   :  { %s787_s17 = smov 0   ;;  %s789_s18 = smov 0  }
   0x2   :  { %s791_s19 = smov 0  }
   0x3 LB: > { %s26_s20 = sadd.s32 1, %s748_s18  ;;  %p42_p1 = scmp.ne.s32.totalorder %s740_s16, %s736_s15  ;;  %s752_s19 = sphi %s791_s19, %s14_s19   ;;  %s748_s18 = sphi %s789_s18, %s880_s18   ;;  %s744_s17 = sphi %s787_s17, %s879_s17   ;;  %s740_s16 = sphi %s785_s16, %s878_s16   ;;  %s736_s15 = sphi %s783_s15, %s877_s15  }
   0x4   : > { %p28_p0 = scmp.ge.s32.totalorder %s26_s20, 2  ;;  %p43_p2 = scmp.eq.s32.totalorder %s752_s19, 0 }
   0x5   : > { %s35_s23 = sadd.s32 1, %s740_s16  ;;  %p610_p5 = scmp.ge.s32.totalorder %s752_s19, 2 }
   0x6   : > { %s882_s20 = smov (%p28_p0, %s26_s20), 0  ;;  %p814_p3 = por %p43_p2, %p42_p1 }
   0x7   : > { %s30_s22 = ssub.s32 %s748_s18, %s882_s20  ;;  %174 = sbr.rel (%p610_p5) target bundleno = 28 (0x1c), region = 24 }
   0x8   : > { %p33_p4 = scmp.eq.s32.totalorder %s30_s22, 0 }
   0xa   : > { %s822_s24 = scalar_select %p33_p4, %s740_s16, %s35_s23  }
   0xe   : > { %177 = sbr.rel (!%p814_p3) target bundleno = 21 (0x15), region = 28  ;;  %s179_s25 = sand.u32 (%p814_p3), 1, %s740_s16  }
   0xf   : > { %s636_s26 = sshll.u32 (%p814_p3), %s748_s18, 5  ;;  %s611_s27 = sshll.u32 (%p814_p3), %s179_s25, 4 }
  0x10   : > { %s185_s30 = scalar_lea.vmem (%p814_p3), %s871_s0, %s636_s26  ;;  %s181_s5 = scalar_lea.vmem (%p814_p3), [#allocation2], %s611_s27 }
  0x11   : > { %v201_v0 = vld [vmem:[%s185_s30] sm:$0xf] (%p814_p3)  ;;  %v203_v1 = vld [vmem:[%s185_s30 + $0x8] sm:$0xf] (%p814_p3)  ;;  %v205_v2 = vld [vmem:[%s185_s30 + $0x10] sm:$0xf] (%p814_p3) }
  0x12   : > { %202 = vst [vmem:[%s181_s5] sm:$0xf] (%p814_p3), %v201_v0  ;;  %204 = vst [vmem:[%s181_s5 + $0x4] sm:$0xf] (%p814_p3), %v203_v1  ;;  %v207_v3 = vld [vmem:[%s185_s30 + $0x18] sm:$0xf] (%p814_p3) }
  0x13   : > { %206 = vst [vmem:[%s181_s5 + $0x8] sm:$0xf] (%p814_p3), %v205_v2  ;;  %208 = vst [vmem:[%s181_s5 + $0xc] sm:$0xf] (%p814_p3), %v207_v3 }
  0x15 PF: > { %239 = sbr.rel (!%p814_p3) target bundleno = 28 (0x1c), region = 69  ;;  %s241_s6 = sand.u32 (%p814_p3), 1, %s740_s16  }
  0x16   : > { %s637_s7 = sshll.u32 (%p814_p3), %s748_s18, 5  ;;  %s614_s8 = sshll.u32 (%p814_p3), %s241_s6, 4 }
  0x17   : > { %s539_s11 = scalar_lea.vmem (%p814_p3), %s872_s1, %s637_s7  ;;  %s243_s12 = scalar_lea.vmem (%p814_p3), [#allocation3], %s614_s8 }
  0x18   : > { %v617_v4 = vld [vmem:[%s539_s11 + $0x4] sm:$0xf] (%p814_p3)  ;;  %v618_v5 = vld [vmem:[%s539_s11 + $0xc] sm:$0xf] (%p814_p3)  ;;  %v619_v6 = vld [vmem:[%s539_s11 + $0x14] sm:$0xf] (%p814_p3) }
  0x19   : > { %265 = vst [vmem:[%s243_s12] sm:$0xf] (%p814_p3), %v617_v4  ;;  %267 = vst [vmem:[%s243_s12 + $0x4] sm:$0xf] (%p814_p3), %v618_v5  ;;  %v620_v7 = vld [vmem:[%s539_s11 + $0x1c] sm:$0xf] (%p814_p3) }
  0x1a   : > { %269 = vst [vmem:[%s243_s12 + $0x8] sm:$0xf] (%p814_p3), %v619_v6  ;;  %271 = vst [vmem:[%s243_s12 + $0xc] sm:$0xf] (%p814_p3), %v620_v7 }
  0x1c PF: > { %p621_p6 = scmp.ge.s32.totalorder %s752_s19, 1  ;;  %p301_p7 = scmp.lt.s32.totalorder %s752_s19, 3 }
  0x1e   : > { %p302_p8 = pnand %p621_p6, %p301_p7 }
  0x1f   : > { %s308_s13 = sand.u32 (!%p302_p8), 1, %s736_s15   ;;  %v754_v8 = vmov (!%p302_p8), 0.0   ;;  %s755_s23 = smov (!%p302_p8), 127   ;;  %vm756_vm4 = vmmov (!%p302_p8), 0   ;;  %v757_v21 = vmov (!%p302_p8), 0   ;;  %v422_v22 = vld [vmem:[%s874_s3 + $0x8] sm:$0xff] (!%p302_p8)  ;;  %v484_v31 = vlaneseq (!%p302_p8) }
  0x20   : > { %305 = sbr.rel (%p302_p8) target bundleno = 386 (0x182), region = 110  ;;  %s622_s14 = sshll.u32 (!%p302_p8), %s308_s13, 4  ;;  %651 = vmatprep.subr.bf16.mxu0 (!%p302_p8), %v754_v8  ;;  %659 = vmatprep.mubr.msk.bf16.mxu0 (!%p302_p8), %vm756_vm4, %v754_v8  ;;  %v421_v23 = vld [vmem:[%s874_s3] sm:$0xff] (!%p302_p8)  ;;  %vm414_vm5 = vcmask (!%p302_p8), 1039360   ;;  %vm438_vm6 = vcmask (!%p302_p8), 523264  }
  0x21   : > { %s310_s21 = scalar_lea.vmem (!%p302_p8), [#allocation2], %s622_s14  ;;  %s317_s22 = scalar_lea.vmem (!%p302_p8), [#allocation3], %s622_s14  ;;  %707 = vset.pattern.permute.xlu0 (!%p302_p8), %v757_v21  ;;  %708 = vset.pattern.permute.xlu1 (!%p302_p8), %v757_v21  ;;  %v713_v30 = vld [vmem:[%s873_s2] sm:$0xff] (!%p302_p8)   ;;  %v485_v33 = vand.u32 (!%p302_p8), 127, %v484_v31 }
  0x22   : > { %v709_v9 = vld [vmem:[%s310_s21 + $0x8] sm:$0xff] (!%p302_p8)   ;;  %v710_v10 = vld [vmem:[%s310_s21] sm:$0xff] (!%p302_p8)   ;;  %p348_p9 = scmp.lt.s32.totalorder (!%p302_p8), %s744_s17, 1 }
  0x23   : > { %vm392_vm0 = vcmp.ge.bf16.partialorder (!%p302_p8), %v709_v9, 0  ;;  %v396_v11 = vmul.bf16 (!%p302_p8), 1036860877, %v709_v9  ;;  %v711_v12 = vld [vmem:[%s317_s22 + $0x8] sm:$0xff] (!%p302_p8)   ;;  %vm390_vm1 = vcmp.ge.bf16.partialorder (!%p302_p8), %v710_v10, 0  ;;  %v712_v14 = vld [vmem:[%s317_s22] sm:$0xff] (!%p302_p8)  }
  0x24   : > { %v394_v13 = vmul.bf16 (!%p302_p8), 1036860877, %v710_v10  ;;  %vm393_vm2 = vcmp.ge.bf16.partialorder (!%p302_p8), %v711_v12, 0  ;;  %v397_v16 = vmul.bf16 (!%p302_p8), 1036860877, %v711_v12  ;;  %vm391_vm3 = vcmp.ge.bf16.partialorder (!%p302_p8), %v712_v14, 0 }
  0x25   : > { %v400_v15 = vsel (!%p302_p8), %vm392_vm0, %v709_v9, %v396_v11  ;;  %v395_v18 = vmul.bf16 (!%p302_p8), 1036860877, %v712_v14  ;;  %vm488_vm7 = vcmp.lt.s32.totalorder (!%p302_p8), %v485_v33, 9 }
  0x26   : > { %410 = vrot.lane.b32.xlu1 (!%p302_p8), %v400_v15, %s755_s23  ;;  %v398_v17 = vsel (!%p302_p8), %vm390_vm1, %v710_v10, %v394_v13  ;;  %v401_v19 = vsel (!%p302_p8), %vm393_vm2, %v711_v12, %v397_v16 }
  0x27   : > { %406 = vrot.lane.b32.xlu0 %v398_v17, %s755_s23  ;;  %652 = vmatpush3.bf16.msra.mxu0 %v398_v17  ;;  %v399_v20 = vsel %vm391_vm3, %v712_v14, %v395_v18  ;;  %s884_s17 = smov (!%p348_p9, %s744_s17), 1 }
  0x28   : > { %653 = vmatprep.subr.bf16.mxu0 %v754_v8  ;;  %s638_s30 = sshll.u32 %s884_s17, 3 }
  0x29   : > { %s355_s7 = scalar_lea.vmem %s875_s4, %s638_s30 }
  0x2a   : > { %412 = vrot.lane.b32.xlu1 %v401_v19, %s755_s23 }
  0x2b   : > { %408 = vrot.lane.b32.xlu0 %v399_v20, %s755_s23  ;;  %654 = vmatpush3.bf16.msra.mxu0 %v400_v15 }
  0x2c   : > { %655 = vmatprep.subr.bf16.mxu0 %v754_v8 }
  0x2e   : > { %430 = vperm.xlu1 %708, %v422_v22  }
  0x2f   : > { %425 = vperm.xlu0 %707, %v421_v23  }
  0x98   : > { %v411_v24 = vpop.permute.xlu1 %410 }
  0x99   : > { %v407_v25 = vpop.permute.xlu0 %406 }
  0x9c   : > { %v413_v28 = vpop.permute.xlu1 %412 }
  0x9d   : > { %v409_v26 = vpop.permute.xlu0 %408  ;;  %v416_v29 = vsel %vm414_vm5, %v411_v24, %v413_v28 }
  0x9e   : > { %v415_v27 = vsel %vm414_vm5, %v407_v25, %v409_v26 }
  0x9f   : > { %656 = vmatpush3.bf16.msra.mxu0 %v415_v27 }
  0xa0   : > { %657 = vmatprep.subr.bf16.mxu0 %v754_v8 }
  0xa3   : > { %658 = vmatpush3.bf16.msra.mxu0 %v416_v29 }
  0xa6   : > { %660 = vmatmul.mubr.msk.bf16.vlgmr.msra.gmra.mrb[0].mxu0 %vm438_vm6, %v713_v30 }
  0xad   : > { %v431_v35 = vpop.permute.xlu1 %430 }
  0xae   : > { %v426_v32 = vpop.permute.xlu0 %425 }
 0x179   : > { %v476_v34 = vpop.f32.mrb[0].mxu0 }
 0x17a   : > { %v477_v36 = vadd.f32 %v476_v34, %v426_v32  ;;  %v661_v37 = vpop.f32.mrb[1].mxu0 }
 0x17b   : > { %v479_v38 = vpop.f32.mrb[2].mxu0 }
 0x17c   : > { %v480_v39 = vadd.f32 %v479_v38, %v431_v35  ;;  %v662_v40 = vpop.f32.mrb[3].mxu0  ;;  %v489_v41 = vsel %vm488_vm7, %v477_v36, 0.0 }
 0x17e   : > { %v490_v42 = vsel %vm488_vm7, %v480_v39, 0.0 }
 0x17f   : > { %v644_v43 = vpack.c.bf16 %v490_v42, %v489_v41 }
 0x181   : > { %645 = vst [vmem:[%s355_s7] sm:$0xff] %v644_v43  }
 0x182 PF: > { %s14_s19 = sadd.s32 1, %s752_s19   ;;  %s877_s15 = smov %s740_s16 }
 0x183   : > { %p11_p10 = scmp.ge.s32.totalorder %s14_s19, 4   ;;  %s878_s16 = smov %s822_s24 }
 0x184   : > { %s879_s17 = smov %s748_s18  ;;  %s880_s18 = smov %s882_s20 }
 0x185   :  { %13 = sbr.rel (!%p11_p10) target bundleno = 3 (0x3), region = 161 }

// kernel: _lambda_.25
= control target key start
LH: loop header
LB: loop body
LE: loop exit
PB: predicated region body
PF: predicated region fallthrough
CT: control target
= control target key end

     0   :  { %s737_s15 = smov 0   ;;  %s739_s16 = smov 0   ;;  %s825_s0 = inlined_call_operand.vmem [shape: bf16[2,16,256], index: 0, kind: input, shape index: {}, may-alias: {0,1}]   ;;  %s826_s1 = inlined_call_operand.vmem [shape: bf16[2,16,256], index: 1, kind: input, shape index: {}, may-alias: {0,1}]   ;;  %s827_s2 = inlined_call_operand.vmem [shape: bf16[16,48], index: 2, kind: input, shape index: {}]   ;;  %s828_s3 = inlined_call_operand.vmem [shape: f32[16,1], index: 3, kind: input, shape index: {}]   ;;  %s829_s4 = inlined_call_operand.vmem [shape: bf16[2,16,128], index: 4, kind: output, shape index: {}]  }
   0x1   :  { %s741_s17 = smov 0   ;;  %s743_s18 = smov 0  }
   0x2   :  { %s745_s19 = smov 0  }
   0x3 LB: > { %s26_s20 = sadd.s32 1, %s701_s18  ;;  %p42_p1 = scmp.ne.s32.totalorder %s693_s16, %s689_s15  ;;  %s705_s19 = sphi %s745_s19, %s14_s19   ;;  %s701_s18 = sphi %s743_s18, %s834_s18   ;;  %s697_s17 = sphi %s741_s17, %s833_s17   ;;  %s693_s16 = sphi %s739_s16, %s832_s16   ;;  %s689_s15 = sphi %s737_s15, %s831_s15  }
   0x4   : > { %p28_p0 = scmp.ge.s32.totalorder %s26_s20, 2  ;;  %p43_p2 = scmp.eq.s32.totalorder %s705_s19, 0 }
   0x5   : > { %s35_s23 = sadd.s32 1, %s693_s16  ;;  %p571_p5 = scmp.ge.s32.totalorder %s705_s19, 2 }
   0x6   : > { %s836_s20 = smov (%p28_p0, %s26_s20), 0  ;;  %p768_p3 = por %p43_p2, %p42_p1 }
   0x7   : > { %s30_s22 = ssub.s32 %s701_s18, %s836_s20  ;;  %174 = sbr.rel (%p571_p5) target bundleno = 28 (0x1c), region = 24 }
   0x8   : > { %p33_p4 = scmp.eq.s32.totalorder %s30_s22, 0 }
   0xa   : > { %s776_s24 = scalar_select %p33_p4, %s693_s16, %s35_s23  }
   0xe   : > { %177 = sbr.rel (!%p768_p3) target bundleno = 21 (0x15), region = 28  ;;  %s179_s25 = sand.u32 (%p768_p3), 1, %s693_s16  }
   0xf   : > { %s593_s26 = sshll.u32 (%p768_p3), %s701_s18, 4  ;;  %s572_s27 = sshll.u32 (%p768_p3), %s179_s25, 3 }
  0x10   : > { %s185_s30 = scalar_lea.vmem (%p768_p3), %s825_s0, %s593_s26  ;;  %s181_s5 = scalar_lea.vmem (%p768_p3), [#allocation2], %s572_s27 }
  0x11   : > { %v201_v0 = vld [vmem:[%s185_s30] sm:$0xf] (%p768_p3)  ;;  %v203_v1 = vld [vmem:[%s185_s30 + $0x8] sm:$0xf] (%p768_p3) }
  0x12   : > { %202 = vst [vmem:[%s181_s5] sm:$0xf] (%p768_p3), %v201_v0  ;;  %204 = vst [vmem:[%s181_s5 + $0x4] sm:$0xf] (%p768_p3), %v203_v1 }
  0x15 PF: > { %231 = sbr.rel (!%p768_p3) target bundleno = 28 (0x1c), region = 69  ;;  %s233_s6 = sand.u32 (%p768_p3), 1, %s693_s16  }
  0x16   : > { %s594_s7 = sshll.u32 (%p768_p3), %s701_s18, 4  ;;  %s575_s8 = sshll.u32 (%p768_p3), %s233_s6, 3 }
  0x17   : > { %s500_s11 = scalar_lea.vmem (%p768_p3), %s826_s1, %s594_s7  ;;  %s235_s12 = scalar_lea.vmem (%p768_p3), [#allocation3], %s575_s8 }
  0x18   : > { %v578_v2 = vld [vmem:[%s500_s11 + $0x4] sm:$0xf] (%p768_p3)  ;;  %v579_v3 = vld [vmem:[%s500_s11 + $0xc] sm:$0xf] (%p768_p3) }
  0x19   : > { %257 = vst [vmem:[%s235_s12] sm:$0xf] (%p768_p3), %v578_v2  ;;  %259 = vst [vmem:[%s235_s12 + $0x4] sm:$0xf] (%p768_p3), %v579_v3 }
  0x1c PF: > { %p580_p6 = scmp.ge.s32.totalorder %s705_s19, 1  ;;  %p285_p7 = scmp.lt.s32.totalorder %s705_s19, 3 }
  0x1e   : > { %p286_p8 = pnand %p580_p6, %p285_p7 }
  0x1f   : > { %s292_s13 = sand.u32 (!%p286_p8), 1, %s689_s15   ;;  %v707_v4 = vmov (!%p286_p8), 0.0   ;;  %vm708_vm1 = vmmov (!%p286_p8), 0   ;;  %s709_s23 = smov (!%p286_p8), 126   ;;  %v711_v11 = vmov (!%p286_p8), 0   ;;  %v382_v12 = vld [vmem:[%s828_s3] sm:$0xff] (!%p286_p8)  ;;  %v445_v21 = vlaneseq (!%p286_p8) }
  0x20   : > { %289 = sbr.rel (%p286_p8) target bundleno = 385 (0x181), region = 110  ;;  %s581_s14 = sshll.u32 (!%p286_p8), %s292_s13, 3  ;;  %607 = vmatprep.subr.bf16.mxu0 (!%p286_p8), %v707_v4  ;;  %613 = vmatprep.mubr.msk.bf16.mxu0 (!%p286_p8), %vm708_vm1, %v707_v4  ;;  %v383_v13 = vld [vmem:[%s828_s3 + $0x8] sm:$0xff] (!%p286_p8)  ;;  %vm370_vm3 = vcmask (!%p286_p8), 1039360   ;;  %vm377_vm4 = vcmask (!%p286_p8), 1031168   ;;  %v666_v20 = vld [vmem:[%s827_s2] sm:$0xff] (!%p286_p8)  }
  0x21   : > { %s294_s21 = scalar_lea.vmem (!%p286_p8), [#allocation2], %s581_s14  ;;  %s301_s22 = scalar_lea.vmem (!%p286_p8), [#allocation3], %s581_s14  ;;  %662 = vset.pattern.permute.xlu0 (!%p286_p8), %v711_v11  ;;  %663 = vset.pattern.permute.xlu1 (!%p286_p8), %v711_v11  ;;  %vm399_vm5 = vcmask (!%p286_p8), 392192   ;;  %v446_v23 = vand.u32 (!%p286_p8), 127, %v445_v21 }
  0x22   : > { %v664_v5 = vld [vmem:[%s294_s21] sm:$0xff] (!%p286_p8)   ;;  %v665_v6 = vld [vmem:[%s301_s22] sm:$0xff] (!%p286_p8)   ;;  %s710_s25 = smov (!%p286_p8), 127   ;;  %p332_p9 = scmp.lt.s32.totalorder (!%p286_p8), %s697_s17, 1 }
  0x23   : > { %vm358_vm0 = vcmp.ge.bf16.partialorder (!%p286_p8), %v664_v5, 0  ;;  %v360_v7 = vmul.bf16 (!%p286_p8), 1036860877, %v664_v5  ;;  %vm359_vm2 = vcmp.ge.bf16.partialorder (!%p286_p8), %v665_v6, 0  ;;  %v361_v8 = vmul.bf16 (!%p286_p8), 1036860877, %v665_v6 }
  0x24   : > { %vm449_vm6 = vcmp.lt.s32.totalorder (!%p286_p8), %v446_v23, 16 }
  0x25   : > { %v362_v9 = vsel (!%p286_p8), %vm358_vm0, %v664_v5, %v360_v7  ;;  %v363_v10 = vsel (!%p286_p8), %vm359_vm2, %v665_v6, %v361_v8 }
  0x26   : > { %373 = vrot.lane.b32.xlu1 (!%p286_p8), %v362_v9, %s709_s23  ;;  %366 = vrot.lane.b32.xlu0 (!%p286_p8), %v362_v9, %s710_s25 }
  0x27   : > { %608 = vmatpush3.bf16.msra.mxu0 %v362_v9  ;;  %s838_s17 = smov (!%p332_p9, %s697_s17), 1 }
  0x28   : > { %609 = vmatprep.subr.bf16.mxu0 %v707_v4  ;;  %s595_s5 = sshll.u32 %s838_s17, 3 }
  0x29   : > { %s339_s8 = scalar_lea.vmem %s829_s4, %s595_s5 }
  0x2a   : > { %375 = vrot.lane.b32.xlu1 %v363_v10, %s709_s23  ;;  %368 = vrot.lane.b32.xlu0 %v363_v10, %s710_s25 }
  0x2e   : > { %386 = vperm.xlu0 %662, %v382_v12   ;;  %391 = vperm.xlu1 %663, %v383_v13  }
  0x98   : > { %v374_v14 = vpop.permute.xlu1 %373  ;;  %v367_v15 = vpop.permute.xlu0 %366 }
  0x9c   : > { %v369_v16 = vpop.permute.xlu0 %368  ;;  %v376_v18 = vpop.permute.xlu1 %375 }
  0x9d   : > { %v371_v17 = vsel %vm370_vm3, %v367_v15, %v369_v16  ;;  %v378_v19 = vsel %vm377_vm4, %v374_v14, %v376_v18 }
  0x9e   : > { %610 = vmatpush3.bf16.msra.mxu0 %v371_v17 }
  0x9f   : > { %611 = vmatprep.subr.bf16.mxu0 %v707_v4 }
  0xa2   : > { %612 = vmatpush3.bf16.msra.mxu0 %v378_v19 }
  0xa5   : > { %614 = vmatmul.mubr.msk.bf16.vlgmr.msra.gmra.mrb[0].mxu0 %vm399_vm5, %v666_v20 }
  0xad   : > { %v387_v22 = vpop.permute.xlu0 %386  ;;  %v392_v25 = vpop.permute.xlu1 %391 }
 0x178   : > { %v437_v24 = vpop.f32.mrb[0].mxu0 }
 0x179   : > { %v438_v26 = vadd.f32 %v437_v24, %v387_v22  ;;  %v615_v27 = vpop.f32.mrb[1].mxu0 }
 0x17a   : > { %v440_v28 = vpop.f32.mrb[2].mxu0 }
 0x17b   : > { %v441_v29 = vadd.f32 %v440_v28, %v392_v25  ;;  %v616_v30 = vpop.f32.mrb[3].mxu0  ;;  %v450_v31 = vsel %vm449_vm6, %v438_v26, 0.0 }
 0x17d   : > { %v451_v32 = vsel %vm449_vm6, %v441_v29, 0.0 }
 0x17e   : > { %v601_v33 = vpack.c.bf16 %v451_v32, %v450_v31 }
 0x180   : > { %602 = vst [vmem:[%s339_s8] sm:$0xff] %v601_v33  }
 0x181 PF: > { %s14_s19 = sadd.s32 1, %s705_s19   ;;  %s831_s15 = smov %s693_s16 }
 0x182   : > { %p11_p10 = scmp.ge.s32.totalorder %s14_s19, 4   ;;  %s832_s16 = smov %s776_s24 }
 0x183   : > { %s833_s17 = smov %s701_s18  ;;  %s834_s18 = smov %s836_s20 }
 0x184   :  { %13 = sbr.rel (!%p11_p10) target bundleno = 3 (0x3), region = 161 }

// kernel: _lambda_.22
= control target key start
LH: loop header
LB: loop body
LE: loop exit
PB: predicated region body
PF: predicated region fallthrough
CT: control target
= control target key end

     0   :  { %s1183_s15 = smov 0   ;;  %s1185_s16 = smov 0   ;;  %s1297_s0 = inlined_call_operand.vmem [shape: bf16[2,8,256], index: 0, kind: input, shape index: {}, may-alias: {0,1}]   ;;  %s1298_s1 = inlined_call_operand.vmem [shape: bf16[2,8,256], index: 1, kind: input, shape index: {}, may-alias: {0,1}]   ;;  %s1299_s2 = inlined_call_operand.vmem [shape: bf16[32,56], index: 2, kind: input, shape index: {}]   ;;  %s1300_s3 = inlined_call_operand.vmem [shape: f32[32,1], index: 3, kind: input, shape index: {}]   ;;  %s1301_s4 = inlined_call_operand.vmem [shape: bf16[2,32,128], index: 4, kind: output, shape index: {}]  }
   0x1   :  { %s1187_s17 = smov 0  }
   0x2 LB: > { %s26_s18 = sadd.s32 1, %s1139_s16  ;;  %p937_p0 = scmp.ge.s32.totalorder %s1143_s17, 1  ;;  %s1143_s17 = sphi %s1187_s17, %s14_s17   ;;  %s1139_s16 = sphi %s1185_s16, %s1303_s16   ;;  %s1135_s15 = sphi %s1183_s15, %s1302_s15  }
   0x3   : > { %p28_p1 = scmp.ge.s32.totalorder %s26_s18, 2  ;;  %p200_p2 = scmp.lt.s32.totalorder %s1143_s17, 3 }
   0x5   : > { %s1305_s18 = smov (%p28_p1, %s26_s18), 0  ;;  %p201_p3 = pnand %p937_p0, %p200_p2 }
   0x6   : > { %v1204_v0 = vld [vmem:[%s1299_s2] sm:$0xff] (!%p201_p3)   ;;  %p241_p4 = scmp.lt.s32.totalorder (!%p201_p3), %s1135_s15, 1  ;;  %s1145_s21 = smov (!%p201_p3), 104   ;;  %v1210_v1 = vld [vmem:[%s1299_s2 + $0x8] sm:$0xff] (!%p201_p3)   ;;  %v1155_v4 = vmov (!%p201_p3), 0   ;;  %v776_v6 = vld [vmem:[%s1300_s3 + $0x10] sm:$0xff] (!%p201_p3)  ;;  %v803_v47 = vlaneseq (!%p201_p3) }
   0x7   : > { %204 = sbr.rel (%p201_p3) target bundleno = 401 (0x191), region = 36  ;;  %486 = vrot.lane.b32.xlu1 (!%p201_p3), %v1204_v0, %s1145_s21  ;;  %s1146_s6 = smov (!%p201_p3), 125   ;;  %1117 = vset.pattern.permute.xlu0 (!%p201_p3), %v1155_v4  ;;  %v775_v5 = vld [vmem:[%s1300_s3 + $0x8] sm:$0xff] (!%p201_p3)  ;;  %v774_v7 = vld [vmem:[%s1300_s3] sm:$0xff] (!%p201_p3)  ;;  %v777_v8 = vld [vmem:[%s1300_s3 + $0x18] sm:$0xff] (!%p201_p3)  ;;  %vm296_vm0 = vcmask (!%p201_p3), 64512  }
   0x8   : > { %s1147_s7 = smov (!%p201_p3), 127   ;;  %s1148_s8 = smov (!%p201_p3), 124   ;;  %1118 = vset.pattern.permute.xlu1 (!%p201_p3), %v1155_v4  ;;  %vm494_vm1 = vcmask (!%p201_p3), 1022976   ;;  %vm303_vm2 = vcmask (!%p201_p3), 1043456   ;;  %vm294_vm3 = vcmask (!%p201_p3), 1039360   ;;  %vm566_vm4 = vcmask (!%p201_p3), 1014784  }
   0x9   : > { %s1149_s9 = smov (!%p201_p3), 96   ;;  %s1150_s10 = smov (!%p201_p3), 120   ;;  %vm638_vm5 = vcmask (!%p201_p3), 1006592   ;;  %vm422_vm6 = vcmask (!%p201_p3), 1031168   ;;  %vm710_vm7 = vcmask (!%p201_p3), 998400   ;;  %v804_v53 = vand.u32 (!%p201_p3), 127, %v803_v47 }
   0xa   : > { %s1151_s11 = smov (!%p201_p3), 123   ;;  %s1152_s12 = smov (!%p201_p3), 88  }
   0xb   : > { %488 = vrot.lane.b32.xlu1 (!%p201_p3), %v1210_v1, %s1145_s21  ;;  %s1153_s13 = smov (!%p201_p3), 126   ;;  %s1154_s14 = smov (!%p201_p3), 122   ;;  %vm807_vm8 = vcmp.lt.s32.totalorder (!%p201_p3), %v804_v53, 8 }
   0xc   : > { %s1156_s19 = smov (!%p201_p3), 80   ;;  %s1157_s22 = smov (!%p201_p3), 112  }
   0xe   : > { %s1307_s15 = smov (!%p241_p4, %s1135_s15), 1 }
   0xf   : > { %s966_s24 = sshll.u32 %s1307_s15, 3  ;;  %s969_s29 = sshll.u32 %s1307_s15, 4 }
  0x10   : > { %s248_s27 = scalar_lea.vmem %s1297_s0, %s966_s24  ;;  %s968_s28 = sadd.s32 4, %s966_s24 }
  0x11   : > { %v1219_v2 = vld [vmem:[%s248_s27] sm:$0xf]  ;;  %s257_s5 = scalar_lea.vmem %s1298_s1, %s968_s28 }
  0x12   : > { %490 = vrot.lane.b32.xlu0 %v1219_v2, %s1146_s6  ;;  %v269_v3 = vld [vmem:[%s257_s5] sm:$0xf]  ;;  %v363_v27 = vsel %vm303_vm2, %v1219_v2, 0 }
  0x13   : > { %292 = vrot.lane.b32.xlu1 %v269_v3, %s1147_s7 }
  0x16   : > { %492 = vrot.lane.b32.xlu0 %v269_v3, %s1146_s6  ;;  %s266_s6 = scalar_lea.vmem %s1301_s4, %s969_s29 }
  0x17   : > { %564 = vrot.lane.b32.xlu1 %v269_v3, %s1148_s8 }
  0x1a   : > { %290 = vrot.lane.b32.xlu0 %v1219_v2, %s1147_s7 }
  0x1b   : > { %558 = vrot.lane.b32.xlu1 %v1204_v0, %s1149_s9 }
  0x1e   : > { %562 = vrot.lane.b32.xlu0 %v1219_v2, %s1148_s8 }
  0x1f   : > { %560 = vrot.lane.b32.xlu1 %v1210_v1, %s1149_s9 }
  0x22   : > { %284 = vrot.lane.b32.xlu0 %v1204_v0, %s1150_s10 }
  0x23   : > { %636 = vrot.lane.b32.xlu1 %v269_v3, %s1151_s11 }
  0x26   : > { %286 = vrot.lane.b32.xlu0 %v1210_v1, %s1150_s10 }
  0x27   : > { %632 = vrot.lane.b32.xlu1 %v1210_v1, %s1152_s12 }
  0x2a   : > { %634 = vrot.lane.b32.xlu0 %v1219_v2, %s1151_s11 }
  0x2b   : > { %420 = vrot.lane.b32.xlu1 %v269_v3, %s1153_s13 }
  0x2e   : > { %630 = vrot.lane.b32.xlu0 %v1204_v0, %s1152_s12 }
  0x2f   : > { %708 = vrot.lane.b32.xlu1 %v269_v3, %s1154_s14 }
  0x32   : > { %418 = vrot.lane.b32.xlu0 %v1219_v2, %s1153_s13 }
  0x33   : > { %702 = vrot.lane.b32.xlu1 %v1204_v0, %s1156_s19 }
  0x36   : > { %706 = vrot.lane.b32.xlu0 %v1219_v2, %s1154_s14 }
  0x37   : > { %704 = vrot.lane.b32.xlu1 %v1210_v1, %s1156_s19 }
  0x3a   : > { %414 = vrot.lane.b32.xlu0 %v1204_v0, %s1157_s22 }
  0x3b   : > { %785 = vperm.xlu1 %1118, %v775_v5  }
  0x3e   : > { %416 = vrot.lane.b32.xlu0 %v1210_v1, %s1157_s22 }
  0x3f   : > { %790 = vperm.xlu1 %1118, %v776_v6  }
  0x42   : > { %780 = vperm.xlu0 %1117, %v774_v7  }
  0x46   : > { %795 = vperm.xlu0 %1117, %v777_v8  }
  0x79   : > { %v487_v9 = vpop.permute.xlu1 %486 }
  0x7a   : > { %1027 = vmatprep.mubr.msk.bf16.mxu0 %vm296_vm0, %v487_v9 }
  0x7d   : > { %v489_v10 = vpop.permute.xlu1 %488 }
  0x84   : > { %v491_v11 = vpop.permute.xlu0 %490 }
  0x85   : > { %v293_v12 = vpop.permute.xlu1 %292 }
  0x88   : > { %v493_v13 = vpop.permute.xlu0 %492 }
  0x89   : > { %v495_v14 = vsel %vm494_vm1, %v491_v11, %v493_v13  ;;  %v565_v16 = vpop.permute.xlu1 %564 }
  0x8a   : > { %1076 = vmatprep.subr.msk.bf16.mxu0 %vm303_vm2, %v495_v14  ;;  %v503_v15 = vsel %vm303_vm2, %v495_v14, 0 }
  0x8b   : > { %1026 = vmatpush3.bf16.msra.mxu0 %v503_v15 }
  0x8c   : > { %v291_v17 = vpop.permute.xlu0 %290 }
  0x8d   : > { %v295_v18 = vsel %vm294_vm3, %v291_v17, %v293_v12  ;;  %v559_v20 = vpop.permute.xlu1 %558 }
  0x8e   : > { %1073 = vmatprep.subr.msk.bf16.mxu1 %vm303_vm2, %v295_v18  ;;  %1028 = vmatmul.mubr.msk.bf16.vlgmr.msra.gmra.mrb[0].mxu0 %vm296_vm0, %v489_v10  ;;  %v305_v19 = vsel %vm303_vm2, %v295_v18, 0 }
  0x8f   : > { %1008 = vmatpush3.bf16.msra.mxu1 %v305_v19  ;;  %1033 = vmatprep.mubr.msk.bf16.mxu0 %vm296_vm0, %v559_v20 }
  0x90   : > { %v563_v21 = vpop.permute.xlu0 %562  ;;  %1074 = vmatprep.subr.msk.bf16.mxu1 %vm303_vm2, %v1219_v2 }
  0x91   : > { %v567_v22 = vsel %vm566_vm4, %v563_v21, %v565_v16  ;;  %v561_v24 = vpop.permute.xlu1 %560 }
  0x92   : > { %v575_v23 = vsel %vm303_vm2, %v567_v22, 0  ;;  %1077 = vmatprep.subr.msk.bf16.mxu0 %vm303_vm2, %v567_v22 }
  0x93   : > { %1032 = vmatpush3.bf16.msra.mxu0 %v575_v23 }
  0x94   : > { %v285_v25 = vpop.permute.xlu0 %284 }
  0x95   : > { %1009 = vmatprep.mubr.msk.bf16.mxu1 %vm296_vm0, %v285_v25  ;;  %v637_v26 = vpop.permute.xlu1 %636 }
  0x98   : > { %v287_v28 = vpop.permute.xlu0 %286 }
  0x99   : > { %1010 = vmatmul.mubr.msk.bf16.vlgmr.msra.gmra.mrb[0].mxu1 %vm296_vm0, %v287_v28  ;;  %v633_v29 = vpop.permute.xlu1 %632 }
  0x9a   : > { %1034 = vmatmul.mubr.msk.bf16.vlgmr.msra.gmra.mrb[0].mxu0 %vm296_vm0, %v561_v24  ;;  %1014 = vmatpush3.bf16.msra.mxu1 %v363_v27 }
  0x9b   : > { %1015 = vmatprep.mubr.msk.bf16.mxu1 %vm296_vm0, %v1204_v0 }
  0x9c   : > { %v635_v30 = vpop.permute.xlu0 %634 }
  0x9d   : > { %v639_v31 = vsel %vm638_vm5, %v635_v30, %v637_v26  ;;  %v421_v33 = vpop.permute.xlu1 %420 }
  0x9e   : > { %v647_v32 = vsel %vm303_vm2, %v639_v31, 0  ;;  %1078 = vmatprep.subr.msk.bf16.mxu0 %vm303_vm2, %v639_v31 }
  0x9f   : > { %1038 = vmatpush3.bf16.msra.mxu0 %v647_v32 }
  0xa0   : > { %v631_v34 = vpop.permute.xlu0 %630 }
  0xa1   : > { %1039 = vmatprep.mubr.msk.bf16.mxu0 %vm296_vm0, %v631_v34  ;;  %v709_v35 = vpop.permute.xlu1 %708 }
  0xa4   : > { %v419_v36 = vpop.permute.xlu0 %418 }
  0xa5   : > { %v423_v37 = vsel %vm422_vm6, %v419_v36, %v421_v33  ;;  %1016 = vmatmul.mubr.msk.bf16.vlgmr.msra.gmra.mrb[0].mxu1 %vm296_vm0, %v1210_v1  ;;  %v703_v39 = vpop.permute.xlu1 %702 }
  0xa6   : > { %v431_v38 = vsel %vm303_vm2, %v423_v37, 0  ;;  %1075 = vmatprep.subr.msk.bf16.mxu1 %vm303_vm2, %v423_v37  ;;  %1040 = vmatmul.mubr.msk.bf16.vlgmr.msra.gmra.mrb[0].mxu0 %vm296_vm0, %v633_v29 }
  0xa7   : > { %1020 = vmatpush3.bf16.msra.mxu1 %v431_v38  ;;  %1045 = vmatprep.mubr.msk.bf16.mxu0 %vm296_vm0, %v703_v39 }
  0xa8   : > { %v707_v40 = vpop.permute.xlu0 %706 }
  0xa9   : > { %v711_v41 = vsel %vm710_vm7, %v707_v40, %v709_v35  ;;  %v705_v44 = vpop.permute.xlu1 %704 }
  0xaa   : > { %v719_v42 = vsel %vm303_vm2, %v711_v41, 0  ;;  %1079 = vmatprep.subr.msk.bf16.mxu0 %vm303_vm2, %v711_v41 }
  0xab   : > { %1044 = vmatpush3.bf16.msra.mxu0 %v719_v42 }
  0xac   : > { %v415_v43 = vpop.permute.xlu0 %414 }
  0xad   : > { %1021 = vmatprep.mubr.msk.bf16.mxu1 %vm296_vm0, %v415_v43 }
  0xb0   : > { %v417_v45 = vpop.permute.xlu0 %416 }
  0xb1   : > { %1022 = vmatmul.mubr.msk.bf16.vlgmr.msra.gmra.mrb[0].mxu1 %vm296_vm0, %v417_v45 }
  0xb2   : > { %1046 = vmatmul.mubr.msk.bf16.vlgmr.msra.gmra.mrb[0].mxu0 %vm296_vm0, %v705_v44 }
  0xba   : > { %v786_v46 = vpop.permute.xlu1 %785 }
  0xbe   : > { %v791_v50 = vpop.permute.xlu1 %790 }
  0xc1   : > { %v781_v48 = vpop.permute.xlu0 %780 }
  0xc5   : > { %v796_v1 = vpop.permute.xlu0 %795 }
 0x184   : > { %v1023_v49 = vpop.f32.mrb[0].mxu1 }
 0x185   : > { %v1047_v51 = vpop.f32.mrb[0].mxu0  ;;  %v467_v52 = vpop.f32.mrb[1].mxu1 }
 0x186   : > { %v1049_v54 = vadd.f32 %v1047_v51, %v1023_v49  ;;  %v1024_v55 = vpop.f32.mrb[2].mxu1  ;;  %v755_v56 = vpop.f32.mrb[1].mxu0 }
 0x187   : > { %v1050_v57 = vadd.f32 %v755_v56, %v467_v52  ;;  %v470_v58 = vpop.f32.mrb[3].mxu1  ;;  %v1048_v59 = vpop.f32.mrb[2].mxu0 }
 0x188   : > { %v800_v60 = vadd.f32 %v1049_v54, %v791_v50  ;;  %v1051_v61 = vadd.f32 %v1048_v59, %v1024_v55  ;;  %v758_v62 = vpop.f32.mrb[3].mxu0 }
 0x189   : > { %v798_v63 = vadd.f32 %v1050_v57, %v781_v48  ;;  %v1052_v0 = vadd.f32 %v758_v62, %v470_v58 }
 0x18a   : > { %v801_v2 = vadd.f32 %v1051_v61, %v796_v1  ;;  %v810_v4 = vsel %vm807_vm8, %v800_v60, 0.0 }
 0x18b   : > { %v799_v3 = vadd.f32 %v1052_v0, %v786_v46  ;;  %v808_v6 = vsel %vm807_vm8, %v798_v63, 0.0 }
 0x18c   : > { %v811_v5 = vsel %vm807_vm8, %v801_v2, 0.0 }
 0x18d   : > { %v809_v7 = vsel %vm807_vm8, %v799_v3, 0.0  ;;  %v982_v8 = vpack.c.bf16 %v811_v5, %v810_v4 }
 0x18e   : > { %v977_v9 = vpack.c.bf16 %v809_v7, %v808_v6 }
 0x18f   : > { %985 = vst [vmem:[%s266_s6 + $0x8] sm:$0xff] %v982_v8  }
 0x190   : > { %978 = vst [vmem:[%s266_s6] sm:$0xff] %v977_v9  }
 0x191 PF: > { %s14_s17 = sadd.s32 1, %s1143_s17   ;;  %s1302_s15 = smov %s1139_s16 }
 0x192   : > { %p11_p5 = scmp.ge.s32.totalorder %s14_s17, 4   ;;  %s1303_s16 = smov %s1305_s18 }
 0x194   :  { %13 = sbr.rel (!%p11_p5) target bundleno = 2 (0x2), region = 69 }

// kernel: _lambda_.26
= control target key start
LH: loop header
LB: loop body
LE: loop exit
PB: predicated region body
PF: predicated region fallthrough
CT: control target
= control target key end

     0   :  { %s831_s18 = smov 0   ;;  %s833_s19 = smov 0   ;;  %s922_s0 = inlined_call_operand.vmem [shape: bf16[2,16,256], index: 0, kind: input, shape index: {}, may-alias: {0,1}]   ;;  %s923_s1 = inlined_call_operand.vmem [shape: bf16[2,16,256], index: 1, kind: input, shape index: {}, may-alias: {0,1}]   ;;  %s924_s2 = inlined_call_operand.vmem [shape: bf16[16,48], index: 2, kind: input, shape index: {}]   ;;  %s925_s3 = inlined_call_operand.vmem [shape: f32[16,1], index: 3, kind: input, shape index: {}]   ;;  %s926_s4 = inlined_call_operand.vmem [shape: bf16[2,16,128], index: 4, kind: input, shape index: {}]   ;;  %s927_s5 = inlined_call_operand.vmem [shape: bf16[2,16,128], index: 5, kind: output, shape index: {}]  }
   0x1   :  { %s835_s20 = smov 0   ;;  %s837_s21 = smov 0  }
   0x2   :  { %s839_s22 = smov 0  }
   0x3 LB: > { %s27_s23 = sadd.s32 1, %s790_s21  ;;  %p43_p1 = scmp.ne.s32.totalorder %s782_s19, %s778_s18  ;;  %s794_s22 = sphi %s839_s22, %s15_s22   ;;  %s790_s21 = sphi %s837_s21, %s932_s21   ;;  %s786_s20 = sphi %s835_s20, %s931_s20   ;;  %s782_s19 = sphi %s833_s19, %s930_s19   ;;  %s778_s18 = sphi %s831_s18, %s929_s18  }
   0x4   : > { %p29_p0 = scmp.ge.s32.totalorder %s27_s23, 2  ;;  %p44_p2 = scmp.eq.s32.totalorder %s794_s22, 0 }
   0x5   : > { %s36_s26 = sadd.s32 1, %s782_s19  ;;  %p653_p5 = scmp.ge.s32.totalorder %s794_s22, 2 }
   0x6   : > { %s934_s23 = smov (%p29_p0, %s27_s23), 0  ;;  %p862_p3 = por %p44_p2, %p43_p1 }
   0x7   : > { %s31_s25 = ssub.s32 %s790_s21, %s934_s23  ;;  %203 = sbr.rel (%p653_p5) target bundleno = 28 (0x1c), region = 24 }
   0x8   : > { %p34_p4 = scmp.eq.s32.totalorder %s31_s25, 0 }
   0xa   : > { %s870_s27 = scalar_select %p34_p4, %s782_s19, %s36_s26  }
   0xe   : > { %206 = sbr.rel (!%p862_p3) target bundleno = 21 (0x15), region = 28  ;;  %s208_s28 = sand.u32 (%p862_p3), 1, %s782_s19  }
   0xf   : > { %s677_s29 = sshll.u32 (%p862_p3), %s790_s21, 4  ;;  %s654_s30 = sshll.u32 (%p862_p3), %s208_s28, 3 }
  0x10   : > { %s214_s8 = scalar_lea.vmem (%p862_p3), %s922_s0, %s677_s29  ;;  %s210_s9 = scalar_lea.vmem (%p862_p3), [#allocation2], %s654_s30 }
  0x11   : > { %v230_v0 = vld [vmem:[%s214_s8] sm:$0xf] (%p862_p3)  ;;  %v232_v1 = vld [vmem:[%s214_s8 + $0x8] sm:$0xf] (%p862_p3) }
  0x12   : > { %231 = vst [vmem:[%s210_s9] sm:$0xf] (%p862_p3), %v230_v0  ;;  %233 = vst [vmem:[%s210_s9 + $0x4] sm:$0xf] (%p862_p3), %v232_v1 }
  0x15 PF: > { %260 = sbr.rel (!%p862_p3) target bundleno = 28 (0x1c), region = 69  ;;  %s262_s10 = sand.u32 (%p862_p3), 1, %s782_s19  }
  0x16   : > { %s678_s11 = sshll.u32 (%p862_p3), %s790_s21, 4  ;;  %s657_s12 = sshll.u32 (%p862_p3), %s262_s10, 3 }
  0x17   : > { %s564_s15 = scalar_lea.vmem (%p862_p3), %s923_s1, %s678_s11  ;;  %s264_s16 = scalar_lea.vmem (%p862_p3), [#allocation3], %s657_s12 }
  0x18   : > { %v660_v2 = vld [vmem:[%s564_s15 + $0x4] sm:$0xf] (%p862_p3)  ;;  %v661_v3 = vld [vmem:[%s564_s15 + $0xc] sm:$0xf] (%p862_p3) }
  0x19   : > { %286 = vst [vmem:[%s264_s16] sm:$0xf] (%p862_p3), %v660_v2  ;;  %288 = vst [vmem:[%s264_s16 + $0x4] sm:$0xf] (%p862_p3), %v661_v3 }
  0x1c PF: > { %p662_p6 = scmp.ge.s32.totalorder %s794_s22, 1  ;;  %p325_p7 = scmp.lt.s32.totalorder %s794_s22, 3 }
  0x1e   : > { %p326_p8 = pnand %p662_p6, %p325_p7 }
  0x1f   : > { %s332_s17 = sand.u32 (!%p326_p8), 1, %s778_s18   ;;  %v796_v4 = vmov (!%p326_p8), 0.0   ;;  %vm797_vm1 = vmmov (!%p326_p8), 0   ;;  %s798_s28 = smov (!%p326_p8), 126   ;;  %v800_v11 = vmov (!%p326_p8), 0   ;;  %v440_v12 = vld [vmem:[%s925_s3] sm:$0xff] (!%p326_p8)  ;;  %v509_v22 = vlaneseq (!%p326_p8) }
  0x20   : > { %329 = sbr.rel (%p326_p8) target bundleno = 387 (0x183), region = 114  ;;  %s663_s24 = sshll.u32 (!%p326_p8), %s332_s17, 3  ;;  %696 = vmatprep.subr.bf16.mxu0 (!%p326_p8), %v796_v4  ;;  %702 = vmatprep.mubr.msk.bf16.mxu0 (!%p326_p8), %vm797_vm1, %v796_v4  ;;  %v441_v13 = vld [vmem:[%s925_s3 + $0x8] sm:$0xff] (!%p326_p8)  ;;  %vm428_vm3 = vcmask (!%p326_p8), 1039360   ;;  %vm435_vm4 = vcmask (!%p326_p8), 1031168   ;;  %v755_v20 = vld [vmem:[%s924_s2] sm:$0xff] (!%p326_p8)  }
  0x21   : > { %s334_s25 = scalar_lea.vmem (!%p326_p8), [#allocation2], %s663_s24  ;;  %s341_s26 = scalar_lea.vmem (!%p326_p8), [#allocation3], %s663_s24  ;;  %751 = vset.pattern.permute.xlu0 (!%p326_p8), %v800_v11  ;;  %752 = vset.pattern.permute.xlu1 (!%p326_p8), %v800_v11  ;;  %vm457_vm5 = vcmask (!%p326_p8), 392192   ;;  %v510_v26 = vand.u32 (!%p326_p8), 127, %v509_v22 }
  0x22   : > { %v753_v5 = vld [vmem:[%s334_s25] sm:$0xff] (!%p326_p8)   ;;  %v754_v6 = vld [vmem:[%s341_s26] sm:$0xff] (!%p326_p8)   ;;  %s799_s29 = smov (!%p326_p8), 127   ;;  %p382_p9 = scmp.lt.s32.totalorder (!%p326_p8), %s786_s20, 1 }
  0x23   : > { %vm416_vm0 = vcmp.ge.bf16.partialorder (!%p326_p8), %v753_v5, 0  ;;  %v418_v7 = vmul.bf16 (!%p326_p8), 1036860877, %v753_v5  ;;  %vm417_vm2 = vcmp.ge.bf16.partialorder (!%p326_p8), %v754_v6, 0  ;;  %v419_v8 = vmul.bf16 (!%p326_p8), 1036860877, %v754_v6 }
  0x24   : > { %vm513_vm6 = vcmp.lt.s32.totalorder (!%p326_p8), %v510_v26, 16 }
  0x25   : > { %v420_v9 = vsel (!%p326_p8), %vm416_vm0, %v753_v5, %v418_v7  ;;  %v421_v10 = vsel (!%p326_p8), %vm417_vm2, %v754_v6, %v419_v8 }
  0x26   : > { %431 = vrot.lane.b32.xlu1 (!%p326_p8), %v420_v9, %s798_s28  ;;  %424 = vrot.lane.b32.xlu0 (!%p326_p8), %v420_v9, %s799_s29 }
  0x27   : > { %697 = vmatpush3.bf16.msra.mxu0 %v420_v9  ;;  %s936_s20 = smov (!%p382_p9, %s786_s20), 1 }
  0x28   : > { %698 = vmatprep.subr.bf16.mxu0 %v796_v4  ;;  %s679_s10 = sshll.u32 %s936_s20, 3 }
  0x29   : > { %s389_s13 = scalar_lea.vmem %s926_s4, %s679_s10  ;;  %s397_s15 = scalar_lea.vmem %s927_s5, %s679_s10 }
  0x2a   : > { %433 = vrot.lane.b32.xlu1 %v421_v10, %s798_s28  ;;  %426 = vrot.lane.b32.xlu0 %v421_v10, %s799_s29  ;;  %v684_v21 = vld [vmem:[%s389_s13] sm:$0xff]  }
  0x2b   : > { %v685_v24 = vunpack.c.l.bf16 %v684_v21  ;;  %v686_v30 = vunpack.c.h.bf16 %v684_v21 }
  0x2e   : > { %444 = vperm.xlu0 %751, %v440_v12   ;;  %449 = vperm.xlu1 %752, %v441_v13  }
  0x98   : > { %v432_v14 = vpop.permute.xlu1 %431  ;;  %v425_v15 = vpop.permute.xlu0 %424 }
  0x9c   : > { %v427_v16 = vpop.permute.xlu0 %426  ;;  %v434_v18 = vpop.permute.xlu1 %433 }
  0x9d   : > { %v429_v17 = vsel %vm428_vm3, %v425_v15, %v427_v16  ;;  %v436_v19 = vsel %vm435_vm4, %v432_v14, %v434_v18 }
  0x9e   : > { %699 = vmatpush3.bf16.msra.mxu0 %v429_v17 }
  0x9f   : > { %700 = vmatprep.subr.bf16.mxu0 %v796_v4 }
  0xa2   : > { %701 = vmatpush3.bf16.msra.mxu0 %v436_v19 }
  0xa5   : > { %703 = vmatmul.mubr.msk.bf16.vlgmr.msra.gmra.mrb[0].mxu0 %vm457_vm5, %v755_v20 }
  0xad   : > { %v445_v23 = vpop.permute.xlu0 %444  ;;  %v450_v27 = vpop.permute.xlu1 %449 }
 0x178   : > { %v495_v25 = vpop.f32.mrb[0].mxu0 }
 0x179   : > { %v496_v28 = vadd.f32 %v495_v25, %v445_v23  ;;  %v704_v29 = vpop.f32.mrb[1].mxu0 }
 0x17a   : > { %v498_v31 = vpop.f32.mrb[2].mxu0 }
 0x17b   : > { %v506_v32 = vadd.f32 %v685_v24, %v496_v28  ;;  %v499_v33 = vadd.f32 %v498_v31, %v450_v27  ;;  %v705_v34 = vpop.f32.mrb[3].mxu0 }
 0x17d   : > { %v507_v35 = vadd.f32 %v686_v30, %v499_v33  ;;  %v514_v36 = vsel %vm513_vm6, %v506_v32, 0.0 }
 0x17f   : > { %v515_v37 = vsel %vm513_vm6, %v507_v35, 0.0 }
 0x180   : > { %v690_v38 = vpack.c.bf16 %v515_v37, %v514_v36 }
 0x182   : > { %691 = vst [vmem:[%s397_s15] sm:$0xff] %v690_v38  }
 0x183 PF: > { %s15_s22 = sadd.s32 1, %s794_s22   ;;  %s929_s18 = smov %s782_s19 }
 0x184   : > { %p12_p10 = scmp.ge.s32.totalorder %s15_s22, 4   ;;  %s930_s19 = smov %s870_s27 }
 0x185   : > { %s931_s20 = smov %s790_s21  ;;  %s932_s21 = smov %s934_s23 }
 0x186   :  { %14 = sbr.rel (!%p12_p10) target bundleno = 3 (0x3), region = 168 }

// kernel: _lambda_.29
= control target key start
LH: loop header
LB: loop body
LE: loop exit
PB: predicated region body
PF: predicated region fallthrough
CT: control target
= control target key end

     0   :  { %s761_s15 = smov 0   ;;  %s763_s16 = smov 0   ;;  %s849_s0 = inlined_call_operand.vmem [shape: bf16[2,16,256], index: 0, kind: input, shape index: {}, may-alias: {0,1}]   ;;  %s850_s1 = inlined_call_operand.vmem [shape: bf16[2,16,256], index: 1, kind: input, shape index: {}, may-alias: {0,1}]   ;;  %s851_s2 = inlined_call_operand.vmem [shape: bf16[16,80], index: 2, kind: input, shape index: {}]   ;;  %s852_s3 = inlined_call_operand.vmem [shape: f32[16,1], index: 3, kind: input, shape index: {}]   ;;  %s853_s4 = inlined_call_operand.vmem [shape: bf16[2,16,128], index: 4, kind: output, shape index: {}]  }
   0x1   :  { %s765_s17 = smov 0   ;;  %s767_s18 = smov 0  }
   0x2   :  { %s769_s19 = smov 0  }
   0x3 LB: > { %s26_s20 = sadd.s32 1, %s723_s18  ;;  %p42_p1 = scmp.ne.s32.totalorder %s715_s16, %s711_s15  ;;  %s727_s19 = sphi %s769_s19, %s14_s19   ;;  %s723_s18 = sphi %s767_s18, %s858_s18   ;;  %s719_s17 = sphi %s765_s17, %s857_s17   ;;  %s715_s16 = sphi %s763_s16, %s856_s16   ;;  %s711_s15 = sphi %s761_s15, %s855_s15  }
   0x4   : > { %p28_p0 = scmp.ge.s32.totalorder %s26_s20, 2  ;;  %p43_p2 = scmp.eq.s32.totalorder %s727_s19, 0 }
   0x5   : > { %s35_s23 = sadd.s32 1, %s715_s16  ;;  %p585_p5 = scmp.ge.s32.totalorder %s727_s19, 2 }
   0x6   : > { %s860_s20 = smov (%p28_p0, %s26_s20), 0  ;;  %p792_p3 = por %p43_p2, %p42_p1 }
   0x7   : > { %s30_s22 = ssub.s32 %s723_s18, %s860_s20  ;;  %174 = sbr.rel (%p585_p5) target bundleno = 28 (0x1c), region = 24 }
   0x8   : > { %p33_p4 = scmp.eq.s32.totalorder %s30_s22, 0 }
   0xa   : > { %s800_s24 = scalar_select %p33_p4, %s715_s16, %s35_s23  }
   0xe   : > { %177 = sbr.rel (!%p792_p3) target bundleno = 21 (0x15), region = 28  ;;  %s179_s25 = sand.u32 (%p792_p3), 1, %s715_s16  }
   0xf   : > { %s607_s26 = sshll.u32 (%p792_p3), %s723_s18, 4  ;;  %s586_s27 = sshll.u32 (%p792_p3), %s179_s25, 3 }
  0x10   : > { %s185_s30 = scalar_lea.vmem (%p792_p3), %s849_s0, %s607_s26  ;;  %s181_s5 = scalar_lea.vmem (%p792_p3), [#allocation2], %s586_s27 }
  0x11   : > { %v201_v0 = vld [vmem:[%s185_s30] sm:$0xf] (%p792_p3)  ;;  %v203_v1 = vld [vmem:[%s185_s30 + $0x8] sm:$0xf] (%p792_p3) }
  0x12   : > { %202 = vst [vmem:[%s181_s5] sm:$0xf] (%p792_p3), %v201_v0  ;;  %204 = vst [vmem:[%s181_s5 + $0x4] sm:$0xf] (%p792_p3), %v203_v1 }
  0x15 PF: > { %231 = sbr.rel (!%p792_p3) target bundleno = 28 (0x1c), region = 69  ;;  %s233_s6 = sand.u32 (%p792_p3), 1, %s715_s16  }
  0x16   : > { %s608_s7 = sshll.u32 (%p792_p3), %s723_s18, 4  ;;  %s589_s8 = sshll.u32 (%p792_p3), %s233_s6, 3 }
  0x17   : > { %s514_s11 = scalar_lea.vmem (%p792_p3), %s850_s1, %s608_s7  ;;  %s235_s12 = scalar_lea.vmem (%p792_p3), [#allocation3], %s589_s8 }
  0x18   : > { %v592_v2 = vld [vmem:[%s514_s11 + $0x4] sm:$0xf] (%p792_p3)  ;;  %v593_v3 = vld [vmem:[%s514_s11 + $0xc] sm:$0xf] (%p792_p3) }
  0x19   : > { %257 = vst [vmem:[%s235_s12] sm:$0xf] (%p792_p3), %v592_v2  ;;  %259 = vst [vmem:[%s235_s12 + $0x4] sm:$0xf] (%p792_p3), %v593_v3 }
  0x1c PF: > { %p594_p6 = scmp.ge.s32.totalorder %s727_s19, 1  ;;  %p285_p7 = scmp.lt.s32.totalorder %s727_s19, 3 }
  0x1e   : > { %p286_p8 = pnand %p594_p6, %p285_p7 }
  0x1f   : > { %s292_s13 = sand.u32 (!%p286_p8), 1, %s711_s15   ;;  %v729_v4 = vmov (!%p286_p8), 0.0   ;;  %s730_s23 = smov (!%p286_p8), 126   ;;  %vm732_vm2 = vmmov (!%p286_p8), 0   ;;  %v734_v11 = vmov (!%p286_p8), 0   ;;  %v396_v12 = vld [vmem:[%s852_s3] sm:$0xff] (!%p286_p8)  ;;  %v459_v27 = vlaneseq (!%p286_p8) }
  0x20   : > { %289 = sbr.rel (%p286_p8) target bundleno = 393 (0x189), region = 110  ;;  %s595_s14 = sshll.u32 (!%p286_p8), %s292_s13, 3  ;;  %623 = vmatprep.subr.bf16.mxu0 (!%p286_p8), %v729_v4  ;;  %633 = vmatprep.mubr.msk.bf16.mxu0 (!%p286_p8), %vm732_vm2, %v729_v4  ;;  %v397_v13 = vld [vmem:[%s852_s3 + $0x8] sm:$0xff] (!%p286_p8)  ;;  %vm370_vm3 = vcmask (!%p286_p8), 1039360   ;;  %vm377_vm4 = vcmask (!%p286_p8), 1031168   ;;  %vm384_vm5 = vcmask (!%p286_p8), 1022976  }
  0x21   : > { %s294_s21 = scalar_lea.vmem (!%p286_p8), [#allocation2], %s595_s14  ;;  %s301_s22 = scalar_lea.vmem (!%p286_p8), [#allocation3], %s595_s14  ;;  %684 = vset.pattern.permute.xlu0 (!%p286_p8), %v734_v11  ;;  %685 = vset.pattern.permute.xlu1 (!%p286_p8), %v734_v11  ;;  %vm391_vm6 = vcmask (!%p286_p8), 1014784   ;;  %v688_v26 = vld [vmem:[%s851_s2] sm:$0xff] (!%p286_p8)   ;;  %vm413_vm7 = vcmask (!%p286_p8), 654336   ;;  %v460_v29 = vand.u32 (!%p286_p8), 127, %v459_v27 }
  0x22   : > { %v686_v5 = vld [vmem:[%s294_s21] sm:$0xff] (!%p286_p8)   ;;  %v687_v6 = vld [vmem:[%s301_s22] sm:$0xff] (!%p286_p8)   ;;  %s731_s25 = smov (!%p286_p8), 127   ;;  %s733_s15 = smov (!%p286_p8), 125  }
  0x23   : > { %vm358_vm0 = vcmp.ge.bf16.partialorder (!%p286_p8), %v686_v5, 0  ;;  %v360_v7 = vmul.bf16 (!%p286_p8), 1036860877, %v686_v5  ;;  %vm359_vm1 = vcmp.ge.bf16.partialorder (!%p286_p8), %v687_v6, 0  ;;  %v361_v8 = vmul.bf16 (!%p286_p8), 1036860877, %v687_v6 }
  0x24   : > { %s735_s26 = smov (!%p286_p8), 124   ;;  %p332_p9 = scmp.lt.s32.totalorder (!%p286_p8), %s719_s17, 1  ;;  %vm463_vm8 = vcmp.lt.s32.totalorder (!%p286_p8), %v460_v29, 16 }
  0x25   : > { %v362_v9 = vsel (!%p286_p8), %vm358_vm0, %v686_v5, %v360_v7  ;;  %v363_v10 = vsel (!%p286_p8), %vm359_vm1, %v687_v6, %v361_v8 }
  0x26   : > { %373 = vrot.lane.b32.xlu1 (!%p286_p8), %v362_v9, %s730_s23  ;;  %366 = vrot.lane.b32.xlu0 (!%p286_p8), %v362_v9, %s731_s25 }
  0x27   : > { %624 = vmatpush3.bf16.msra.mxu0 %v362_v9  ;;  %s862_s17 = smov (!%p332_p9, %s719_s17), 1 }
  0x28   : > { %625 = vmatprep.subr.bf16.mxu0 %v729_v4  ;;  %s609_s7 = sshll.u32 %s862_s17, 3 }
  0x29   : > { %s339_s10 = scalar_lea.vmem %s853_s4, %s609_s7 }
  0x2a   : > { %375 = vrot.lane.b32.xlu1 %v363_v10, %s730_s23  ;;  %368 = vrot.lane.b32.xlu0 %v363_v10, %s731_s25 }
  0x2e   : > { %382 = vrot.lane.b32.xlu1 %v363_v10, %s733_s15  ;;  %380 = vrot.lane.b32.xlu0 %v362_v9, %s733_s15 }
  0x32   : > { %389 = vrot.lane.b32.xlu1 %v363_v10, %s735_s26  ;;  %387 = vrot.lane.b32.xlu0 %v362_v9, %s735_s26 }
  0x36   : > { %400 = vperm.xlu0 %684, %v396_v12   ;;  %405 = vperm.xlu1 %685, %v397_v13  }
  0x98   : > { %v374_v14 = vpop.permute.xlu1 %373  ;;  %v367_v15 = vpop.permute.xlu0 %366 }
  0x9c   : > { %v376_v16 = vpop.permute.xlu1 %375  ;;  %v369_v17 = vpop.permute.xlu0 %368 }
  0x9d   : > { %v371_v18 = vsel %vm370_vm3, %v367_v15, %v369_v17  ;;  %v378_v21 = vsel %vm377_vm4, %v374_v14, %v376_v16 }
  0x9e   : > { %626 = vmatpush3.bf16.msra.mxu0 %v371_v18 }
  0x9f   : > { %627 = vmatprep.subr.bf16.mxu0 %v729_v4 }
  0xa0   : > { %v383_v19 = vpop.permute.xlu1 %382  ;;  %v381_v20 = vpop.permute.xlu0 %380 }
  0xa1   : > { %v385_v22 = vsel %vm384_vm5, %v381_v20, %v383_v19 }
  0xa2   : > { %628 = vmatpush3.bf16.msra.mxu0 %v378_v21 }
  0xa3   : > { %629 = vmatprep.subr.bf16.mxu0 %v729_v4 }
  0xa4   : > { %v390_v23 = vpop.permute.xlu1 %389  ;;  %v388_v24 = vpop.permute.xlu0 %387 }
  0xa5   : > { %v392_v25 = vsel %vm391_vm6, %v388_v24, %v390_v23 }
  0xa6   : > { %630 = vmatpush3.bf16.msra.mxu0 %v385_v22 }
  0xa7   : > { %631 = vmatprep.subr.bf16.mxu0 %v729_v4 }
  0xaa   : > { %632 = vmatpush3.bf16.msra.mxu0 %v392_v25 }
  0xad   : > { %634 = vmatmul.mubr.msk.bf16.vlgmr.msra.gmra.mrb[0].mxu0 %vm413_vm7, %v688_v26 }
  0xb5   : > { %v401_v28 = vpop.permute.xlu0 %400  ;;  %v406_v31 = vpop.permute.xlu1 %405 }
 0x180   : > { %v451_v30 = vpop.f32.mrb[0].mxu0 }
 0x181   : > { %v452_v32 = vadd.f32 %v451_v30, %v401_v28  ;;  %v635_v33 = vpop.f32.mrb[1].mxu0 }
 0x182   : > { %v454_v34 = vpop.f32.mrb[2].mxu0 }
 0x183   : > { %v455_v35 = vadd.f32 %v454_v34, %v406_v31  ;;  %v636_v36 = vpop.f32.mrb[3].mxu0  ;;  %v464_v37 = vsel %vm463_vm8, %v452_v32, 0.0 }
 0x185   : > { %v465_v38 = vsel %vm463_vm8, %v455_v35, 0.0 }
 0x186   : > { %v615_v39 = vpack.c.bf16 %v465_v38, %v464_v37 }
 0x188   : > { %616 = vst [vmem:[%s339_s10] sm:$0xff] %v615_v39  }
 0x189 PF: > { %s14_s19 = sadd.s32 1, %s727_s19   ;;  %s855_s15 = smov %s715_s16 }
 0x18a   : > { %p11_p10 = scmp.ge.s32.totalorder %s14_s19, 4   ;;  %s856_s16 = smov %s800_s24 }
 0x18b   : > { %s857_s17 = smov %s723_s18  ;;  %s858_s18 = smov %s860_s20 }
 0x18c   :  { %13 = sbr.rel (!%p11_p10) target bundleno = 3 (0x3), region = 161 }

// kernel: _lambda_.30
= control target key start
LH: loop header
LB: loop body
LE: loop exit
PB: predicated region body
PF: predicated region fallthrough
CT: control target
= control target key end

     0   :  { %s855_s18 = smov 0   ;;  %s857_s19 = smov 0   ;;  %s946_s0 = inlined_call_operand.vmem [shape: bf16[2,16,256], index: 0, kind: input, shape index: {}, may-alias: {0,1}]   ;;  %s947_s1 = inlined_call_operand.vmem [shape: bf16[2,16,256], index: 1, kind: input, shape index: {}, may-alias: {0,1}]   ;;  %s948_s2 = inlined_call_operand.vmem [shape: bf16[16,80], index: 2, kind: input, shape index: {}]   ;;  %s949_s3 = inlined_call_operand.vmem [shape: f32[16,1], index: 3, kind: input, shape index: {}]   ;;  %s950_s4 = inlined_call_operand.vmem [shape: bf16[2,16,128], index: 4, kind: input, shape index: {}]   ;;  %s951_s5 = inlined_call_operand.vmem [shape: bf16[2,16,128], index: 5, kind: output, shape index: {}]  }
   0x1   :  { %s859_s20 = smov 0   ;;  %s861_s21 = smov 0  }
   0x2   :  { %s863_s22 = smov 0  }
   0x3 LB: > { %s27_s23 = sadd.s32 1, %s812_s21  ;;  %p43_p1 = scmp.ne.s32.totalorder %s804_s19, %s800_s18  ;;  %s816_s22 = sphi %s863_s22, %s15_s22   ;;  %s812_s21 = sphi %s861_s21, %s956_s21   ;;  %s808_s20 = sphi %s859_s20, %s955_s20   ;;  %s804_s19 = sphi %s857_s19, %s954_s19   ;;  %s800_s18 = sphi %s855_s18, %s953_s18  }
   0x4   : > { %p29_p0 = scmp.ge.s32.totalorder %s27_s23, 2  ;;  %p44_p2 = scmp.eq.s32.totalorder %s816_s22, 0 }
   0x5   : > { %s36_s26 = sadd.s32 1, %s804_s19  ;;  %p667_p5 = scmp.ge.s32.totalorder %s816_s22, 2 }
   0x6   : > { %s958_s23 = smov (%p29_p0, %s27_s23), 0  ;;  %p886_p3 = por %p44_p2, %p43_p1 }
   0x7   : > { %s31_s25 = ssub.s32 %s812_s21, %s958_s23  ;;  %203 = sbr.rel (%p667_p5) target bundleno = 28 (0x1c), region = 24 }
   0x8   : > { %p34_p4 = scmp.eq.s32.totalorder %s31_s25, 0 }
   0xa   : > { %s894_s27 = scalar_select %p34_p4, %s804_s19, %s36_s26  }
   0xe   : > { %206 = sbr.rel (!%p886_p3) target bundleno = 21 (0x15), region = 28  ;;  %s208_s28 = sand.u32 (%p886_p3), 1, %s804_s19  }
   0xf   : > { %s691_s29 = sshll.u32 (%p886_p3), %s812_s21, 4  ;;  %s668_s30 = sshll.u32 (%p886_p3), %s208_s28, 3 }
  0x10   : > { %s214_s8 = scalar_lea.vmem (%p886_p3), %s946_s0, %s691_s29  ;;  %s210_s9 = scalar_lea.vmem (%p886_p3), [#allocation2], %s668_s30 }
  0x11   : > { %v230_v0 = vld [vmem:[%s214_s8] sm:$0xf] (%p886_p3)  ;;  %v232_v1 = vld [vmem:[%s214_s8 + $0x8] sm:$0xf] (%p886_p3) }
  0x12   : > { %231 = vst [vmem:[%s210_s9] sm:$0xf] (%p886_p3), %v230_v0  ;;  %233 = vst [vmem:[%s210_s9 + $0x4] sm:$0xf] (%p886_p3), %v232_v1 }
  0x15 PF: > { %260 = sbr.rel (!%p886_p3) target bundleno = 28 (0x1c), region = 69  ;;  %s262_s10 = sand.u32 (%p886_p3), 1, %s804_s19  }
  0x16   : > { %s692_s11 = sshll.u32 (%p886_p3), %s812_s21, 4  ;;  %s671_s12 = sshll.u32 (%p886_p3), %s262_s10, 3 }
  0x17   : > { %s578_s15 = scalar_lea.vmem (%p886_p3), %s947_s1, %s692_s11  ;;  %s264_s16 = scalar_lea.vmem (%p886_p3), [#allocation3], %s671_s12 }
  0x18   : > { %v674_v2 = vld [vmem:[%s578_s15 + $0x4] sm:$0xf] (%p886_p3)  ;;  %v675_v3 = vld [vmem:[%s578_s15 + $0xc] sm:$0xf] (%p886_p3) }
  0x19   : > { %286 = vst [vmem:[%s264_s16] sm:$0xf] (%p886_p3), %v674_v2  ;;  %288 = vst [vmem:[%s264_s16 + $0x4] sm:$0xf] (%p886_p3), %v675_v3 }
  0x1c PF: > { %p676_p6 = scmp.ge.s32.totalorder %s816_s22, 1  ;;  %p325_p7 = scmp.lt.s32.totalorder %s816_s22, 3 }
  0x1e   : > { %p326_p8 = pnand %p676_p6, %p325_p7 }
  0x1f   : > { %s332_s17 = sand.u32 (!%p326_p8), 1, %s800_s18   ;;  %v818_v4 = vmov (!%p326_p8), 0.0   ;;  %s819_s28 = smov (!%p326_p8), 126   ;;  %vm821_vm2 = vmmov (!%p326_p8), 0   ;;  %v823_v11 = vmov (!%p326_p8), 0   ;;  %v454_v12 = vld [vmem:[%s949_s3] sm:$0xff] (!%p326_p8)  ;;  %v523_v28 = vlaneseq (!%p326_p8) }
  0x20   : > { %329 = sbr.rel (%p326_p8) target bundleno = 395 (0x18b), region = 114  ;;  %s677_s24 = sshll.u32 (!%p326_p8), %s332_s17, 3  ;;  %712 = vmatprep.subr.bf16.mxu0 (!%p326_p8), %v818_v4  ;;  %722 = vmatprep.mubr.msk.bf16.mxu0 (!%p326_p8), %vm821_vm2, %v818_v4  ;;  %v455_v13 = vld [vmem:[%s949_s3 + $0x8] sm:$0xff] (!%p326_p8)  ;;  %vm428_vm3 = vcmask (!%p326_p8), 1039360   ;;  %vm435_vm4 = vcmask (!%p326_p8), 1031168   ;;  %vm442_vm5 = vcmask (!%p326_p8), 1022976  }
  0x21   : > { %s334_s25 = scalar_lea.vmem (!%p326_p8), [#allocation2], %s677_s24  ;;  %s341_s26 = scalar_lea.vmem (!%p326_p8), [#allocation3], %s677_s24  ;;  %773 = vset.pattern.permute.xlu0 (!%p326_p8), %v823_v11  ;;  %774 = vset.pattern.permute.xlu1 (!%p326_p8), %v823_v11  ;;  %vm449_vm6 = vcmask (!%p326_p8), 1014784   ;;  %v777_v26 = vld [vmem:[%s948_s2] sm:$0xff] (!%p326_p8)   ;;  %vm471_vm7 = vcmask (!%p326_p8), 654336   ;;  %v524_v32 = vand.u32 (!%p326_p8), 127, %v523_v28 }
  0x22   : > { %v775_v5 = vld [vmem:[%s334_s25] sm:$0xff] (!%p326_p8)   ;;  %v776_v6 = vld [vmem:[%s341_s26] sm:$0xff] (!%p326_p8)   ;;  %s820_s29 = smov (!%p326_p8), 127   ;;  %s822_s18 = smov (!%p326_p8), 125  }
  0x23   : > { %vm416_vm0 = vcmp.ge.bf16.partialorder (!%p326_p8), %v775_v5, 0  ;;  %v418_v7 = vmul.bf16 (!%p326_p8), 1036860877, %v775_v5  ;;  %vm417_vm1 = vcmp.ge.bf16.partialorder (!%p326_p8), %v776_v6, 0  ;;  %v419_v8 = vmul.bf16 (!%p326_p8), 1036860877, %v776_v6 }
  0x24   : > { %s824_s30 = smov (!%p326_p8), 124   ;;  %p382_p9 = scmp.lt.s32.totalorder (!%p326_p8), %s808_s20, 1  ;;  %vm527_vm8 = vcmp.lt.s32.totalorder (!%p326_p8), %v524_v32, 16 }
  0x25   : > { %v420_v9 = vsel (!%p326_p8), %vm416_vm0, %v775_v5, %v418_v7  ;;  %v421_v10 = vsel (!%p326_p8), %vm417_vm1, %v776_v6, %v419_v8 }
  0x26   : > { %431 = vrot.lane.b32.xlu1 (!%p326_p8), %v420_v9, %s819_s28  ;;  %424 = vrot.lane.b32.xlu0 (!%p326_p8), %v420_v9, %s820_s29 }
  0x27   : > { %713 = vmatpush3.bf16.msra.mxu0 %v420_v9  ;;  %s960_s20 = smov (!%p382_p9, %s808_s20), 1 }
  0x28   : > { %714 = vmatprep.subr.bf16.mxu0 %v818_v4  ;;  %s693_s12 = sshll.u32 %s960_s20, 3 }
  0x29   : > { %s389_s15 = scalar_lea.vmem %s950_s4, %s693_s12  ;;  %s397_s17 = scalar_lea.vmem %s951_s5, %s693_s12 }
  0x2a   : > { %433 = vrot.lane.b32.xlu1 %v421_v10, %s819_s28  ;;  %426 = vrot.lane.b32.xlu0 %v421_v10, %s820_s29  ;;  %v698_v27 = vld [vmem:[%s389_s15] sm:$0xff]  }
  0x2b   : > { %v699_v30 = vunpack.c.l.bf16 %v698_v27  ;;  %v700_v36 = vunpack.c.h.bf16 %v698_v27 }
  0x2e   : > { %440 = vrot.lane.b32.xlu1 %v421_v10, %s822_s18  ;;  %438 = vrot.lane.b32.xlu0 %v420_v9, %s822_s18 }
  0x32   : > { %447 = vrot.lane.b32.xlu1 %v421_v10, %s824_s30  ;;  %445 = vrot.lane.b32.xlu0 %v420_v9, %s824_s30 }
  0x36   : > { %458 = vperm.xlu0 %773, %v454_v12   ;;  %463 = vperm.xlu1 %774, %v455_v13  }
  0x98   : > { %v432_v14 = vpop.permute.xlu1 %431  ;;  %v425_v15 = vpop.permute.xlu0 %424 }
  0x9c   : > { %v434_v16 = vpop.permute.xlu1 %433  ;;  %v427_v17 = vpop.permute.xlu0 %426 }
  0x9d   : > { %v429_v18 = vsel %vm428_vm3, %v425_v15, %v427_v17  ;;  %v436_v21 = vsel %vm435_vm4, %v432_v14, %v434_v16 }
  0x9e   : > { %715 = vmatpush3.bf16.msra.mxu0 %v429_v18 }
  0x9f   : > { %716 = vmatprep.subr.bf16.mxu0 %v818_v4 }
  0xa0   : > { %v441_v19 = vpop.permute.xlu1 %440  ;;  %v439_v20 = vpop.permute.xlu0 %438 }
  0xa1   : > { %v443_v22 = vsel %vm442_vm5, %v439_v20, %v441_v19 }
  0xa2   : > { %717 = vmatpush3.bf16.msra.mxu0 %v436_v21 }
  0xa3   : > { %718 = vmatprep.subr.bf16.mxu0 %v818_v4 }
  0xa4   : > { %v448_v23 = vpop.permute.xlu1 %447  ;;  %v446_v24 = vpop.permute.xlu0 %445 }
  0xa5   : > { %v450_v25 = vsel %vm449_vm6, %v446_v24, %v448_v23 }
  0xa6   : > { %719 = vmatpush3.bf16.msra.mxu0 %v443_v22 }
  0xa7   : > { %720 = vmatprep.subr.bf16.mxu0 %v818_v4 }
  0xaa   : > { %721 = vmatpush3.bf16.msra.mxu0 %v450_v25 }
  0xad   : > { %723 = vmatmul.mubr.msk.bf16.vlgmr.msra.gmra.mrb[0].mxu0 %vm471_vm7, %v777_v26 }
  0xb5   : > { %v459_v29 = vpop.permute.xlu0 %458  ;;  %v464_v33 = vpop.permute.xlu1 %463 }
 0x180   : > { %v509_v31 = vpop.f32.mrb[0].mxu0 }
 0x181   : > { %v510_v34 = vadd.f32 %v509_v31, %v459_v29  ;;  %v724_v35 = vpop.f32.mrb[1].mxu0 }
 0x182   : > { %v512_v37 = vpop.f32.mrb[2].mxu0 }
 0x183   : > { %v520_v38 = vadd.f32 %v699_v30, %v510_v34  ;;  %v513_v39 = vadd.f32 %v512_v37, %v464_v33  ;;  %v725_v40 = vpop.f32.mrb[3].mxu0 }
 0x185   : > { %v521_v41 = vadd.f32 %v700_v36, %v513_v39  ;;  %v528_v42 = vsel %vm527_vm8, %v520_v38, 0.0 }
 0x187   : > { %v529_v43 = vsel %vm527_vm8, %v521_v41, 0.0 }
 0x188   : > { %v704_v44 = vpack.c.bf16 %v529_v43, %v528_v42 }
 0x18a   : > { %705 = vst [vmem:[%s397_s17] sm:$0xff] %v704_v44  }
 0x18b PF: > { %s15_s22 = sadd.s32 1, %s816_s22   ;;  %s953_s18 = smov %s804_s19 }
 0x18c   : > { %p12_p10 = scmp.ge.s32.totalorder %s15_s22, 4   ;;  %s954_s19 = smov %s894_s27 }
 0x18d   : > { %s955_s20 = smov %s812_s21  ;;  %s956_s21 = smov %s958_s23 }
 0x18e   :  { %14 = sbr.rel (!%p12_p10) target bundleno = 3 (0x3), region = 168 }

// kernel: _lambda_.31
= control target key start
LH: loop header
LB: loop body
LE: loop exit
PB: predicated region body
PF: predicated region fallthrough
CT: control target
= control target key end

     0   :  { %s761_s15 = smov 0   ;;  %s763_s16 = smov 0   ;;  %s849_s0 = inlined_call_operand.vmem [shape: bf16[2,16,256], index: 0, kind: input, shape index: {}, may-alias: {0,1}]   ;;  %s850_s1 = inlined_call_operand.vmem [shape: bf16[2,16,256], index: 1, kind: input, shape index: {}, may-alias: {0,1}]   ;;  %s851_s2 = inlined_call_operand.vmem [shape: bf16[16,80], index: 2, kind: input, shape index: {}]   ;;  %s852_s3 = inlined_call_operand.vmem [shape: f32[16,1], index: 3, kind: input, shape index: {}]   ;;  %s853_s4 = inlined_call_operand.vmem [shape: bf16[2,16,128], index: 4, kind: output, shape index: {}]  }
   0x1   :  { %s765_s17 = smov 0   ;;  %s767_s18 = smov 0  }
   0x2   :  { %s769_s19 = smov 0  }
   0x3 LB: > { %s26_s20 = sadd.s32 1, %s723_s18  ;;  %p42_p1 = scmp.ne.s32.totalorder %s715_s16, %s711_s15  ;;  %s727_s19 = sphi %s769_s19, %s14_s19   ;;  %s723_s18 = sphi %s767_s18, %s858_s18   ;;  %s719_s17 = sphi %s765_s17, %s857_s17   ;;  %s715_s16 = sphi %s763_s16, %s856_s16   ;;  %s711_s15 = sphi %s761_s15, %s855_s15  }
   0x4   : > { %p28_p0 = scmp.ge.s32.totalorder %s26_s20, 2  ;;  %p43_p2 = scmp.eq.s32.totalorder %s727_s19, 0 }
   0x5   : > { %s35_s23 = sadd.s32 1, %s715_s16  ;;  %p585_p5 = scmp.ge.s32.totalorder %s727_s19, 2 }
   0x6   : > { %s860_s20 = smov (%p28_p0, %s26_s20), 0  ;;  %p792_p3 = por %p43_p2, %p42_p1 }
   0x7   : > { %s30_s22 = ssub.s32 %s723_s18, %s860_s20  ;;  %174 = sbr.rel (%p585_p5) target bundleno = 28 (0x1c), region = 24 }
   0x8   : > { %p33_p4 = scmp.eq.s32.totalorder %s30_s22, 0 }
   0xa   : > { %s800_s24 = scalar_select %p33_p4, %s715_s16, %s35_s23  }
   0xe   : > { %177 = sbr.rel (!%p792_p3) target bundleno = 21 (0x15), region = 28  ;;  %s179_s25 = sand.u32 (%p792_p3), 1, %s715_s16  }
   0xf   : > { %s607_s26 = sshll.u32 (%p792_p3), %s723_s18, 4  ;;  %s586_s27 = sshll.u32 (%p792_p3), %s179_s25, 3 }
  0x10   : > { %s185_s30 = scalar_lea.vmem (%p792_p3), %s849_s0, %s607_s26  ;;  %s181_s5 = scalar_lea.vmem (%p792_p3), [#allocation2], %s586_s27 }
  0x11   : > { %v201_v0 = vld [vmem:[%s185_s30] sm:$0xf] (%p792_p3)  ;;  %v203_v1 = vld [vmem:[%s185_s30 + $0x8] sm:$0xf] (%p792_p3) }
  0x12   : > { %202 = vst [vmem:[%s181_s5] sm:$0xf] (%p792_p3), %v201_v0  ;;  %204 = vst [vmem:[%s181_s5 + $0x4] sm:$0xf] (%p792_p3), %v203_v1 }
  0x15 PF: > { %231 = sbr.rel (!%p792_p3) target bundleno = 28 (0x1c), region = 69  ;;  %s233_s6 = sand.u32 (%p792_p3), 1, %s715_s16  }
  0x16   : > { %s608_s7 = sshll.u32 (%p792_p3), %s723_s18, 4  ;;  %s589_s8 = sshll.u32 (%p792_p3), %s233_s6, 3 }
  0x17   : > { %s514_s11 = scalar_lea.vmem (%p792_p3), %s850_s1, %s608_s7  ;;  %s235_s12 = scalar_lea.vmem (%p792_p3), [#allocation3], %s589_s8 }
  0x18   : > { %v592_v2 = vld [vmem:[%s514_s11 + $0x4] sm:$0xf] (%p792_p3)  ;;  %v593_v3 = vld [vmem:[%s514_s11 + $0xc] sm:$0xf] (%p792_p3) }
  0x19   : > { %257 = vst [vmem:[%s235_s12] sm:$0xf] (%p792_p3), %v592_v2  ;;  %259 = vst [vmem:[%s235_s12 + $0x4] sm:$0xf] (%p792_p3), %v593_v3 }
  0x1c PF: > { %p594_p6 = scmp.ge.s32.totalorder %s727_s19, 1  ;;  %p285_p7 = scmp.lt.s32.totalorder %s727_s19, 3 }
  0x1e   : > { %p286_p8 = pnand %p594_p6, %p285_p7 }
  0x1f   : > { %s292_s13 = sand.u32 (!%p286_p8), 1, %s711_s15   ;;  %v729_v4 = vmov (!%p286_p8), 0.0   ;;  %s730_s23 = smov (!%p286_p8), 122   ;;  %vm732_vm2 = vmmov (!%p286_p8), 0   ;;  %v734_v11 = vmov (!%p286_p8), 0   ;;  %v396_v12 = vld [vmem:[%s852_s3] sm:$0xff] (!%p286_p8)  ;;  %v459_v27 = vlaneseq (!%p286_p8) }
  0x20   : > { %289 = sbr.rel (%p286_p8) target bundleno = 393 (0x189), region = 110  ;;  %s595_s14 = sshll.u32 (!%p286_p8), %s292_s13, 3  ;;  %623 = vmatprep.subr.bf16.mxu0 (!%p286_p8), %v729_v4  ;;  %633 = vmatprep.mubr.msk.bf16.mxu0 (!%p286_p8), %vm732_vm2, %v729_v4  ;;  %v397_v13 = vld [vmem:[%s852_s3 + $0x8] sm:$0xff] (!%p286_p8)  ;;  %vm370_vm3 = vcmask (!%p286_p8), 1022976   ;;  %vm377_vm4 = vcmask (!%p286_p8), 998400   ;;  %vm384_vm5 = vcmask (!%p286_p8), 973824  }
  0x21   : > { %s294_s21 = scalar_lea.vmem (!%p286_p8), [#allocation2], %s595_s14  ;;  %s301_s22 = scalar_lea.vmem (!%p286_p8), [#allocation3], %s595_s14  ;;  %684 = vset.pattern.permute.xlu0 (!%p286_p8), %v734_v11  ;;  %685 = vset.pattern.permute.xlu1 (!%p286_p8), %v734_v11  ;;  %vm391_vm6 = vcmask (!%p286_p8), 949248   ;;  %v688_v26 = vld [vmem:[%s851_s2] sm:$0xff] (!%p286_p8)   ;;  %vm413_vm7 = vcmask (!%p286_p8), 654336   ;;  %v460_v29 = vand.u32 (!%p286_p8), 127, %v459_v27 }
  0x22   : > { %v686_v5 = vld [vmem:[%s294_s21] sm:$0xff] (!%p286_p8)   ;;  %v687_v6 = vld [vmem:[%s301_s22] sm:$0xff] (!%p286_p8)   ;;  %s731_s25 = smov (!%p286_p8), 125   ;;  %s733_s15 = smov (!%p286_p8), 119  }
  0x23   : > { %vm358_vm0 = vcmp.ge.bf16.partialorder (!%p286_p8), %v686_v5, 0  ;;  %v360_v7 = vmul.bf16 (!%p286_p8), 1036860877, %v686_v5  ;;  %vm359_vm1 = vcmp.ge.bf16.partialorder (!%p286_p8), %v687_v6, 0  ;;  %v361_v8 = vmul.bf16 (!%p286_p8), 1036860877, %v687_v6 }
  0x24   : > { %s735_s26 = smov (!%p286_p8), 116   ;;  %p332_p9 = scmp.lt.s32.totalorder (!%p286_p8), %s719_s17, 1  ;;  %vm463_vm8 = vcmp.lt.s32.totalorder (!%p286_p8), %v460_v29, 16 }
  0x25   : > { %v362_v9 = vsel (!%p286_p8), %vm358_vm0, %v686_v5, %v360_v7  ;;  %v363_v10 = vsel (!%p286_p8), %vm359_vm1, %v687_v6, %v361_v8 }
  0x26   : > { %373 = vrot.lane.b32.xlu1 (!%p286_p8), %v362_v9, %s730_s23  ;;  %366 = vrot.lane.b32.xlu0 (!%p286_p8), %v362_v9, %s731_s25 }
  0x27   : > { %624 = vmatpush3.bf16.msra.mxu0 %v362_v9  ;;  %s862_s17 = smov (!%p332_p9, %s719_s17), 1 }
  0x28   : > { %625 = vmatprep.subr.bf16.mxu0 %v729_v4  ;;  %s609_s7 = sshll.u32 %s862_s17, 3 }
  0x29   : > { %s339_s10 = scalar_lea.vmem %s853_s4, %s609_s7 }
  0x2a   : > { %375 = vrot.lane.b32.xlu1 %v363_v10, %s730_s23  ;;  %368 = vrot.lane.b32.xlu0 %v363_v10, %s731_s25 }
  0x2e   : > { %382 = vrot.lane.b32.xlu1 %v363_v10, %s733_s15  ;;  %380 = vrot.lane.b32.xlu0 %v362_v9, %s733_s15 }
  0x32   : > { %389 = vrot.lane.b32.xlu1 %v363_v10, %s735_s26  ;;  %387 = vrot.lane.b32.xlu0 %v362_v9, %s735_s26 }
  0x36   : > { %400 = vperm.xlu0 %684, %v396_v12   ;;  %405 = vperm.xlu1 %685, %v397_v13  }
  0x98   : > { %v374_v14 = vpop.permute.xlu1 %373  ;;  %v367_v15 = vpop.permute.xlu0 %366 }
  0x9c   : > { %v376_v16 = vpop.permute.xlu1 %375  ;;  %v369_v17 = vpop.permute.xlu0 %368 }
  0x9d   : > { %v371_v18 = vsel %vm370_vm3, %v367_v15, %v369_v17  ;;  %v378_v21 = vsel %vm377_vm4, %v374_v14, %v376_v16 }
  0x9e   : > { %626 = vmatpush3.bf16.msra.mxu0 %v371_v18 }
  0x9f   : > { %627 = vmatprep.subr.bf16.mxu0 %v729_v4 }
  0xa0   : > { %v383_v19 = vpop.permute.xlu1 %382  ;;  %v381_v20 = vpop.permute.xlu0 %380 }
  0xa1   : > { %v385_v22 = vsel %vm384_vm5, %v381_v20, %v383_v19 }
  0xa2   : > { %628 = vmatpush3.bf16.msra.mxu0 %v378_v21 }
  0xa3   : > { %629 = vmatprep.subr.bf16.mxu0 %v729_v4 }
  0xa4   : > { %v390_v23 = vpop.permute.xlu1 %389  ;;  %v388_v24 = vpop.permute.xlu0 %387 }
  0xa5   : > { %v392_v25 = vsel %vm391_vm6, %v388_v24, %v390_v23 }
  0xa6   : > { %630 = vmatpush3.bf16.msra.mxu0 %v385_v22 }
  0xa7   : > { %631 = vmatprep.subr.bf16.mxu0 %v729_v4 }
  0xaa   : > { %632 = vmatpush3.bf16.msra.mxu0 %v392_v25 }
  0xad   : > { %634 = vmatmul.mubr.msk.bf16.vlgmr.msra.gmra.mrb[0].mxu0 %vm413_vm7, %v688_v26 }
  0xb5   : > { %v401_v28 = vpop.permute.xlu0 %400  ;;  %v406_v31 = vpop.permute.xlu1 %405 }
 0x180   : > { %v451_v30 = vpop.f32.mrb[0].mxu0 }
 0x181   : > { %v452_v32 = vadd.f32 %v451_v30, %v401_v28  ;;  %v635_v33 = vpop.f32.mrb[1].mxu0 }
 0x182   : > { %v454_v34 = vpop.f32.mrb[2].mxu0 }
 0x183   : > { %v455_v35 = vadd.f32 %v454_v34, %v406_v31  ;;  %v636_v36 = vpop.f32.mrb[3].mxu0  ;;  %v464_v37 = vsel %vm463_vm8, %v452_v32, 0.0 }
 0x185   : > { %v465_v38 = vsel %vm463_vm8, %v455_v35, 0.0 }
 0x186   : > { %v615_v39 = vpack.c.bf16 %v465_v38, %v464_v37 }
 0x188   : > { %616 = vst [vmem:[%s339_s10] sm:$0xff] %v615_v39  }
 0x189 PF: > { %s14_s19 = sadd.s32 1, %s727_s19   ;;  %s855_s15 = smov %s715_s16 }
 0x18a   : > { %p11_p10 = scmp.ge.s32.totalorder %s14_s19, 4   ;;  %s856_s16 = smov %s800_s24 }
 0x18b   : > { %s857_s17 = smov %s723_s18  ;;  %s858_s18 = smov %s860_s20 }
 0x18c   :  { %13 = sbr.rel (!%p11_p10) target bundleno = 3 (0x3), region = 161 }

// kernel: _lambda_.27
= control target key start
LH: loop header
LB: loop body
LE: loop exit
PB: predicated region body
PF: predicated region fallthrough
CT: control target
= control target key end

     0   :  { %s737_s15 = smov 0   ;;  %s739_s16 = smov 0   ;;  %s825_s0 = inlined_call_operand.vmem [shape: bf16[2,16,256], index: 0, kind: input, shape index: {}, may-alias: {0,1}]   ;;  %s826_s1 = inlined_call_operand.vmem [shape: bf16[2,16,256], index: 1, kind: input, shape index: {}, may-alias: {0,1}]   ;;  %s827_s2 = inlined_call_operand.vmem [shape: bf16[16,48], index: 2, kind: input, shape index: {}]   ;;  %s828_s3 = inlined_call_operand.vmem [shape: f32[16,1], index: 3, kind: input, shape index: {}]   ;;  %s829_s4 = inlined_call_operand.vmem [shape: bf16[2,16,128], index: 4, kind: output, shape index: {}]  }
   0x1   :  { %s741_s17 = smov 0   ;;  %s743_s18 = smov 0  }
   0x2   :  { %s745_s19 = smov 0  }
   0x3 LB: > { %s26_s20 = sadd.s32 1, %s701_s18  ;;  %p42_p1 = scmp.ne.s32.totalorder %s693_s16, %s689_s15  ;;  %s705_s19 = sphi %s745_s19, %s14_s19   ;;  %s701_s18 = sphi %s743_s18, %s834_s18   ;;  %s697_s17 = sphi %s741_s17, %s833_s17   ;;  %s693_s16 = sphi %s739_s16, %s832_s16   ;;  %s689_s15 = sphi %s737_s15, %s831_s15  }
   0x4   : > { %p28_p0 = scmp.ge.s32.totalorder %s26_s20, 2  ;;  %p43_p2 = scmp.eq.s32.totalorder %s705_s19, 0 }
   0x5   : > { %s35_s23 = sadd.s32 1, %s693_s16  ;;  %p571_p5 = scmp.ge.s32.totalorder %s705_s19, 2 }
   0x6   : > { %s836_s20 = smov (%p28_p0, %s26_s20), 0  ;;  %p768_p3 = por %p43_p2, %p42_p1 }
   0x7   : > { %s30_s22 = ssub.s32 %s701_s18, %s836_s20  ;;  %174 = sbr.rel (%p571_p5) target bundleno = 28 (0x1c), region = 24 }
   0x8   : > { %p33_p4 = scmp.eq.s32.totalorder %s30_s22, 0 }
   0xa   : > { %s776_s24 = scalar_select %p33_p4, %s693_s16, %s35_s23  }
   0xe   : > { %177 = sbr.rel (!%p768_p3) target bundleno = 21 (0x15), region = 28  ;;  %s179_s25 = sand.u32 (%p768_p3), 1, %s693_s16  }
   0xf   : > { %s593_s26 = sshll.u32 (%p768_p3), %s701_s18, 4  ;;  %s572_s27 = sshll.u32 (%p768_p3), %s179_s25, 3 }
  0x10   : > { %s185_s30 = scalar_lea.vmem (%p768_p3), %s825_s0, %s593_s26  ;;  %s181_s5 = scalar_lea.vmem (%p768_p3), [#allocation2], %s572_s27 }
  0x11   : > { %v201_v0 = vld [vmem:[%s185_s30] sm:$0xf] (%p768_p3)  ;;  %v203_v1 = vld [vmem:[%s185_s30 + $0x8] sm:$0xf] (%p768_p3) }
  0x12   : > { %202 = vst [vmem:[%s181_s5] sm:$0xf] (%p768_p3), %v201_v0  ;;  %204 = vst [vmem:[%s181_s5 + $0x4] sm:$0xf] (%p768_p3), %v203_v1 }
  0x15 PF: > { %231 = sbr.rel (!%p768_p3) target bundleno = 28 (0x1c), region = 69  ;;  %s233_s6 = sand.u32 (%p768_p3), 1, %s693_s16  }
  0x16   : > { %s594_s7 = sshll.u32 (%p768_p3), %s701_s18, 4  ;;  %s575_s8 = sshll.u32 (%p768_p3), %s233_s6, 3 }
  0x17   : > { %s500_s11 = scalar_lea.vmem (%p768_p3), %s826_s1, %s594_s7  ;;  %s235_s12 = scalar_lea.vmem (%p768_p3), [#allocation3], %s575_s8 }
  0x18   : > { %v578_v2 = vld [vmem:[%s500_s11 + $0x4] sm:$0xf] (%p768_p3)  ;;  %v579_v3 = vld [vmem:[%s500_s11 + $0xc] sm:$0xf] (%p768_p3) }
  0x19   : > { %257 = vst [vmem:[%s235_s12] sm:$0xf] (%p768_p3), %v578_v2  ;;  %259 = vst [vmem:[%s235_s12 + $0x4] sm:$0xf] (%p768_p3), %v579_v3 }
  0x1c PF: > { %p580_p6 = scmp.ge.s32.totalorder %s705_s19, 1  ;;  %p285_p7 = scmp.lt.s32.totalorder %s705_s19, 3 }
  0x1e   : > { %p286_p8 = pnand %p580_p6, %p285_p7 }
  0x1f   : > { %s292_s13 = sand.u32 (!%p286_p8), 1, %s689_s15   ;;  %v707_v4 = vmov (!%p286_p8), 0.0   ;;  %vm708_vm1 = vmmov (!%p286_p8), 0   ;;  %s709_s23 = smov (!%p286_p8), 122   ;;  %v711_v11 = vmov (!%p286_p8), 0   ;;  %v382_v12 = vld [vmem:[%s828_s3] sm:$0xff] (!%p286_p8)  ;;  %v445_v21 = vlaneseq (!%p286_p8) }
  0x20   : > { %289 = sbr.rel (%p286_p8) target bundleno = 385 (0x181), region = 110  ;;  %s581_s14 = sshll.u32 (!%p286_p8), %s292_s13, 3  ;;  %607 = vmatprep.subr.bf16.mxu0 (!%p286_p8), %v707_v4  ;;  %613 = vmatprep.mubr.msk.bf16.mxu0 (!%p286_p8), %vm708_vm1, %v707_v4  ;;  %v383_v13 = vld [vmem:[%s828_s3 + $0x8] sm:$0xff] (!%p286_p8)  ;;  %vm370_vm3 = vcmask (!%p286_p8), 1022976   ;;  %vm377_vm4 = vcmask (!%p286_p8), 998400   ;;  %v666_v20 = vld [vmem:[%s827_s2] sm:$0xff] (!%p286_p8)  }
  0x21   : > { %s294_s21 = scalar_lea.vmem (!%p286_p8), [#allocation2], %s581_s14  ;;  %s301_s22 = scalar_lea.vmem (!%p286_p8), [#allocation3], %s581_s14  ;;  %662 = vset.pattern.permute.xlu0 (!%p286_p8), %v711_v11  ;;  %663 = vset.pattern.permute.xlu1 (!%p286_p8), %v711_v11  ;;  %vm399_vm5 = vcmask (!%p286_p8), 392192   ;;  %v446_v23 = vand.u32 (!%p286_p8), 127, %v445_v21 }
  0x22   : > { %v664_v5 = vld [vmem:[%s294_s21] sm:$0xff] (!%p286_p8)   ;;  %v665_v6 = vld [vmem:[%s301_s22] sm:$0xff] (!%p286_p8)   ;;  %s710_s25 = smov (!%p286_p8), 125   ;;  %p332_p9 = scmp.lt.s32.totalorder (!%p286_p8), %s697_s17, 1 }
  0x23   : > { %vm358_vm0 = vcmp.ge.bf16.partialorder (!%p286_p8), %v664_v5, 0  ;;  %v360_v7 = vmul.bf16 (!%p286_p8), 1036860877, %v664_v5  ;;  %vm359_vm2 = vcmp.ge.bf16.partialorder (!%p286_p8), %v665_v6, 0  ;;  %v361_v8 = vmul.bf16 (!%p286_p8), 1036860877, %v665_v6 }
  0x24   : > { %vm449_vm6 = vcmp.lt.s32.totalorder (!%p286_p8), %v446_v23, 16 }
  0x25   : > { %v362_v9 = vsel (!%p286_p8), %vm358_vm0, %v664_v5, %v360_v7  ;;  %v363_v10 = vsel (!%p286_p8), %vm359_vm2, %v665_v6, %v361_v8 }
  0x26   : > { %373 = vrot.lane.b32.xlu1 (!%p286_p8), %v362_v9, %s709_s23  ;;  %366 = vrot.lane.b32.xlu0 (!%p286_p8), %v362_v9, %s710_s25 }
  0x27   : > { %608 = vmatpush3.bf16.msra.mxu0 %v362_v9  ;;  %s838_s17 = smov (!%p332_p9, %s697_s17), 1 }
  0x28   : > { %609 = vmatprep.subr.bf16.mxu0 %v707_v4  ;;  %s595_s5 = sshll.u32 %s838_s17, 3 }
  0x29   : > { %s339_s8 = scalar_lea.vmem %s829_s4, %s595_s5 }
  0x2a   : > { %375 = vrot.lane.b32.xlu1 %v363_v10, %s709_s23  ;;  %368 = vrot.lane.b32.xlu0 %v363_v10, %s710_s25 }
  0x2e   : > { %386 = vperm.xlu0 %662, %v382_v12   ;;  %391 = vperm.xlu1 %663, %v383_v13  }
  0x98   : > { %v374_v14 = vpop.permute.xlu1 %373  ;;  %v367_v15 = vpop.permute.xlu0 %366 }
  0x9c   : > { %v369_v16 = vpop.permute.xlu0 %368  ;;  %v376_v18 = vpop.permute.xlu1 %375 }
  0x9d   : > { %v371_v17 = vsel %vm370_vm3, %v367_v15, %v369_v16  ;;  %v378_v19 = vsel %vm377_vm4, %v374_v14, %v376_v18 }
  0x9e   : > { %610 = vmatpush3.bf16.msra.mxu0 %v371_v17 }
  0x9f   : > { %611 = vmatprep.subr.bf16.mxu0 %v707_v4 }
  0xa2   : > { %612 = vmatpush3.bf16.msra.mxu0 %v378_v19 }
  0xa5   : > { %614 = vmatmul.mubr.msk.bf16.vlgmr.msra.gmra.mrb[0].mxu0 %vm399_vm5, %v666_v20 }
  0xad   : > { %v387_v22 = vpop.permute.xlu0 %386  ;;  %v392_v25 = vpop.permute.xlu1 %391 }
 0x178   : > { %v437_v24 = vpop.f32.mrb[0].mxu0 }
 0x179   : > { %v438_v26 = vadd.f32 %v437_v24, %v387_v22  ;;  %v615_v27 = vpop.f32.mrb[1].mxu0 }
 0x17a   : > { %v440_v28 = vpop.f32.mrb[2].mxu0 }
 0x17b   : > { %v441_v29 = vadd.f32 %v440_v28, %v392_v25  ;;  %v616_v30 = vpop.f32.mrb[3].mxu0  ;;  %v450_v31 = vsel %vm449_vm6, %v438_v26, 0.0 }
 0x17d   : > { %v451_v32 = vsel %vm449_vm6, %v441_v29, 0.0 }
 0x17e   : > { %v601_v33 = vpack.c.bf16 %v451_v32, %v450_v31 }
 0x180   : > { %602 = vst [vmem:[%s339_s8] sm:$0xff] %v601_v33  }
 0x181 PF: > { %s14_s19 = sadd.s32 1, %s705_s19   ;;  %s831_s15 = smov %s693_s16 }
 0x182   : > { %p11_p10 = scmp.ge.s32.totalorder %s14_s19, 4   ;;  %s832_s16 = smov %s776_s24 }
 0x183   : > { %s833_s17 = smov %s701_s18  ;;  %s834_s18 = smov %s836_s20 }
 0x184   :  { %13 = sbr.rel (!%p11_p10) target bundleno = 3 (0x3), region = 161 }

// kernel: _lambda_.33
= control target key start
LH: loop header
LB: loop body
LE: loop exit
PB: predicated region body
PF: predicated region fallthrough
CT: control target
= control target key end

     0   :  { %s682_s15 = smov 0   ;;  %s684_s16 = smov 0   ;;  %s767_s0 = inlined_call_operand.vmem [shape: bf16[2,16,256], index: 0, kind: input, shape index: {}, may-alias: {0,1}]   ;;  %s768_s1 = inlined_call_operand.vmem [shape: bf16[2,16,256], index: 1, kind: input, shape index: {}, may-alias: {0,1}]   ;;  %s769_s2 = inlined_call_operand.vmem [shape: bf16[8,32], index: 2, kind: input, shape index: {}]   ;;  %s770_s3 = inlined_call_operand.vmem [shape: f32[8,1], index: 3, kind: input, shape index: {}]   ;;  %s771_s4 = inlined_call_operand.vmem [shape: bf16[2,8,128], index: 4, kind: output, shape index: {}]  }
   0x1   :  { %s686_s17 = smov 0   ;;  %s688_s18 = smov 0  }
   0x2   :  { %s690_s19 = smov 0  }
   0x3 LB: > { %s26_s20 = sadd.s32 1, %s647_s18  ;;  %p42_p1 = scmp.ne.s32.totalorder %s639_s16, %s635_s15  ;;  %s651_s19 = sphi %s690_s19, %s14_s19   ;;  %s647_s18 = sphi %s688_s18, %s776_s18   ;;  %s643_s17 = sphi %s686_s17, %s775_s17   ;;  %s639_s16 = sphi %s684_s16, %s774_s16   ;;  %s635_s15 = sphi %s682_s15, %s773_s15  }
   0x4   : > { %p28_p0 = scmp.ge.s32.totalorder %s26_s20, 2  ;;  %p43_p2 = scmp.eq.s32.totalorder %s651_s19, 0 }
   0x5   : > { %s35_s23 = sadd.s32 1, %s639_s16  ;;  %p534_p5 = scmp.ge.s32.totalorder %s651_s19, 2 }
   0x6   : > { %s778_s20 = smov (%p28_p0, %s26_s20), 0  ;;  %p713_p3 = por %p43_p2, %p42_p1 }
   0x7   : > { %s30_s22 = ssub.s32 %s647_s18, %s778_s20  ;;  %174 = sbr.rel (%p534_p5) target bundleno = 28 (0x1c), region = 24 }
   0x8   : > { %p33_p4 = scmp.eq.s32.totalorder %s30_s22, 0 }
   0xa   : > { %s721_s24 = scalar_select %p33_p4, %s639_s16, %s35_s23  }
   0xe   : > { %177 = sbr.rel (!%p713_p3) target bundleno = 21 (0x15), region = 28  ;;  %s179_s25 = sand.u32 (%p713_p3), 1, %s639_s16  }
   0xf   : > { %s552_s26 = sshll.u32 (%p713_p3), %s647_s18, 4  ;;  %s535_s27 = sshll.u32 (%p713_p3), %s179_s25, 3 }
  0x10   : > { %s185_s30 = scalar_lea.vmem (%p713_p3), %s767_s0, %s552_s26  ;;  %s181_s5 = scalar_lea.vmem (%p713_p3), [#allocation2], %s535_s27 }
  0x11   : > { %v201_v0 = vld [vmem:[%s185_s30] sm:$0xf] (%p713_p3)  ;;  %v203_v1 = vld [vmem:[%s185_s30 + $0x8] sm:$0xf] (%p713_p3) }
  0x12   : > { %202 = vst [vmem:[%s181_s5] sm:$0xf] (%p713_p3), %v201_v0  ;;  %204 = vst [vmem:[%s181_s5 + $0x4] sm:$0xf] (%p713_p3), %v203_v1 }
  0x15 PF: > { %231 = sbr.rel (!%p713_p3) target bundleno = 28 (0x1c), region = 69  ;;  %s233_s6 = sand.u32 (%p713_p3), 1, %s639_s16  }
  0x16   : > { %s553_s7 = sshll.u32 (%p713_p3), %s647_s18, 4  ;;  %s538_s8 = sshll.u32 (%p713_p3), %s233_s6, 3 }
  0x17   : > { %s467_s11 = scalar_lea.vmem (%p713_p3), %s768_s1, %s553_s7  ;;  %s235_s12 = scalar_lea.vmem (%p713_p3), [#allocation3], %s538_s8 }
  0x18   : > { %v541_v2 = vld [vmem:[%s467_s11 + $0x4] sm:$0xf] (%p713_p3)  ;;  %v542_v3 = vld [vmem:[%s467_s11 + $0xc] sm:$0xf] (%p713_p3) }
  0x19   : > { %257 = vst [vmem:[%s235_s12] sm:$0xf] (%p713_p3), %v541_v2  ;;  %259 = vst [vmem:[%s235_s12 + $0x4] sm:$0xf] (%p713_p3), %v542_v3 }
  0x1c PF: > { %p543_p6 = scmp.ge.s32.totalorder %s651_s19, 1  ;;  %p285_p7 = scmp.lt.s32.totalorder %s651_s19, 3 }
  0x1e   : > { %p286_p8 = pnand %p543_p6, %p285_p7 }
  0x1f   : > { %s292_s13 = sand.u32 (!%p286_p8), 1, %s635_s15   ;;  %v653_v4 = vmov (!%p286_p8), 0.0   ;;  %vm654_vm0 = vmmov (!%p286_p8), 0   ;;  %v655_v7 = vmov (!%p286_p8), 0   ;;  %v372_v9 = vld [vmem:[%s770_s3] sm:$0xff] (!%p286_p8)  ;;  %s656_s15 = smov (!%p286_p8), 127   ;;  %v423_v17 = vlaneseq (!%p286_p8) }
  0x20   : > { %289 = sbr.rel (%p286_p8) target bundleno = 379 (0x17b), region = 110  ;;  %s544_s14 = sshll.u32 (!%p286_p8), %s292_s13, 3  ;;  %557 = vmatprep.subr.bf16.mxu0 (!%p286_p8), %v653_v4  ;;  %561 = vmatprep.mubr.msk.bf16.mxu0 (!%p286_p8), %vm654_vm0, %v653_v4  ;;  %vm368_vm3 = vcmask (!%p286_p8), 1039360   ;;  %v371_v16 = vld [vmem:[%s769_s2] sm:$0xf] (!%p286_p8)  ;;  %vm378_vm4 = vcmask (!%p286_p8), 261120  }
  0x21   : > { %s294_s21 = scalar_lea.vmem (!%p286_p8), [#allocation2], %s544_s14  ;;  %s301_s22 = scalar_lea.vmem (!%p286_p8), [#allocation3], %s544_s14  ;;  %609 = vset.pattern.permute.xlu1 (!%p286_p8), %v655_v7  ;;  %610 = vset.pattern.permute.xlu0 (!%p286_p8), %v655_v7  ;;  %v424_v18 = vand.u32 (!%p286_p8), 127, %v423_v17 }
  0x22   : > { %v611_v5 = vld [vmem:[%s294_s21] sm:$0xff] (!%p286_p8)   ;;  %v612_v6 = vld [vmem:[%s301_s22] sm:$0xff] (!%p286_p8)   ;;  %375 = vperm.xlu1 (!%p286_p8), %609, %v372_v9   ;;  %p331_p9 = scmp.lt.s32.totalorder (!%p286_p8), %s643_s17, 1 }
  0x23   : > { %vm356_vm1 = vcmp.ge.bf16.partialorder (!%p286_p8), %v611_v5, 0  ;;  %v358_v8 = vmul.bf16 (!%p286_p8), 1036860877, %v611_v5  ;;  %vm357_vm2 = vcmp.ge.bf16.partialorder (!%p286_p8), %v612_v6, 0  ;;  %v359_v10 = vmul.bf16 (!%p286_p8), 1036860877, %v612_v6 }
  0x24   : > { %vm427_vm5 = vcmp.lt.s32.totalorder (!%p286_p8), %v424_v18, 17 }
  0x25   : > { %v360_v11 = vsel (!%p286_p8), %vm356_vm1, %v611_v5, %v358_v8  ;;  %v361_v12 = vsel (!%p286_p8), %vm357_vm2, %v612_v6, %v359_v10 }
  0x26   : > { %364 = vrot.lane.b32.xlu0 (!%p286_p8), %v360_v11, %s656_s15  ;;  %558 = vmatpush3.bf16.msra.mxu0 (!%p286_p8), %v360_v11 }
  0x27   : > { %559 = vmatprep.subr.bf16.mxu0 %v653_v4  ;;  %s780_s17 = smov (!%p331_p9, %s643_s17), 1 }
  0x28   : > { %s546_s28 = sshll.u32 %s780_s17, 2 }
  0x29   : > { %s337_s5 = scalar_lea.vmem %s771_s4, %s546_s28 }
  0x2a   : > { %366 = vrot.lane.b32.xlu0 %v361_v12, %s656_s15 }
  0x98   : > { %v365_v13 = vpop.permute.xlu0 %364 }
  0x9c   : > { %v367_v14 = vpop.permute.xlu0 %366 }
  0x9d   : > { %v369_v15 = vsel %vm368_vm3, %v365_v13, %v367_v14 }
  0x9e   : > { %560 = vmatpush3.bf16.msra.mxu0 %v369_v15 }
  0xa1   : > { %562 = vmatmul.mubr.msk.bf16.vlgmr.msra.gmra.mrb[0].mxu0 %vm378_vm4, %v371_v16  ;;  %v376_v19 = vpop.permute.xlu1 %375 }
 0x174   : > { %v416_v20 = vpop.f32.mrb[0].mxu0 }
 0x175   : > { %v417_v21 = vadd.f32 %v416_v20, %v376_v19  ;;  %v563_v22 = vpop.f32.mrb[1].mxu0 }
 0x176   : > { %v419_v23 = vpop.f32.mrb[2].mxu0 }
 0x177   : > { %v428_v24 = vsel %vm427_vm5, %v417_v21, 0.0  ;;  %v564_v25 = vpop.f32.mrb[3].mxu0 }
 0x178   : > { %v429_v26 = vpack.c.bf16 %v428_v24, %v428_v24 }
 0x17a   : > { %430 = vst [vmem:[%s337_s5] sm:$0xf] %v429_v26 }
 0x17b PF: > { %s14_s19 = sadd.s32 1, %s651_s19   ;;  %s773_s15 = smov %s639_s16 }
 0x17c   : > { %p11_p10 = scmp.ge.s32.totalorder %s14_s19, 4   ;;  %s774_s16 = smov %s721_s24 }
 0x17d   : > { %s775_s17 = smov %s647_s18  ;;  %s776_s18 = smov %s778_s20 }
 0x17e   :  { %13 = sbr.rel (!%p11_p10) target bundleno = 3 (0x3), region = 161 }

// kernel: _lambda_.35
= control target key start
LH: loop header
LB: loop body
LE: loop exit
PB: predicated region body
PF: predicated region fallthrough
CT: control target
= control target key end

     0   :  { %s682_s15 = smov 0   ;;  %s684_s16 = smov 0   ;;  %s737_s0 = inlined_call_operand.vmem [shape: bf16[2,8,256], index: 0, kind: input, shape index: {}, may-alias: {0,1}]   ;;  %s738_s1 = inlined_call_operand.vmem [shape: bf16[2,8,256], index: 1, kind: input, shape index: {}, may-alias: {0,1}]   ;;  %s739_s2 = inlined_call_operand.vmem [shape: bf16[8,24], index: 2, kind: input, shape index: {}]   ;;  %s740_s3 = inlined_call_operand.vmem [shape: f32[8,1], index: 3, kind: input, shape index: {}]   ;;  %s741_s4 = inlined_call_operand.vmem [shape: bf16[2,8,128], index: 4, kind: output, shape index: {}]  }
   0x1   :  { %s686_s17 = smov 0  }
   0x2 LB: > { %s26_s18 = sadd.s32 1, %s644_s16  ;;  %p553_p0 = scmp.ge.s32.totalorder %s648_s17, 1  ;;  %s648_s17 = sphi %s686_s17, %s14_s17   ;;  %s644_s16 = sphi %s684_s16, %s743_s16   ;;  %s640_s15 = sphi %s682_s15, %s742_s15  }
   0x3   : > { %p28_p1 = scmp.ge.s32.totalorder %s26_s18, 2  ;;  %p200_p2 = scmp.lt.s32.totalorder %s648_s17, 3 }
   0x5   : > { %s745_s18 = smov (%p28_p1, %s26_s18), 0  ;;  %p201_p3 = pnand %p553_p0, %p200_p2 }
   0x6   : > { %p240_p4 = scmp.lt.s32.totalorder (!%p201_p3), %s640_s15, 1  ;;  %v275_v0 = vld [vmem:[%s739_s2] sm:$0xf] (!%p201_p3)  ;;  %v650_v2 = vmov (!%p201_p3), 0.0   ;;  %s651_s21 = smov (!%p201_p3), 120   ;;  %vm652_vm0 = vmmov (!%p201_p3), 0   ;;  %v446_v30 = vlaneseq (!%p201_p3) }
   0x7   : > { %204 = sbr.rel (%p201_p3) target bundleno = 373 (0x175), region = 36  ;;  %v559_v1 = vcombine.low (!%p201_p3), %v275_v0, %v275_v0  ;;  %575 = vmatprep.subr.bf16.mxu0 (!%p201_p3), %v650_v2  ;;  %581 = vmatprep.subr.bf16.mxu1 (!%p201_p3), %v650_v2  ;;  %vm293_vm2 = vcmask (!%p201_p3), 1043456   ;;  %s653_s30 = smov (!%p201_p3), 127   ;;  %vm289_vm4 = vcmask (!%p201_p3), 64512   ;;  %v656_v10 = vmov (!%p201_p3), 0   ;;  %v438_v11 = vld [vmem:[%s740_s3] sm:$0xff] (!%p201_p3) }
   0x8   : > { %577 = vmatprep.mubr.msk.bf16.mxu0 (!%p201_p3), %vm652_vm0, %v650_v2  ;;  %583 = vmatprep.mubr.msk.bf16.mxu1 (!%p201_p3), %vm652_vm0, %v650_v2  ;;  %s654_s5 = smov (!%p201_p3), 126   ;;  %s655_s6 = smov (!%p201_p3), 112   ;;  %vm287_vm5 = vcmask (!%p201_p3), 1039360   ;;  %vm389_vm6 = vcmask (!%p201_p3), 1031168   ;;  %v447_v32 = vand.u32 (!%p201_p3), 127, %v446_v30 }
   0x9   : > { %279 = vrot.lane.b32.xlu1 (!%p201_p3), %v559_v1, %s651_s21  ;;  %624 = vset.pattern.permute.xlu0 (!%p201_p3), %v656_v10 }
   0xa   : > { %vm450_vm7 = vcmp.lt.s32.totalorder (!%p201_p3), %v447_v32, 32 }
   0xe   : > { %s747_s15 = smov (!%p240_p4, %s640_s15), 1 }
   0xf   : > { %s565_s22 = sshll.u32 %s747_s15, 3  ;;  %s558_s9 = sshll.u32 %s747_s15, 2 }
  0x10   : > { %s247_s25 = scalar_lea.vmem %s737_s0, %s565_s22  ;;  %s567_s26 = sadd.s32 4, %s565_s22 }
  0x11   : > { %v267_v3 = vld [vmem:[%s247_s25] sm:$0xf]  ;;  %s256_s29 = scalar_lea.vmem %s738_s1, %s567_s26  ;;  %s264_s12 = scalar_lea.vmem %s741_s4, %s558_s9 }
  0x12   : > { %vm269_vm1 = vcmp.ge.bf16.partialorder %v267_v3, 0  ;;  %v271_v4 = vmul.bf16 1036860877, %v267_v3  ;;  %v268_v5 = vld [vmem:[%s256_s29] sm:$0xf] }
  0x13   : > { %vm270_vm3 = vcmp.ge.bf16.partialorder %v268_v5, 0  ;;  %v272_v6 = vmul.bf16 1036860877, %v268_v5 }
  0x14   : > { %v273_v7 = vsel %vm269_vm1, %v267_v3, %v271_v4 }
  0x15   : > { %283 = vrot.lane.b32.xlu0 %v273_v7, %s653_s30  ;;  %385 = vrot.lane.b32.xlu1 %v273_v7, %s654_s5  ;;  %v341_v8 = vsel %vm293_vm2, %v273_v7, 0  ;;  %v274_v9 = vsel %vm270_vm3, %v268_v5, %v272_v6 }
  0x16   : > { %582 = vmatpush3.bf16.msra.mxu1 %v341_v8 }
  0x19   : > { %285 = vrot.lane.b32.xlu0 %v274_v9, %s653_s30  ;;  %383 = vrot.lane.b32.xlu1 %v559_v1, %s655_s6 }
  0x1a   : > { %584 = vmatmul.mubr.msk.bf16.vlgmr.msra.gmra.mrb[0].mxu1 %vm289_vm4, %v275_v0 }
  0x1d   : > { %387 = vrot.lane.b32.xlu0 %v274_v9, %s654_s5 }
  0x21   : > { %441 = vperm.xlu0 %624, %v438_v11  }
  0x7b   : > { %v280_v13 = vpop.permute.xlu1 %279 }
  0x87   : > { %v284_v12 = vpop.permute.xlu0 %283  ;;  %v386_v17 = vpop.permute.xlu1 %385 }
  0x8b   : > { %v286_v14 = vpop.permute.xlu0 %285  ;;  %v384_v21 = vpop.permute.xlu1 %383 }
  0x8c   : > { %v288_v15 = vsel %vm287_vm5, %v284_v12, %v286_v14 }
  0x8d   : > { %v295_v16 = vsel %vm293_vm2, %v288_v15, 0 }
  0x8e   : > { %576 = vmatpush3.bf16.msra.mxu0 %v295_v16 }
  0x8f   : > { %v388_v18 = vpop.permute.xlu0 %387  ;;  %587 = vmatprep.subr.bf16.mxu0 %v650_v2 }
  0x90   : > { %v390_v19 = vsel %vm389_vm6, %v386_v17, %v388_v18 }
  0x91   : > { %v395_v20 = vsel %vm293_vm2, %v390_v19, 0  ;;  %578 = vmatmul.mubr.msk.bf16.vlgmr.msra.gmra.mrb[0].mxu0 %vm289_vm4, %v280_v13 }
  0x92   : > { %588 = vmatpush3.bf16.msra.mxu0 %v395_v20  ;;  %589 = vmatprep.mubr.msk.bf16.mxu0 %vm652_vm0, %v650_v2 }
  0x99   : > { %590 = vmatmul.mubr.msk.bf16.vlgmr.msra.gmra.mrb[4].mxu0 %vm289_vm4, %v384_v21 }
  0xa0   : > { %v442_v34 = vpop.permute.xlu0 %441 }
  0xed   : > { %v377_v22 = vpop.f32.mrb[0].mxu1 }
  0xee   : > { %v585_v23 = vpop.f32.mrb[1].mxu1 }
  0xef   : > { %v380_v24 = vpop.f32.mrb[2].mxu1 }
  0xf0   : > { %v586_v25 = vpop.f32.mrb[3].mxu1 }
 0x164   : > { %v331_v26 = vpop.f32.mrb[0].mxu0 }
 0x165   : > { %v378_v27 = vadd.f32 %v377_v22, %v331_v26  ;;  %v579_v28 = vpop.f32.mrb[1].mxu0 }
 0x166   : > { %v334_v29 = vpop.f32.mrb[2].mxu0 }
 0x167   : > { %v580_v31 = vpop.f32.mrb[3].mxu0 }
 0x16c   : > { %v431_v33 = vpop.f32.mrb[4].mxu0 }
 0x16d   : > { %v437_v35 = vadd.f32 %v431_v33, %v378_v27  ;;  %v591_v36 = vpop.f32.mrb[5].mxu0 }
 0x16e   : > { %v434_v37 = vpop.f32.mrb[6].mxu0 }
 0x16f   : > { %v444_v38 = vadd.f32 %v442_v34, %v437_v35  ;;  %v592_v39 = vpop.f32.mrb[7].mxu0 }
 0x171   : > { %v451_v40 = vsel %vm450_vm7, %v444_v38, 0.0 }
 0x172   : > { %v452_v41 = vpack.c.bf16 %v451_v40, %v451_v40 }
 0x174   : > { %453 = vst [vmem:[%s264_s12] sm:$0xf] %v452_v41 }
 0x175 PF: > { %s14_s17 = sadd.s32 1, %s648_s17   ;;  %s742_s15 = smov %s644_s16 }
 0x176   : > { %p11_p5 = scmp.ge.s32.totalorder %s14_s17, 4   ;;  %s743_s16 = smov %s745_s18 }
 0x178   :  { %13 = sbr.rel (!%p11_p5) target bundleno = 2 (0x2), region = 69 }

// kernel: _lambda_.36
= control target key start
LH: loop header
LB: loop body
LE: loop exit
PB: predicated region body
PF: predicated region fallthrough
CT: control target
= control target key end

     0   :  { %s761_s18 = smov 0   ;;  %s763_s19 = smov 0   ;;  %s819_s0 = inlined_call_operand.vmem [shape: bf16[2,8,256], index: 0, kind: input, shape index: {}, may-alias: {0,1}]   ;;  %s820_s1 = inlined_call_operand.vmem [shape: bf16[2,8,256], index: 1, kind: input, shape index: {}, may-alias: {0,1}]   ;;  %s821_s2 = inlined_call_operand.vmem [shape: bf16[8,24], index: 2, kind: input, shape index: {}]   ;;  %s822_s3 = inlined_call_operand.vmem [shape: f32[8,1], index: 3, kind: input, shape index: {}]   ;;  %s823_s4 = inlined_call_operand.vmem [shape: bf16[2,8,128], index: 4, kind: input, shape index: {}]   ;;  %s824_s5 = inlined_call_operand.vmem [shape: bf16[2,8,128], index: 5, kind: output, shape index: {}]  }
   0x1   :  { %s765_s20 = smov 0  }
   0x2 LB: > { %s27_s21 = sadd.s32 1, %s718_s19  ;;  %p626_p0 = scmp.ge.s32.totalorder %s722_s20, 1  ;;  %s722_s20 = sphi %s765_s20, %s15_s20   ;;  %s718_s19 = sphi %s763_s19, %s826_s19   ;;  %s714_s18 = sphi %s761_s18, %s825_s18  }
   0x3   : > { %p29_p1 = scmp.ge.s32.totalorder %s27_s21, 2  ;;  %p239_p2 = scmp.lt.s32.totalorder %s722_s20, 3 }
   0x5   : > { %s828_s21 = smov (%p29_p1, %s27_s21), 0  ;;  %p240_p3 = pnand %p626_p0, %p239_p2 }
   0x6   : > { %p288_p4 = scmp.lt.s32.totalorder (!%p240_p3), %s714_s18, 1  ;;  %v330_v0 = vld [vmem:[%s821_s2] sm:$0xf] (!%p240_p3)  ;;  %v724_v2 = vmov (!%p240_p3), 0.0   ;;  %s725_s24 = smov (!%p240_p3), 120   ;;  %vm726_vm0 = vmmov (!%p240_p3), 0   ;;  %v504_v31 = vlaneseq (!%p240_p3) }
   0x7   : > { %243 = sbr.rel (%p240_p3) target bundleno = 375 (0x177), region = 40  ;;  %v633_v1 = vcombine.low (!%p240_p3), %v330_v0, %v330_v0  ;;  %649 = vmatprep.subr.bf16.mxu0 (!%p240_p3), %v724_v2  ;;  %655 = vmatprep.subr.bf16.mxu1 (!%p240_p3), %v724_v2  ;;  %vm348_vm2 = vcmask (!%p240_p3), 1043456   ;;  %s727_s8 = smov (!%p240_p3), 127   ;;  %vm344_vm4 = vcmask (!%p240_p3), 64512   ;;  %v730_v10 = vmov (!%p240_p3), 0   ;;  %v493_v11 = vld [vmem:[%s822_s3] sm:$0xff] (!%p240_p3) }
   0x8   : > { %651 = vmatprep.mubr.msk.bf16.mxu0 (!%p240_p3), %vm726_vm0, %v724_v2  ;;  %657 = vmatprep.mubr.msk.bf16.mxu1 (!%p240_p3), %vm726_vm0, %v724_v2  ;;  %s728_s9 = smov (!%p240_p3), 126   ;;  %s729_s10 = smov (!%p240_p3), 112   ;;  %vm342_vm5 = vcmask (!%p240_p3), 1039360   ;;  %vm444_vm6 = vcmask (!%p240_p3), 1031168   ;;  %v505_v34 = vand.u32 (!%p240_p3), 127, %v504_v31 }
   0x9   : > { %334 = vrot.lane.b32.xlu1 (!%p240_p3), %v633_v1, %s725_s24  ;;  %698 = vset.pattern.permute.xlu0 (!%p240_p3), %v730_v10 }
   0xa   : > { %vm508_vm7 = vcmp.lt.s32.totalorder (!%p240_p3), %v505_v34, 32 }
   0xe   : > { %s830_s18 = smov (!%p288_p4, %s714_s18), 1 }
   0xf   : > { %s639_s25 = sshll.u32 %s830_s18, 3  ;;  %s631_s13 = sshll.u32 %s830_s18, 2 }
  0x10   : > { %s295_s28 = scalar_lea.vmem %s819_s0, %s639_s25  ;;  %s641_s29 = sadd.s32 4, %s639_s25 }
  0x11   : > { %v322_v3 = vld [vmem:[%s295_s28] sm:$0xf]  ;;  %s304_s7 = scalar_lea.vmem %s820_s1, %s641_s29  ;;  %s312_s16 = scalar_lea.vmem %s823_s4, %s631_s13 }
  0x12   : > { %vm324_vm1 = vcmp.ge.bf16.partialorder %v322_v3, 0  ;;  %v326_v4 = vmul.bf16 1036860877, %v322_v3  ;;  %v323_v5 = vld [vmem:[%s304_s7] sm:$0xf]  ;;  %s319_s22 = scalar_lea.vmem %s824_s5, %s631_s13 }
  0x13   : > { %vm325_vm3 = vcmp.ge.bf16.partialorder %v323_v5, 0  ;;  %v327_v6 = vmul.bf16 1036860877, %v323_v5  ;;  %v500_v32 = vld [vmem:[%s312_s16] sm:$0xf] }
  0x14   : > { %v328_v7 = vsel %vm324_vm1, %v322_v3, %v326_v4  ;;  %v501_v38 = vunpack.c.l.bf16 %v500_v32 }
  0x15   : > { %338 = vrot.lane.b32.xlu0 %v328_v7, %s727_s8  ;;  %440 = vrot.lane.b32.xlu1 %v328_v7, %s728_s9  ;;  %v396_v8 = vsel %vm348_vm2, %v328_v7, 0  ;;  %v329_v9 = vsel %vm325_vm3, %v323_v5, %v327_v6 }
  0x16   : > { %656 = vmatpush3.bf16.msra.mxu1 %v396_v8 }
  0x19   : > { %340 = vrot.lane.b32.xlu0 %v329_v9, %s727_s8  ;;  %438 = vrot.lane.b32.xlu1 %v633_v1, %s729_s10 }
  0x1a   : > { %658 = vmatmul.mubr.msk.bf16.vlgmr.msra.gmra.mrb[0].mxu1 %vm344_vm4, %v330_v0 }
  0x1d   : > { %442 = vrot.lane.b32.xlu0 %v329_v9, %s728_s9 }
  0x21   : > { %496 = vperm.xlu0 %698, %v493_v11  }
  0x7b   : > { %v335_v13 = vpop.permute.xlu1 %334 }
  0x87   : > { %v339_v12 = vpop.permute.xlu0 %338  ;;  %v441_v17 = vpop.permute.xlu1 %440 }
  0x8b   : > { %v341_v14 = vpop.permute.xlu0 %340  ;;  %v439_v21 = vpop.permute.xlu1 %438 }
  0x8c   : > { %v343_v15 = vsel %vm342_vm5, %v339_v12, %v341_v14 }
  0x8d   : > { %v350_v16 = vsel %vm348_vm2, %v343_v15, 0 }
  0x8e   : > { %650 = vmatpush3.bf16.msra.mxu0 %v350_v16 }
  0x8f   : > { %v443_v18 = vpop.permute.xlu0 %442  ;;  %661 = vmatprep.subr.bf16.mxu0 %v724_v2 }
  0x90   : > { %v445_v19 = vsel %vm444_vm6, %v441_v17, %v443_v18 }
  0x91   : > { %v450_v20 = vsel %vm348_vm2, %v445_v19, 0  ;;  %652 = vmatmul.mubr.msk.bf16.vlgmr.msra.gmra.mrb[0].mxu0 %vm344_vm4, %v335_v13 }
  0x92   : > { %662 = vmatpush3.bf16.msra.mxu0 %v450_v20  ;;  %663 = vmatprep.mubr.msk.bf16.mxu0 %vm726_vm0, %v724_v2 }
  0x99   : > { %664 = vmatmul.mubr.msk.bf16.vlgmr.msra.gmra.mrb[4].mxu0 %vm344_vm4, %v439_v21 }
  0xa0   : > { %v497_v35 = vpop.permute.xlu0 %496 }
  0xed   : > { %v432_v22 = vpop.f32.mrb[0].mxu1 }
  0xee   : > { %v659_v23 = vpop.f32.mrb[1].mxu1 }
  0xef   : > { %v435_v24 = vpop.f32.mrb[2].mxu1 }
  0xf0   : > { %v660_v25 = vpop.f32.mrb[3].mxu1 }
 0x164   : > { %v386_v26 = vpop.f32.mrb[0].mxu0 }
 0x165   : > { %v433_v27 = vadd.f32 %v432_v22, %v386_v26  ;;  %v653_v28 = vpop.f32.mrb[1].mxu0 }
 0x166   : > { %v389_v29 = vpop.f32.mrb[2].mxu0 }
 0x167   : > { %v654_v30 = vpop.f32.mrb[3].mxu0 }
 0x16c   : > { %v486_v33 = vpop.f32.mrb[4].mxu0 }
 0x16d   : > { %v492_v36 = vadd.f32 %v486_v33, %v433_v27  ;;  %v665_v37 = vpop.f32.mrb[5].mxu0 }
 0x16e   : > { %v489_v39 = vpop.f32.mrb[6].mxu0 }
 0x16f   : > { %v499_v40 = vadd.f32 %v497_v35, %v492_v36  ;;  %v666_v41 = vpop.f32.mrb[7].mxu0 }
 0x171   : > { %v502_v42 = vadd.f32 %v501_v38, %v499_v40 }
 0x173   : > { %v509_v43 = vsel %vm508_vm7, %v502_v42, 0.0 }
 0x174   : > { %v510_v44 = vpack.c.bf16 %v509_v43, %v509_v43 }
 0x176   : > { %511 = vst [vmem:[%s319_s22] sm:$0xf] %v510_v44 }
 0x177 PF: > { %s15_s20 = sadd.s32 1, %s722_s20   ;;  %s825_s18 = smov %s718_s19 }
 0x178   : > { %p12_p5 = scmp.ge.s32.totalorder %s15_s20, 4   ;;  %s826_s19 = smov %s828_s21 }
 0x17a   :  { %14 = sbr.rel (!%p12_p5) target bundleno = 2 (0x2), region = 76 }

// kernel: _lambda_.39
= control target key start
LH: loop header
LB: loop body
LE: loop exit
PB: predicated region body
PF: predicated region fallthrough
CT: control target
= control target key end

     0   :  { %s818_s15 = smov 0   ;;  %s820_s16 = smov 0   ;;  %s889_s0 = inlined_call_operand.vmem [shape: bf16[2,8,256], index: 0, kind: input, shape index: {}, may-alias: {0,1}]   ;;  %s890_s1 = inlined_call_operand.vmem [shape: bf16[2,8,256], index: 1, kind: input, shape index: {}, may-alias: {0,1}]   ;;  %s891_s2 = inlined_call_operand.vmem [shape: bf16[8,40], index: 2, kind: input, shape index: {}]   ;;  %s892_s3 = inlined_call_operand.vmem [shape: f32[8,1], index: 3, kind: input, shape index: {}]   ;;  %s893_s4 = inlined_call_operand.vmem [shape: bf16[2,8,128], index: 4, kind: output, shape index: {}]  }
   0x1   :  { %s822_s17 = smov 0  }
   0x2 LB: > { %s26_s18 = sadd.s32 1, %s776_s16  ;;  %p663_p0 = scmp.ge.s32.totalorder %s780_s17, 1  ;;  %s780_s17 = sphi %s822_s17, %s14_s17   ;;  %s776_s16 = sphi %s820_s16, %s895_s16   ;;  %s772_s15 = sphi %s818_s15, %s894_s15  }
   0x3   : > { %p28_p1 = scmp.ge.s32.totalorder %s26_s18, 2  ;;  %p200_p2 = scmp.lt.s32.totalorder %s780_s17, 3 }
   0x5   : > { %s897_s18 = smov (%p28_p1, %s26_s18), 0  ;;  %p201_p3 = pnand %p663_p0, %p200_p2 }
   0x6   : > { %v275_v0 = vld [vmem:[%s891_s2] sm:$0xf] (!%p201_p3)  ;;  %p240_p4 = scmp.lt.s32.totalorder (!%p201_p3), %s772_s15, 1  ;;  %v782_v2 = vmov (!%p201_p3), 0.0   ;;  %s783_s21 = smov (!%p201_p3), 120   ;;  %vm784_vm0 = vmmov (!%p201_p3), 0   ;;  %v556_v45 = vlaneseq (!%p201_p3) }
   0x7   : > { %204 = sbr.rel (%p201_p3) target bundleno = 381 (0x17d), region = 36  ;;  %v669_v1 = vcombine.low (!%p201_p3), %v275_v0, %v275_v0  ;;  %691 = vmatprep.subr.bf16.mxu0 (!%p201_p3), %v782_v2  ;;  %697 = vmatprep.subr.bf16.mxu1 (!%p201_p3), %v782_v2  ;;  %vm293_vm2 = vcmask (!%p201_p3), 1043456   ;;  %s785_s30 = smov (!%p201_p3), 127   ;;  %vm289_vm4 = vcmask (!%p201_p3), 64512   ;;  %v790_v10 = vmov (!%p201_p3), 0   ;;  %v548_v11 = vld [vmem:[%s892_s3] sm:$0xff] (!%p201_p3) }
   0x8   : > { %693 = vmatprep.mubr.msk.bf16.mxu0 (!%p201_p3), %vm784_vm0, %v782_v2  ;;  %699 = vmatprep.mubr.msk.bf16.mxu1 (!%p201_p3), %vm784_vm0, %v782_v2  ;;  %s786_s5 = smov (!%p201_p3), 126   ;;  %s787_s6 = smov (!%p201_p3), 112   ;;  %vm287_vm5 = vcmask (!%p201_p3), 1039360   ;;  %vm389_vm6 = vcmask (!%p201_p3), 1031168   ;;  %vm444_vm7 = vcmask (!%p201_p3), 1022976   ;;  %vm499_vm8 = vcmask (!%p201_p3), 1014784  }
   0x9   : > { %279 = vrot.lane.b32.xlu1 (!%p201_p3), %v669_v1, %s783_s21  ;;  %s788_s7 = smov (!%p201_p3), 125   ;;  %s789_s8 = smov (!%p201_p3), 124   ;;  %756 = vset.pattern.permute.xlu0 (!%p201_p3), %v790_v10  ;;  %v557_v52 = vand.u32 (!%p201_p3), 127, %v556_v45 }
   0xa   : > { %s791_s9 = smov (!%p201_p3), 96   ;;  %s792_s10 = smov (!%p201_p3), 104  }
   0xb   : > { %vm560_vm9 = vcmp.lt.s32.totalorder (!%p201_p3), %v557_v52, 32 }
   0xe   : > { %s899_s15 = smov (!%p240_p4, %s772_s15), 1 }
   0xf   : > { %s677_s22 = sshll.u32 %s899_s15, 3  ;;  %s668_s13 = sshll.u32 %s899_s15, 2 }
  0x10   : > { %s247_s25 = scalar_lea.vmem %s889_s0, %s677_s22  ;;  %s679_s26 = sadd.s32 4, %s677_s22 }
  0x11   : > { %v267_v3 = vld [vmem:[%s247_s25] sm:$0xf]  ;;  %s256_s29 = scalar_lea.vmem %s890_s1, %s679_s26  ;;  %s264_s20 = scalar_lea.vmem %s893_s4, %s668_s13 }
  0x12   : > { %vm269_vm1 = vcmp.ge.bf16.partialorder %v267_v3, 0  ;;  %v271_v4 = vmul.bf16 1036860877, %v267_v3  ;;  %v268_v5 = vld [vmem:[%s256_s29] sm:$0xf] }
  0x13   : > { %vm270_vm3 = vcmp.ge.bf16.partialorder %v268_v5, 0  ;;  %v272_v6 = vmul.bf16 1036860877, %v268_v5 }
  0x14   : > { %v273_v7 = vsel %vm269_vm1, %v267_v3, %v271_v4 }
  0x15   : > { %283 = vrot.lane.b32.xlu0 %v273_v7, %s785_s30  ;;  %385 = vrot.lane.b32.xlu1 %v273_v7, %s786_s5  ;;  %v341_v8 = vsel %vm293_vm2, %v273_v7, 0  ;;  %v274_v9 = vsel %vm270_vm3, %v268_v5, %v272_v6 }
  0x16   : > { %698 = vmatpush3.bf16.msra.mxu1 %v341_v8 }
  0x17   : > { %709 = vmatprep.subr.bf16.mxu1 %v782_v2 }
  0x19   : > { %285 = vrot.lane.b32.xlu0 %v274_v9, %s785_s30  ;;  %383 = vrot.lane.b32.xlu1 %v669_v1, %s787_s6 }
  0x1a   : > { %700 = vmatmul.mubr.msk.bf16.vlgmr.msra.gmra.mrb[0].mxu1 %vm289_vm4, %v275_v0 }
  0x1b   : > { %711 = vmatprep.mubr.msk.bf16.mxu1 %vm784_vm0, %v782_v2 }
  0x1d   : > { %387 = vrot.lane.b32.xlu0 %v274_v9, %s786_s5  ;;  %442 = vrot.lane.b32.xlu1 %v274_v9, %s788_s7 }
  0x21   : > { %440 = vrot.lane.b32.xlu0 %v273_v7, %s788_s7  ;;  %497 = vrot.lane.b32.xlu1 %v274_v9, %s789_s8 }
  0x25   : > { %495 = vrot.lane.b32.xlu0 %v273_v7, %s789_s8  ;;  %493 = vrot.lane.b32.xlu1 %v669_v1, %s791_s9 }
  0x29   : > { %438 = vrot.lane.b32.xlu0 %v669_v1, %s792_s10 }
  0x2d   : > { %551 = vperm.xlu0 %756, %v548_v11  }
  0x7b   : > { %v280_v12 = vpop.permute.xlu1 %279 }
  0x87   : > { %v284_v13 = vpop.permute.xlu0 %283  ;;  %v386_v14 = vpop.permute.xlu1 %385 }
  0x8b   : > { %v286_v15 = vpop.permute.xlu0 %285  ;;  %v384_v16 = vpop.permute.xlu1 %383 }
  0x8c   : > { %v288_v17 = vsel %vm287_vm5, %v284_v13, %v286_v15 }
  0x8d   : > { %v295_v18 = vsel %vm293_vm2, %v288_v17, 0 }
  0x8e   : > { %692 = vmatpush3.bf16.msra.mxu0 %v295_v18 }
  0x8f   : > { %v388_v19 = vpop.permute.xlu0 %387  ;;  %703 = vmatprep.subr.bf16.mxu0 %v782_v2  ;;  %v443_v20 = vpop.permute.xlu1 %442 }
  0x90   : > { %v390_v21 = vsel %vm389_vm6, %v386_v14, %v388_v19 }
  0x91   : > { %v395_v22 = vsel %vm293_vm2, %v390_v21, 0  ;;  %694 = vmatmul.mubr.msk.bf16.vlgmr.msra.gmra.mrb[0].mxu0 %vm289_vm4, %v280_v12 }
  0x92   : > { %704 = vmatpush3.bf16.msra.mxu0 %v395_v22  ;;  %705 = vmatprep.mubr.msk.bf16.mxu0 %vm784_vm0, %v782_v2 }
  0x93   : > { %v441_v23 = vpop.permute.xlu0 %440  ;;  %715 = vmatprep.subr.bf16.mxu0 %v782_v2  ;;  %v498_v26 = vpop.permute.xlu1 %497 }
  0x94   : > { %v445_v24 = vsel %vm444_vm7, %v441_v23, %v443_v20 }
  0x95   : > { %v450_v25 = vsel %vm293_vm2, %v445_v24, 0 }
  0x96   : > { %710 = vmatpush3.bf16.msra.mxu1 %v450_v25 }
  0x97   : > { %v496_v27 = vpop.permute.xlu0 %495  ;;  %v494_v31 = vpop.permute.xlu1 %493 }
  0x98   : > { %v500_v28 = vsel %vm499_vm8, %v496_v27, %v498_v26 }
  0x99   : > { %v505_v29 = vsel %vm293_vm2, %v500_v28, 0  ;;  %706 = vmatmul.mubr.msk.bf16.vlgmr.msra.gmra.mrb[4].mxu0 %vm289_vm4, %v384_v16 }
  0x9a   : > { %716 = vmatpush3.bf16.msra.mxu0 %v505_v29  ;;  %717 = vmatprep.mubr.msk.bf16.mxu0 %vm784_vm0, %v782_v2 }
  0x9b   : > { %v439_v30 = vpop.permute.xlu0 %438 }
  0x9c   : > { %712 = vmatmul.mubr.msk.bf16.vlgmr.msra.gmra.mrb[4].mxu1 %vm289_vm4, %v439_v30 }
  0xa1   : > { %718 = vmatmul.mubr.msk.bf16.vlgmr.msra.gmra.mrb[8].mxu0 %vm289_vm4, %v494_v31 }
  0xac   : > { %v552_v54 = vpop.permute.xlu0 %551 }
  0xed   : > { %v377_v32 = vpop.f32.mrb[0].mxu1 }
  0xee   : > { %v701_v33 = vpop.f32.mrb[1].mxu1 }
  0xef   : > { %v380_v34 = vpop.f32.mrb[2].mxu1 }
  0xf0   : > { %v702_v35 = vpop.f32.mrb[3].mxu1 }
 0x164   : > { %v331_v36 = vpop.f32.mrb[0].mxu0 }
 0x165   : > { %v378_v37 = vadd.f32 %v377_v32, %v331_v36  ;;  %v695_v38 = vpop.f32.mrb[1].mxu0 }
 0x166   : > { %v334_v39 = vpop.f32.mrb[2].mxu0 }
 0x167   : > { %v696_v40 = vpop.f32.mrb[3].mxu0 }
 0x16c   : > { %v431_v41 = vpop.f32.mrb[4].mxu0 }
 0x16d   : > { %v437_v42 = vadd.f32 %v431_v41, %v378_v37  ;;  %v707_v43 = vpop.f32.mrb[5].mxu0 }
 0x16e   : > { %v434_v44 = vpop.f32.mrb[6].mxu0 }
 0x16f   : > { %v708_v46 = vpop.f32.mrb[7].mxu0  ;;  %v486_v47 = vpop.f32.mrb[4].mxu1 }
 0x170   : > { %v492_v48 = vadd.f32 %v486_v47, %v437_v42  ;;  %v713_v49 = vpop.f32.mrb[5].mxu1 }
 0x171   : > { %v489_v50 = vpop.f32.mrb[6].mxu1 }
 0x172   : > { %v714_v51 = vpop.f32.mrb[7].mxu1 }
 0x174   : > { %v541_v53 = vpop.f32.mrb[8].mxu0 }
 0x175   : > { %v547_v55 = vadd.f32 %v541_v53, %v492_v48  ;;  %v719_v56 = vpop.f32.mrb[9].mxu0 }
 0x176   : > { %v544_v57 = vpop.f32.mrb[10].mxu0 }
 0x177   : > { %v554_v58 = vadd.f32 %v552_v54, %v547_v55  ;;  %v720_v59 = vpop.f32.mrb[11].mxu0 }
 0x179   : > { %v561_v60 = vsel %vm560_vm9, %v554_v58, 0.0 }
 0x17a   : > { %v562_v61 = vpack.c.bf16 %v561_v60, %v561_v60 }
 0x17c   : > { %563 = vst [vmem:[%s264_s20] sm:$0xf] %v562_v61 }
 0x17d PF: > { %s14_s17 = sadd.s32 1, %s780_s17   ;;  %s894_s15 = smov %s776_s16 }
 0x17e   : > { %p11_p5 = scmp.ge.s32.totalorder %s14_s17, 4   ;;  %s895_s16 = smov %s897_s18 }
 0x180   :  { %13 = sbr.rel (!%p11_p5) target bundleno = 2 (0x2), region = 69 }

// kernel: _lambda_.40
= control target key start
LH: loop header
LB: loop body
LE: loop exit
PB: predicated region body
PF: predicated region fallthrough
CT: control target
= control target key end

     0   :  { %s897_s18 = smov 0   ;;  %s899_s19 = smov 0   ;;  %s971_s0 = inlined_call_operand.vmem [shape: bf16[2,8,256], index: 0, kind: input, shape index: {}, may-alias: {0,1}]   ;;  %s972_s1 = inlined_call_operand.vmem [shape: bf16[2,8,256], index: 1, kind: input, shape index: {}, may-alias: {0,1}]   ;;  %s973_s2 = inlined_call_operand.vmem [shape: bf16[8,40], index: 2, kind: input, shape index: {}]   ;;  %s974_s3 = inlined_call_operand.vmem [shape: f32[8,1], index: 3, kind: input, shape index: {}]   ;;  %s975_s4 = inlined_call_operand.vmem [shape: bf16[2,8,128], index: 4, kind: input, shape index: {}]   ;;  %s976_s5 = inlined_call_operand.vmem [shape: bf16[2,8,128], index: 5, kind: output, shape index: {}]  }
   0x1   :  { %s901_s20 = smov 0  }
   0x2 LB: > { %s27_s21 = sadd.s32 1, %s850_s19  ;;  %p736_p0 = scmp.ge.s32.totalorder %s854_s20, 1  ;;  %s854_s20 = sphi %s901_s20, %s15_s20   ;;  %s850_s19 = sphi %s899_s19, %s978_s19   ;;  %s846_s18 = sphi %s897_s18, %s977_s18  }
   0x3   : > { %p29_p1 = scmp.ge.s32.totalorder %s27_s21, 2  ;;  %p239_p2 = scmp.lt.s32.totalorder %s854_s20, 3 }
   0x5   : > { %s980_s21 = smov (%p29_p1, %s27_s21), 0  ;;  %p240_p3 = pnand %p736_p0, %p239_p2 }
   0x6   : > { %v330_v0 = vld [vmem:[%s973_s2] sm:$0xf] (!%p240_p3)  ;;  %p288_p4 = scmp.lt.s32.totalorder (!%p240_p3), %s846_s18, 1  ;;  %v856_v2 = vmov (!%p240_p3), 0.0   ;;  %s857_s24 = smov (!%p240_p3), 120   ;;  %vm858_vm0 = vmmov (!%p240_p3), 0   ;;  %v614_v49 = vlaneseq (!%p240_p3) }
   0x7   : > { %243 = sbr.rel (%p240_p3) target bundleno = 383 (0x17f), region = 40  ;;  %v743_v1 = vcombine.low (!%p240_p3), %v330_v0, %v330_v0  ;;  %765 = vmatprep.subr.bf16.mxu0 (!%p240_p3), %v856_v2  ;;  %771 = vmatprep.subr.bf16.mxu1 (!%p240_p3), %v856_v2  ;;  %vm348_vm2 = vcmask (!%p240_p3), 1043456   ;;  %s859_s8 = smov (!%p240_p3), 127   ;;  %vm344_vm4 = vcmask (!%p240_p3), 64512   ;;  %v864_v10 = vmov (!%p240_p3), 0   ;;  %v603_v11 = vld [vmem:[%s974_s3] sm:$0xff] (!%p240_p3) }
   0x8   : > { %767 = vmatprep.mubr.msk.bf16.mxu0 (!%p240_p3), %vm858_vm0, %v856_v2  ;;  %773 = vmatprep.mubr.msk.bf16.mxu1 (!%p240_p3), %vm858_vm0, %v856_v2  ;;  %s860_s9 = smov (!%p240_p3), 126   ;;  %s861_s10 = smov (!%p240_p3), 112   ;;  %vm342_vm5 = vcmask (!%p240_p3), 1039360   ;;  %vm444_vm6 = vcmask (!%p240_p3), 1031168   ;;  %vm499_vm7 = vcmask (!%p240_p3), 1022976   ;;  %vm554_vm8 = vcmask (!%p240_p3), 1014784  }
   0x9   : > { %334 = vrot.lane.b32.xlu1 (!%p240_p3), %v743_v1, %s857_s24  ;;  %s862_s11 = smov (!%p240_p3), 125   ;;  %s863_s12 = smov (!%p240_p3), 124   ;;  %830 = vset.pattern.permute.xlu0 (!%p240_p3), %v864_v10  ;;  %v615_v54 = vand.u32 (!%p240_p3), 127, %v614_v49 }
   0xa   : > { %s865_s13 = smov (!%p240_p3), 96   ;;  %s866_s14 = smov (!%p240_p3), 104  }
   0xb   : > { %vm618_vm9 = vcmp.lt.s32.totalorder (!%p240_p3), %v615_v54, 32 }
   0xe   : > { %s982_s18 = smov (!%p288_p4, %s846_s18), 1 }
   0xf   : > { %s751_s25 = sshll.u32 %s982_s18, 3  ;;  %s741_s17 = sshll.u32 %s982_s18, 2 }
  0x10   : > { %s295_s28 = scalar_lea.vmem %s971_s0, %s751_s25  ;;  %s753_s29 = sadd.s32 4, %s751_s25 }
  0x11   : > { %v322_v3 = vld [vmem:[%s295_s28] sm:$0xf]  ;;  %s304_s7 = scalar_lea.vmem %s972_s1, %s753_s29  ;;  %s312_s24 = scalar_lea.vmem %s975_s4, %s741_s17 }
  0x12   : > { %vm324_vm1 = vcmp.ge.bf16.partialorder %v322_v3, 0  ;;  %v326_v4 = vmul.bf16 1036860877, %v322_v3  ;;  %v323_v5 = vld [vmem:[%s304_s7] sm:$0xf]  ;;  %s319_s26 = scalar_lea.vmem %s976_s5, %s741_s17 }
  0x13   : > { %vm325_vm3 = vcmp.ge.bf16.partialorder %v323_v5, 0  ;;  %v327_v6 = vmul.bf16 1036860877, %v323_v5  ;;  %v610_v52 = vld [vmem:[%s312_s24] sm:$0xf] }
  0x14   : > { %v328_v7 = vsel %vm324_vm1, %v322_v3, %v326_v4  ;;  %v611_v58 = vunpack.c.l.bf16 %v610_v52 }
  0x15   : > { %338 = vrot.lane.b32.xlu0 %v328_v7, %s859_s8  ;;  %440 = vrot.lane.b32.xlu1 %v328_v7, %s860_s9  ;;  %v396_v8 = vsel %vm348_vm2, %v328_v7, 0  ;;  %v329_v9 = vsel %vm325_vm3, %v323_v5, %v327_v6 }
  0x16   : > { %772 = vmatpush3.bf16.msra.mxu1 %v396_v8 }
  0x17   : > { %783 = vmatprep.subr.bf16.mxu1 %v856_v2 }
  0x19   : > { %340 = vrot.lane.b32.xlu0 %v329_v9, %s859_s8  ;;  %438 = vrot.lane.b32.xlu1 %v743_v1, %s861_s10 }
  0x1a   : > { %774 = vmatmul.mubr.msk.bf16.vlgmr.msra.gmra.mrb[0].mxu1 %vm344_vm4, %v330_v0 }
  0x1b   : > { %785 = vmatprep.mubr.msk.bf16.mxu1 %vm858_vm0, %v856_v2 }
  0x1d   : > { %442 = vrot.lane.b32.xlu0 %v329_v9, %s860_s9  ;;  %497 = vrot.lane.b32.xlu1 %v329_v9, %s862_s11 }
  0x21   : > { %495 = vrot.lane.b32.xlu0 %v328_v7, %s862_s11  ;;  %552 = vrot.lane.b32.xlu1 %v329_v9, %s863_s12 }
  0x25   : > { %550 = vrot.lane.b32.xlu0 %v328_v7, %s863_s12  ;;  %548 = vrot.lane.b32.xlu1 %v743_v1, %s865_s13 }
  0x29   : > { %493 = vrot.lane.b32.xlu0 %v743_v1, %s866_s14 }
  0x2d   : > { %606 = vperm.xlu0 %830, %v603_v11  }
  0x7b   : > { %v335_v12 = vpop.permute.xlu1 %334 }
  0x87   : > { %v339_v13 = vpop.permute.xlu0 %338  ;;  %v441_v14 = vpop.permute.xlu1 %440 }
  0x8b   : > { %v341_v15 = vpop.permute.xlu0 %340  ;;  %v439_v16 = vpop.permute.xlu1 %438 }
  0x8c   : > { %v343_v17 = vsel %vm342_vm5, %v339_v13, %v341_v15 }
  0x8d   : > { %v350_v18 = vsel %vm348_vm2, %v343_v17, 0 }
  0x8e   : > { %766 = vmatpush3.bf16.msra.mxu0 %v350_v18 }
  0x8f   : > { %v443_v19 = vpop.permute.xlu0 %442  ;;  %777 = vmatprep.subr.bf16.mxu0 %v856_v2  ;;  %v498_v20 = vpop.permute.xlu1 %497 }
  0x90   : > { %v445_v21 = vsel %vm444_vm6, %v441_v14, %v443_v19 }
  0x91   : > { %v450_v22 = vsel %vm348_vm2, %v445_v21, 0  ;;  %768 = vmatmul.mubr.msk.bf16.vlgmr.msra.gmra.mrb[0].mxu0 %vm344_vm4, %v335_v12 }
  0x92   : > { %778 = vmatpush3.bf16.msra.mxu0 %v450_v22  ;;  %779 = vmatprep.mubr.msk.bf16.mxu0 %vm858_vm0, %v856_v2 }
  0x93   : > { %v496_v23 = vpop.permute.xlu0 %495  ;;  %789 = vmatprep.subr.bf16.mxu0 %v856_v2  ;;  %v553_v26 = vpop.permute.xlu1 %552 }
  0x94   : > { %v500_v24 = vsel %vm499_vm7, %v496_v23, %v498_v20 }
  0x95   : > { %v505_v25 = vsel %vm348_vm2, %v500_v24, 0 }
  0x96   : > { %784 = vmatpush3.bf16.msra.mxu1 %v505_v25 }
  0x97   : > { %v551_v27 = vpop.permute.xlu0 %550  ;;  %v549_v31 = vpop.permute.xlu1 %548 }
  0x98   : > { %v555_v28 = vsel %vm554_vm8, %v551_v27, %v553_v26 }
  0x99   : > { %v560_v29 = vsel %vm348_vm2, %v555_v28, 0  ;;  %780 = vmatmul.mubr.msk.bf16.vlgmr.msra.gmra.mrb[4].mxu0 %vm344_vm4, %v439_v16 }
  0x9a   : > { %790 = vmatpush3.bf16.msra.mxu0 %v560_v29  ;;  %791 = vmatprep.mubr.msk.bf16.mxu0 %vm858_vm0, %v856_v2 }
  0x9b   : > { %v494_v30 = vpop.permute.xlu0 %493 }
  0x9c   : > { %786 = vmatmul.mubr.msk.bf16.vlgmr.msra.gmra.mrb[4].mxu1 %vm344_vm4, %v494_v30 }
  0xa1   : > { %792 = vmatmul.mubr.msk.bf16.vlgmr.msra.gmra.mrb[8].mxu0 %vm344_vm4, %v549_v31 }
  0xac   : > { %v607_v55 = vpop.permute.xlu0 %606 }
  0xed   : > { %v432_v32 = vpop.f32.mrb[0].mxu1 }
  0xee   : > { %v775_v33 = vpop.f32.mrb[1].mxu1 }
  0xef   : > { %v435_v34 = vpop.f32.mrb[2].mxu1 }
  0xf0   : > { %v776_v35 = vpop.f32.mrb[3].mxu1 }
 0x164   : > { %v386_v36 = vpop.f32.mrb[0].mxu0 }
 0x165   : > { %v433_v37 = vadd.f32 %v432_v32, %v386_v36  ;;  %v769_v38 = vpop.f32.mrb[1].mxu0 }
 0x166   : > { %v389_v39 = vpop.f32.mrb[2].mxu0 }
 0x167   : > { %v770_v40 = vpop.f32.mrb[3].mxu0 }
 0x16c   : > { %v486_v41 = vpop.f32.mrb[4].mxu0 }
 0x16d   : > { %v492_v42 = vadd.f32 %v486_v41, %v433_v37  ;;  %v781_v43 = vpop.f32.mrb[5].mxu0 }
 0x16e   : > { %v489_v44 = vpop.f32.mrb[6].mxu0 }
 0x16f   : > { %v782_v45 = vpop.f32.mrb[7].mxu0  ;;  %v541_v46 = vpop.f32.mrb[4].mxu1 }
 0x170   : > { %v547_v47 = vadd.f32 %v541_v46, %v492_v42  ;;  %v787_v48 = vpop.f32.mrb[5].mxu1 }
 0x171   : > { %v544_v50 = vpop.f32.mrb[6].mxu1 }
 0x172   : > { %v788_v51 = vpop.f32.mrb[7].mxu1 }
 0x174   : > { %v596_v53 = vpop.f32.mrb[8].mxu0 }
 0x175   : > { %v602_v56 = vadd.f32 %v596_v53, %v547_v47  ;;  %v793_v57 = vpop.f32.mrb[9].mxu0 }
 0x176   : > { %v599_v59 = vpop.f32.mrb[10].mxu0 }
 0x177   : > { %v609_v60 = vadd.f32 %v607_v55, %v602_v56  ;;  %v794_v61 = vpop.f32.mrb[11].mxu0 }
 0x179   : > { %v612_v62 = vadd.f32 %v611_v58, %v609_v60 }
 0x17b   : > { %v619_v63 = vsel %vm618_vm9, %v612_v62, 0.0 }
 0x17c   : > { %v620_v0 = vpack.c.bf16 %v619_v63, %v619_v63 }
 0x17e   : > { %621 = vst [vmem:[%s319_s26] sm:$0xf] %v620_v0 }
 0x17f PF: > { %s15_s20 = sadd.s32 1, %s854_s20   ;;  %s977_s18 = smov %s850_s19 }
 0x180   : > { %p12_p5 = scmp.ge.s32.totalorder %s15_s20, 4   ;;  %s978_s19 = smov %s980_s21 }
 0x182   :  { %14 = sbr.rel (!%p12_p5) target bundleno = 2 (0x2), region = 76 }

// kernel: _lambda_.41
= control target key start
LH: loop header
LB: loop body
LE: loop exit
PB: predicated region body
PF: predicated region fallthrough
CT: control target
= control target key end

     0   :  { %s818_s15 = smov 0   ;;  %s820_s16 = smov 0   ;;  %s889_s0 = inlined_call_operand.vmem [shape: bf16[2,8,256], index: 0, kind: input, shape index: {}, may-alias: {0,1}]   ;;  %s890_s1 = inlined_call_operand.vmem [shape: bf16[2,8,256], index: 1, kind: input, shape index: {}, may-alias: {0,1}]   ;;  %s891_s2 = inlined_call_operand.vmem [shape: bf16[8,40], index: 2, kind: input, shape index: {}]   ;;  %s892_s3 = inlined_call_operand.vmem [shape: f32[8,1], index: 3, kind: input, shape index: {}]   ;;  %s893_s4 = inlined_call_operand.vmem [shape: bf16[2,8,128], index: 4, kind: output, shape index: {}]  }
   0x1   :  { %s822_s17 = smov 0  }
   0x2 LB: > { %s26_s18 = sadd.s32 1, %s776_s16  ;;  %p663_p0 = scmp.ge.s32.totalorder %s780_s17, 1  ;;  %s780_s17 = sphi %s822_s17, %s14_s17   ;;  %s776_s16 = sphi %s820_s16, %s895_s16   ;;  %s772_s15 = sphi %s818_s15, %s894_s15  }
   0x3   : > { %p28_p1 = scmp.ge.s32.totalorder %s26_s18, 2  ;;  %p200_p2 = scmp.lt.s32.totalorder %s780_s17, 3 }
   0x5   : > { %s897_s18 = smov (%p28_p1, %s26_s18), 0  ;;  %p201_p3 = pnand %p663_p0, %p200_p2 }
   0x6   : > { %v275_v0 = vld [vmem:[%s891_s2] sm:$0xf] (!%p201_p3)  ;;  %p240_p4 = scmp.lt.s32.totalorder (!%p201_p3), %s772_s15, 1  ;;  %v782_v2 = vmov (!%p201_p3), 0.0   ;;  %s783_s21 = smov (!%p201_p3), 120   ;;  %vm784_vm0 = vmmov (!%p201_p3), 0   ;;  %v556_v45 = vlaneseq (!%p201_p3) }
   0x7   : > { %204 = sbr.rel (%p201_p3) target bundleno = 381 (0x17d), region = 36  ;;  %v669_v1 = vcombine.low (!%p201_p3), %v275_v0, %v275_v0  ;;  %691 = vmatprep.subr.bf16.mxu0 (!%p201_p3), %v782_v2  ;;  %697 = vmatprep.subr.bf16.mxu1 (!%p201_p3), %v782_v2  ;;  %vm293_vm2 = vcmask (!%p201_p3), 1043456   ;;  %s785_s30 = smov (!%p201_p3), 125   ;;  %vm289_vm4 = vcmask (!%p201_p3), 64512   ;;  %v790_v10 = vmov (!%p201_p3), 0   ;;  %v548_v11 = vld [vmem:[%s892_s3] sm:$0xff] (!%p201_p3) }
   0x8   : > { %693 = vmatprep.mubr.msk.bf16.mxu0 (!%p201_p3), %vm784_vm0, %v782_v2  ;;  %699 = vmatprep.mubr.msk.bf16.mxu1 (!%p201_p3), %vm784_vm0, %v782_v2  ;;  %s786_s5 = smov (!%p201_p3), 122   ;;  %s787_s6 = smov (!%p201_p3), 112   ;;  %vm287_vm5 = vcmask (!%p201_p3), 1022976   ;;  %vm389_vm6 = vcmask (!%p201_p3), 998400   ;;  %vm444_vm7 = vcmask (!%p201_p3), 973824   ;;  %vm499_vm8 = vcmask (!%p201_p3), 949248  }
   0x9   : > { %279 = vrot.lane.b32.xlu1 (!%p201_p3), %v669_v1, %s783_s21  ;;  %s788_s7 = smov (!%p201_p3), 119   ;;  %s789_s8 = smov (!%p201_p3), 116   ;;  %756 = vset.pattern.permute.xlu0 (!%p201_p3), %v790_v10  ;;  %v557_v52 = vand.u32 (!%p201_p3), 127, %v556_v45 }
   0xa   : > { %s791_s9 = smov (!%p201_p3), 96   ;;  %s792_s10 = smov (!%p201_p3), 104  }
   0xb   : > { %vm560_vm9 = vcmp.lt.s32.totalorder (!%p201_p3), %v557_v52, 32 }
   0xe   : > { %s899_s15 = smov (!%p240_p4, %s772_s15), 1 }
   0xf   : > { %s677_s22 = sshll.u32 %s899_s15, 3  ;;  %s668_s13 = sshll.u32 %s899_s15, 2 }
  0x10   : > { %s247_s25 = scalar_lea.vmem %s889_s0, %s677_s22  ;;  %s679_s26 = sadd.s32 4, %s677_s22 }
  0x11   : > { %v267_v3 = vld [vmem:[%s247_s25] sm:$0xf]  ;;  %s256_s29 = scalar_lea.vmem %s890_s1, %s679_s26  ;;  %s264_s20 = scalar_lea.vmem %s893_s4, %s668_s13 }
  0x12   : > { %vm269_vm1 = vcmp.ge.bf16.partialorder %v267_v3, 0  ;;  %v271_v4 = vmul.bf16 1036860877, %v267_v3  ;;  %v268_v5 = vld [vmem:[%s256_s29] sm:$0xf] }
  0x13   : > { %vm270_vm3 = vcmp.ge.bf16.partialorder %v268_v5, 0  ;;  %v272_v6 = vmul.bf16 1036860877, %v268_v5 }
  0x14   : > { %v273_v7 = vsel %vm269_vm1, %v267_v3, %v271_v4 }
  0x15   : > { %283 = vrot.lane.b32.xlu0 %v273_v7, %s785_s30  ;;  %385 = vrot.lane.b32.xlu1 %v273_v7, %s786_s5  ;;  %v341_v8 = vsel %vm293_vm2, %v273_v7, 0  ;;  %v274_v9 = vsel %vm270_vm3, %v268_v5, %v272_v6 }
  0x16   : > { %698 = vmatpush3.bf16.msra.mxu1 %v341_v8 }
  0x17   : > { %709 = vmatprep.subr.bf16.mxu1 %v782_v2 }
  0x19   : > { %285 = vrot.lane.b32.xlu0 %v274_v9, %s785_s30  ;;  %383 = vrot.lane.b32.xlu1 %v669_v1, %s787_s6 }
  0x1a   : > { %700 = vmatmul.mubr.msk.bf16.vlgmr.msra.gmra.mrb[0].mxu1 %vm289_vm4, %v275_v0 }
  0x1b   : > { %711 = vmatprep.mubr.msk.bf16.mxu1 %vm784_vm0, %v782_v2 }
  0x1d   : > { %387 = vrot.lane.b32.xlu0 %v274_v9, %s786_s5  ;;  %442 = vrot.lane.b32.xlu1 %v274_v9, %s788_s7 }
  0x21   : > { %440 = vrot.lane.b32.xlu0 %v273_v7, %s788_s7  ;;  %497 = vrot.lane.b32.xlu1 %v274_v9, %s789_s8 }
  0x25   : > { %495 = vrot.lane.b32.xlu0 %v273_v7, %s789_s8  ;;  %493 = vrot.lane.b32.xlu1 %v669_v1, %s791_s9 }
  0x29   : > { %438 = vrot.lane.b32.xlu0 %v669_v1, %s792_s10 }
  0x2d   : > { %551 = vperm.xlu0 %756, %v548_v11  }
  0x7b   : > { %v280_v12 = vpop.permute.xlu1 %279 }
  0x87   : > { %v284_v13 = vpop.permute.xlu0 %283  ;;  %v386_v14 = vpop.permute.xlu1 %385 }
  0x8b   : > { %v286_v15 = vpop.permute.xlu0 %285  ;;  %v384_v16 = vpop.permute.xlu1 %383 }
  0x8c   : > { %v288_v17 = vsel %vm287_vm5, %v284_v13, %v286_v15 }
  0x8d   : > { %v295_v18 = vsel %vm293_vm2, %v288_v17, 0 }
  0x8e   : > { %692 = vmatpush3.bf16.msra.mxu0 %v295_v18 }
  0x8f   : > { %v388_v19 = vpop.permute.xlu0 %387  ;;  %703 = vmatprep.subr.bf16.mxu0 %v782_v2  ;;  %v443_v20 = vpop.permute.xlu1 %442 }
  0x90   : > { %v390_v21 = vsel %vm389_vm6, %v386_v14, %v388_v19 }
  0x91   : > { %v395_v22 = vsel %vm293_vm2, %v390_v21, 0  ;;  %694 = vmatmul.mubr.msk.bf16.vlgmr.msra.gmra.mrb[0].mxu0 %vm289_vm4, %v280_v12 }
  0x92   : > { %704 = vmatpush3.bf16.msra.mxu0 %v395_v22  ;;  %705 = vmatprep.mubr.msk.bf16.mxu0 %vm784_vm0, %v782_v2 }
  0x93   : > { %v441_v23 = vpop.permute.xlu0 %440  ;;  %715 = vmatprep.subr.bf16.mxu0 %v782_v2  ;;  %v498_v26 = vpop.permute.xlu1 %497 }
  0x94   : > { %v445_v24 = vsel %vm444_vm7, %v441_v23, %v443_v20 }
  0x95   : > { %v450_v25 = vsel %vm293_vm2, %v445_v24, 0 }
  0x96   : > { %710 = vmatpush3.bf16.msra.mxu1 %v450_v25 }
  0x97   : > { %v496_v27 = vpop.permute.xlu0 %495  ;;  %v494_v31 = vpop.permute.xlu1 %493 }
  0x98   : > { %v500_v28 = vsel %vm499_vm8, %v496_v27, %v498_v26 }
  0x99   : > { %v505_v29 = vsel %vm293_vm2, %v500_v28, 0  ;;  %706 = vmatmul.mubr.msk.bf16.vlgmr.msra.gmra.mrb[4].mxu0 %vm289_vm4, %v384_v16 }
  0x9a   : > { %716 = vmatpush3.bf16.msra.mxu0 %v505_v29  ;;  %717 = vmatprep.mubr.msk.bf16.mxu0 %vm784_vm0, %v782_v2 }
  0x9b   : > { %v439_v30 = vpop.permute.xlu0 %438 }
  0x9c   : > { %712 = vmatmul.mubr.msk.bf16.vlgmr.msra.gmra.mrb[4].mxu1 %vm289_vm4, %v439_v30 }
  0xa1   : > { %718 = vmatmul.mubr.msk.bf16.vlgmr.msra.gmra.mrb[8].mxu0 %vm289_vm4, %v494_v31 }
  0xac   : > { %v552_v54 = vpop.permute.xlu0 %551 }
  0xed   : > { %v377_v32 = vpop.f32.mrb[0].mxu1 }
  0xee   : > { %v701_v33 = vpop.f32.mrb[1].mxu1 }
  0xef   : > { %v380_v34 = vpop.f32.mrb[2].mxu1 }
  0xf0   : > { %v702_v35 = vpop.f32.mrb[3].mxu1 }
 0x164   : > { %v331_v36 = vpop.f32.mrb[0].mxu0 }
 0x165   : > { %v378_v37 = vadd.f32 %v377_v32, %v331_v36  ;;  %v695_v38 = vpop.f32.mrb[1].mxu0 }
 0x166   : > { %v334_v39 = vpop.f32.mrb[2].mxu0 }
 0x167   : > { %v696_v40 = vpop.f32.mrb[3].mxu0 }
 0x16c   : > { %v431_v41 = vpop.f32.mrb[4].mxu0 }
 0x16d   : > { %v437_v42 = vadd.f32 %v431_v41, %v378_v37  ;;  %v707_v43 = vpop.f32.mrb[5].mxu0 }
 0x16e   : > { %v434_v44 = vpop.f32.mrb[6].mxu0 }
 0x16f   : > { %v708_v46 = vpop.f32.mrb[7].mxu0  ;;  %v486_v47 = vpop.f32.mrb[4].mxu1 }
 0x170   : > { %v492_v48 = vadd.f32 %v486_v47, %v437_v42  ;;  %v713_v49 = vpop.f32.mrb[5].mxu1 }
 0x171   : > { %v489_v50 = vpop.f32.mrb[6].mxu1 }
 0x172   : > { %v714_v51 = vpop.f32.mrb[7].mxu1 }
 0x174   : > { %v541_v53 = vpop.f32.mrb[8].mxu0 }
 0x175   : > { %v547_v55 = vadd.f32 %v541_v53, %v492_v48  ;;  %v719_v56 = vpop.f32.mrb[9].mxu0 }
 0x176   : > { %v544_v57 = vpop.f32.mrb[10].mxu0 }
 0x177   : > { %v554_v58 = vadd.f32 %v552_v54, %v547_v55  ;;  %v720_v59 = vpop.f32.mrb[11].mxu0 }
 0x179   : > { %v561_v60 = vsel %vm560_vm9, %v554_v58, 0.0 }
 0x17a   : > { %v562_v61 = vpack.c.bf16 %v561_v60, %v561_v60 }
 0x17c   : > { %563 = vst [vmem:[%s264_s20] sm:$0xf] %v562_v61 }
 0x17d PF: > { %s14_s17 = sadd.s32 1, %s780_s17   ;;  %s894_s15 = smov %s776_s16 }
 0x17e   : > { %p11_p5 = scmp.ge.s32.totalorder %s14_s17, 4   ;;  %s895_s16 = smov %s897_s18 }
 0x180   :  { %13 = sbr.rel (!%p11_p5) target bundleno = 2 (0x2), region = 69 }

// kernel: _lambda_.37
= control target key start
LH: loop header
LB: loop body
LE: loop exit
PB: predicated region body
PF: predicated region fallthrough
CT: control target
= control target key end

     0   :  { %s682_s15 = smov 0   ;;  %s684_s16 = smov 0   ;;  %s737_s0 = inlined_call_operand.vmem [shape: bf16[2,8,256], index: 0, kind: input, shape index: {}, may-alias: {0,1}]   ;;  %s738_s1 = inlined_call_operand.vmem [shape: bf16[2,8,256], index: 1, kind: input, shape index: {}, may-alias: {0,1}]   ;;  %s739_s2 = inlined_call_operand.vmem [shape: bf16[8,24], index: 2, kind: input, shape index: {}]   ;;  %s740_s3 = inlined_call_operand.vmem [shape: f32[8,1], index: 3, kind: input, shape index: {}]   ;;  %s741_s4 = inlined_call_operand.vmem [shape: bf16[2,8,128], index: 4, kind: output, shape index: {}]  }
   0x1   :  { %s686_s17 = smov 0  }
   0x2 LB: > { %s26_s18 = sadd.s32 1, %s644_s16  ;;  %p553_p0 = scmp.ge.s32.totalorder %s648_s17, 1  ;;  %s648_s17 = sphi %s686_s17, %s14_s17   ;;  %s644_s16 = sphi %s684_s16, %s743_s16   ;;  %s640_s15 = sphi %s682_s15, %s742_s15  }
   0x3   : > { %p28_p1 = scmp.ge.s32.totalorder %s26_s18, 2  ;;  %p200_p2 = scmp.lt.s32.totalorder %s648_s17, 3 }
   0x5   : > { %s745_s18 = smov (%p28_p1, %s26_s18), 0  ;;  %p201_p3 = pnand %p553_p0, %p200_p2 }
   0x6   : > { %p240_p4 = scmp.lt.s32.totalorder (!%p201_p3), %s640_s15, 1  ;;  %v275_v0 = vld [vmem:[%s739_s2] sm:$0xf] (!%p201_p3)  ;;  %v650_v2 = vmov (!%p201_p3), 0.0   ;;  %s651_s21 = smov (!%p201_p3), 120   ;;  %vm652_vm0 = vmmov (!%p201_p3), 0   ;;  %v446_v30 = vlaneseq (!%p201_p3) }
   0x7   : > { %204 = sbr.rel (%p201_p3) target bundleno = 373 (0x175), region = 36  ;;  %v559_v1 = vcombine.low (!%p201_p3), %v275_v0, %v275_v0  ;;  %575 = vmatprep.subr.bf16.mxu0 (!%p201_p3), %v650_v2  ;;  %581 = vmatprep.subr.bf16.mxu1 (!%p201_p3), %v650_v2  ;;  %vm293_vm2 = vcmask (!%p201_p3), 1043456   ;;  %s653_s30 = smov (!%p201_p3), 125   ;;  %vm289_vm4 = vcmask (!%p201_p3), 64512   ;;  %v656_v10 = vmov (!%p201_p3), 0   ;;  %v438_v11 = vld [vmem:[%s740_s3] sm:$0xff] (!%p201_p3) }
   0x8   : > { %577 = vmatprep.mubr.msk.bf16.mxu0 (!%p201_p3), %vm652_vm0, %v650_v2  ;;  %583 = vmatprep.mubr.msk.bf16.mxu1 (!%p201_p3), %vm652_vm0, %v650_v2  ;;  %s654_s5 = smov (!%p201_p3), 122   ;;  %s655_s6 = smov (!%p201_p3), 112   ;;  %vm287_vm5 = vcmask (!%p201_p3), 1022976   ;;  %vm389_vm6 = vcmask (!%p201_p3), 998400   ;;  %v447_v32 = vand.u32 (!%p201_p3), 127, %v446_v30 }
   0x9   : > { %279 = vrot.lane.b32.xlu1 (!%p201_p3), %v559_v1, %s651_s21  ;;  %624 = vset.pattern.permute.xlu0 (!%p201_p3), %v656_v10 }
   0xa   : > { %vm450_vm7 = vcmp.lt.s32.totalorder (!%p201_p3), %v447_v32, 32 }
   0xe   : > { %s747_s15 = smov (!%p240_p4, %s640_s15), 1 }
   0xf   : > { %s565_s22 = sshll.u32 %s747_s15, 3  ;;  %s558_s9 = sshll.u32 %s747_s15, 2 }
  0x10   : > { %s247_s25 = scalar_lea.vmem %s737_s0, %s565_s22  ;;  %s567_s26 = sadd.s32 4, %s565_s22 }
  0x11   : > { %v267_v3 = vld [vmem:[%s247_s25] sm:$0xf]  ;;  %s256_s29 = scalar_lea.vmem %s738_s1, %s567_s26  ;;  %s264_s12 = scalar_lea.vmem %s741_s4, %s558_s9 }
  0x12   : > { %vm269_vm1 = vcmp.ge.bf16.partialorder %v267_v3, 0  ;;  %v271_v4 = vmul.bf16 1036860877, %v267_v3  ;;  %v268_v5 = vld [vmem:[%s256_s29] sm:$0xf] }
  0x13   : > { %vm270_vm3 = vcmp.ge.bf16.partialorder %v268_v5, 0  ;;  %v272_v6 = vmul.bf16 1036860877, %v268_v5 }
  0x14   : > { %v273_v7 = vsel %vm269_vm1, %v267_v3, %v271_v4 }
  0x15   : > { %283 = vrot.lane.b32.xlu0 %v273_v7, %s653_s30  ;;  %385 = vrot.lane.b32.xlu1 %v273_v7, %s654_s5  ;;  %v341_v8 = vsel %vm293_vm2, %v273_v7, 0  ;;  %v274_v9 = vsel %vm270_vm3, %v268_v5, %v272_v6 }
  0x16   : > { %582 = vmatpush3.bf16.msra.mxu1 %v341_v8 }
  0x19   : > { %285 = vrot.lane.b32.xlu0 %v274_v9, %s653_s30  ;;  %383 = vrot.lane.b32.xlu1 %v559_v1, %s655_s6 }
  0x1a   : > { %584 = vmatmul.mubr.msk.bf16.vlgmr.msra.gmra.mrb[0].mxu1 %vm289_vm4, %v275_v0 }
  0x1d   : > { %387 = vrot.lane.b32.xlu0 %v274_v9, %s654_s5 }
  0x21   : > { %441 = vperm.xlu0 %624, %v438_v11  }
  0x7b   : > { %v280_v13 = vpop.permute.xlu1 %279 }
  0x87   : > { %v284_v12 = vpop.permute.xlu0 %283  ;;  %v386_v17 = vpop.permute.xlu1 %385 }
  0x8b   : > { %v286_v14 = vpop.permute.xlu0 %285  ;;  %v384_v21 = vpop.permute.xlu1 %383 }
  0x8c   : > { %v288_v15 = vsel %vm287_vm5, %v284_v12, %v286_v14 }
  0x8d   : > { %v295_v16 = vsel %vm293_vm2, %v288_v15, 0 }
  0x8e   : > { %576 = vmatpush3.bf16.msra.mxu0 %v295_v16 }
  0x8f   : > { %v388_v18 = vpop.permute.xlu0 %387  ;;  %587 = vmatprep.subr.bf16.mxu0 %v650_v2 }
  0x90   : > { %v390_v19 = vsel %vm389_vm6, %v386_v17, %v388_v18 }
  0x91   : > { %v395_v20 = vsel %vm293_vm2, %v390_v19, 0  ;;  %578 = vmatmul.mubr.msk.bf16.vlgmr.msra.gmra.mrb[0].mxu0 %vm289_vm4, %v280_v13 }
  0x92   : > { %588 = vmatpush3.bf16.msra.mxu0 %v395_v20  ;;  %589 = vmatprep.mubr.msk.bf16.mxu0 %vm652_vm0, %v650_v2 }
  0x99   : > { %590 = vmatmul.mubr.msk.bf16.vlgmr.msra.gmra.mrb[4].mxu0 %vm289_vm4, %v384_v21 }
  0xa0   : > { %v442_v34 = vpop.permute.xlu0 %441 }
  0xed   : > { %v377_v22 = vpop.f32.mrb[0].mxu1 }
  0xee   : > { %v585_v23 = vpop.f32.mrb[1].mxu1 }
  0xef   : > { %v380_v24 = vpop.f32.mrb[2].mxu1 }
  0xf0   : > { %v586_v25 = vpop.f32.mrb[3].mxu1 }
 0x164   : > { %v331_v26 = vpop.f32.mrb[0].mxu0 }
 0x165   : > { %v378_v27 = vadd.f32 %v377_v22, %v331_v26  ;;  %v579_v28 = vpop.f32.mrb[1].mxu0 }
 0x166   : > { %v334_v29 = vpop.f32.mrb[2].mxu0 }
 0x167   : > { %v580_v31 = vpop.f32.mrb[3].mxu0 }
 0x16c   : > { %v431_v33 = vpop.f32.mrb[4].mxu0 }
 0x16d   : > { %v437_v35 = vadd.f32 %v431_v33, %v378_v27  ;;  %v591_v36 = vpop.f32.mrb[5].mxu0 }
 0x16e   : > { %v434_v37 = vpop.f32.mrb[6].mxu0 }
 0x16f   : > { %v444_v38 = vadd.f32 %v442_v34, %v437_v35  ;;  %v592_v39 = vpop.f32.mrb[7].mxu0 }
 0x171   : > { %v451_v40 = vsel %vm450_vm7, %v444_v38, 0.0 }
 0x172   : > { %v452_v41 = vpack.c.bf16 %v451_v40, %v451_v40 }
 0x174   : > { %453 = vst [vmem:[%s264_s12] sm:$0xf] %v452_v41 }
 0x175 PF: > { %s14_s17 = sadd.s32 1, %s648_s17   ;;  %s742_s15 = smov %s644_s16 }
 0x176   : > { %p11_p5 = scmp.ge.s32.totalorder %s14_s17, 4   ;;  %s743_s16 = smov %s745_s18 }
 0x178   :  { %13 = sbr.rel (!%p11_p5) target bundleno = 2 (0x2), region = 69 }

// kernel: _lambda_.43
= control target key start
LH: loop header
LB: loop body
LE: loop exit
PB: predicated region body
PF: predicated region fallthrough
CT: control target
= control target key end

     0   :  { %s1059_s17 = smov 0   ;;  %s1061_s18 = smov 0   ;;  %s1146_s0 = inlined_call_operand.vmem [shape: bf16[2,8,256], index: 0, kind: input, shape index: {}, may-alias: {0,1}]   ;;  %s1147_s1 = inlined_call_operand.vmem [shape: bf16[2,8,256], index: 1, kind: input, shape index: {}, may-alias: {0,1}]   ;;  %s1148_s2 = inlined_call_operand.vmem [shape: bf16[1,56], index: 2, kind: input, shape index: {}]   ;;  %s1149_s3 = inlined_call_operand.<no memory space> [shape: f32[1,1], index: 3, kind: input, shape index: {}]   ;;  %s1150_s4 = inlined_call_operand.vmem [shape: bf16[2,1,128], index: 4, kind: output, shape index: {}]  }
   0x1   :  { %v9_v0 = vstv %s1149_s3  ;;  %s1063_s19 = smov 0  }
   0x2   :  { %10 = vst [vmem:[#allocation2] sm:$0x1] %v9_v0 }
   0x3 LB: > { %s28_s3 = sadd.s32 1, %s1009_s18  ;;  %p869_p0 = scmp.ge.s32.totalorder %s1013_s19, 1  ;;  %s1013_s19 = sphi %s1063_s19, %s16_s19   ;;  %s1009_s18 = sphi %s1061_s18, %s1152_s18   ;;  %s1005_s17 = sphi %s1059_s17, %s1151_s17  }
   0x4   : > { %p30_p1 = scmp.ge.s32.totalorder %s28_s3, 2  ;;  %p202_p2 = scmp.lt.s32.totalorder %s1013_s19, 3 }
   0x6   : > { %s1154_s3 = smov (%p30_p1, %s28_s3), 0  ;;  %p203_p3 = pnand %p869_p0, %p202_p2 }
   0x7   : > { %v280_v1 = vlaneseq (!%p203_p3)  ;;  %v1015_v2 = vmov (!%p203_p3), 1966171168   ;;  %p241_p4 = scmp.lt.s32.totalorder (!%p203_p3), %s1005_s17, 1  ;;  %v1016_v5 = vmov (!%p203_p3), 0.0   ;;  %v275_v9 = vld [vmem:[%s1148_s2] sm:$0x1] (!%p203_p3) }
   0x8   : > { %206 = sbr.rel (%p203_p3) target bundleno = 403 (0x193), region = 36  ;;  %v278_v3 = vunpack.c.l.s4 (!%p203_p3), %v1015_v2  ;;  %906 = vmatprep.subr.bf16.mxu0 (!%p203_p3), %v1016_v5  ;;  %912 = vmatprep.subr.bf16.mxu1 (!%p203_p3), %v1016_v5  ;;  %v876_v7 = vld.sshfl [vmem:[%s1148_s2] sm:$0x1 pattern:$0x75316420] (!%p203_p3)  ;;  %vm1017_vm0 = vmmov (!%p203_p3), 0  }
   0x9   : > { %v1078_v4 = vshrl.u32 (!%p203_p3), %v280_v1, 7  ;;  %908 = vmatprep.mubr.msk.bf16.mxu0 (!%p203_p3), %vm1017_vm0, %v1016_v5  ;;  %914 = vmatprep.mubr.msk.bf16.mxu1 (!%p203_p3), %vm1017_vm0, %v1016_v5  ;;  %vm305_vm2 = vcmask (!%p203_p3), 1043456   ;;  %s1018_s6 = smov (!%p203_p3), 112   ;;  %s1019_s7 = smov (!%p203_p3), 127   ;;  %vm301_vm4 = vcmask (!%p203_p3), 64512   ;;  %v1026_v20 = vmov (!%p203_p3), 0  }
   0xa   : > { %v279_v6 = vunpack.c.0.s8 (!%p203_p3), %v278_v3  ;;  %s1020_s8 = smov (!%p203_p3), 126   ;;  %s1021_s9 = smov (!%p203_p3), 120   ;;  %988 = vset.pattern.permute.xlu0 (!%p203_p3), %v1026_v20  ;;  %v750_v21 = vld [vmem:[#allocation2] sm:$0x1] (!%p203_p3)  ;;  %vm299_vm5 = vcmask (!%p203_p3), 1039360   ;;  %vm417_vm6 = vcmask (!%p203_p3), 1031168  }
   0xb   : > { %s1022_s10 = smov (!%p203_p3), 125   ;;  %s1023_s11 = smov (!%p203_p3), 124   ;;  %vm488_vm7 = vcmask (!%p203_p3), 1022976   ;;  %vm559_vm8 = vcmask (!%p203_p3), 1014784   ;;  %vm630_vm9 = vcmask (!%p203_p3), 1006592   ;;  %vm701_vm10 = vcmask (!%p203_p3), 998400  }
   0xc   : > { %v282_v8 = vsub.s32 (!%p203_p3), %v279_v6, %v1078_v4  ;;  %s1024_s12 = smov (!%p203_p3), 96   ;;  %s1025_s13 = smov (!%p203_p3), 104   ;;  %vm770_vm12 = vcmask (!%p203_p3), 1040384   ;;  %vm771_vm13 = vsmask.f32 (!%p203_p3), 256 }
   0xd   : > { %s1027_s14 = smov (!%p203_p3), 123   ;;  %s1028_s15 = smov (!%p203_p3), 122   ;;  %vm772_vm14 = vmand (!%p203_p3), %vm770_vm12, %vm771_vm13 }
   0xe   : > { %v410_v10 = vrot.slane (!%p203_p3), %v876_v7, %v282_v8  ;;  %v283_v15 = vrot.slane (!%p203_p3), %v275_v9, %v282_v8  ;;  %s1029_s16 = smov (!%p203_p3), 80   ;;  %s1030_s20 = smov (!%p203_p3), 88  }
   0xf   : > { %s1156_s17 = smov (!%p241_p4, %s1005_s17), 1 }
  0x10   : > { %s888_s22 = sshll.u32 %s1156_s17, 3  ;;  %411 = vrot.lane.b32.xlu1 %v410_v10, %s1018_s6  ;;  %v290_v19 = vrot.slane %v283_v15, %v282_v8  ;;  %s264_s23 = scalar_lea.vmem %s1150_s4, %s1156_s17 }
  0x11   : > { %s248_s25 = scalar_lea.vmem %s1146_s0, %s888_s22  ;;  %s890_s26 = sadd.s32 4, %s888_s22 }
  0x12   : > { %v267_v11 = vld [vmem:[%s248_s25] sm:$0xf]  ;;  %s257_s5 = scalar_lea.vmem %s1147_s1, %s890_s26 }
  0x13   : > { %vm269_vm1 = vcmp.ge.bf16.partialorder %v267_v11, 0  ;;  %v271_v12 = vmul.bf16 1036860877, %v267_v11  ;;  %v268_v13 = vld [vmem:[%s257_s5] sm:$0xf] }
  0x14   : > { %vm270_vm3 = vcmp.ge.bf16.partialorder %v268_v13, 0  ;;  %v272_v14 = vmul.bf16 1036860877, %v268_v13 }
  0x15   : > { %v273_v16 = vsel %vm269_vm1, %v267_v11, %v271_v12 }
  0x16   : > { %295 = vrot.lane.b32.xlu0 %v273_v16, %s1019_s7  ;;  %v353_v17 = vsel %vm305_vm2, %v273_v16, 0  ;;  %v274_v18 = vsel %vm270_vm3, %v268_v13, %v272_v14  ;;  %413 = vrot.lane.b32.xlu1 %v273_v16, %s1020_s8  ;;  %v758_v14 = vsub.s32 0, %v1078_v4 }
  0x17   : > { %913 = vmatpush3.bf16.msra.mxu1 %v353_v17 }
  0x18   : > { %924 = vmatprep.subr.bf16.mxu1 %v1016_v5 }
  0x1a   : > { %297 = vrot.lane.b32.xlu0 %v274_v18, %s1019_s7  ;;  %915 = vmatmul.mubr.msk.bf16.vlgmr.msra.gmra.mrb[0].mxu1 %vm301_vm4, %v275_v9 }
  0x1b   : > { %926 = vmatprep.mubr.msk.bf16.mxu1 %vm1017_vm0, %v1016_v5  ;;  %291 = vrot.lane.b32.xlu1 %v290_v19, %s1021_s9 }
  0x1e   : > { %415 = vrot.lane.b32.xlu0 %v274_v18, %s1020_s8 }
  0x1f   : > { %486 = vrot.lane.b32.xlu1 %v274_v18, %s1022_s10 }
  0x22   : > { %484 = vrot.lane.b32.xlu0 %v273_v16, %s1022_s10 }
  0x23   : > { %557 = vrot.lane.b32.xlu1 %v274_v18, %s1023_s11 }
  0x26   : > { %555 = vrot.lane.b32.xlu0 %v273_v16, %s1023_s11 }
  0x27   : > { %553 = vrot.lane.b32.xlu1 %v410_v10, %s1024_s12 }
  0x2a   : > { %482 = vrot.lane.b32.xlu0 %v410_v10, %s1025_s13 }
  0x2b   : > { %628 = vrot.lane.b32.xlu1 %v274_v18, %s1027_s14 }
  0x2e   : > { %626 = vrot.lane.b32.xlu0 %v273_v16, %s1027_s14 }
  0x2f   : > { %699 = vrot.lane.b32.xlu1 %v274_v18, %s1028_s15 }
  0x32   : > { %697 = vrot.lane.b32.xlu0 %v273_v16, %s1028_s15 }
  0x33   : > { %695 = vrot.lane.b32.xlu1 %v410_v10, %s1029_s16 }
  0x36   : > { %624 = vrot.lane.b32.xlu0 %v410_v10, %s1030_s20 }
  0x3a   : > { %753 = vperm.xlu0 %988, %v750_v21  }
  0x82   : > { %v412_v22 = vpop.permute.xlu1 %411 }
  0x88   : > { %v296_v23 = vpop.permute.xlu0 %295  ;;  %v414_v24 = vpop.permute.xlu1 %413 }
  0x8c   : > { %v298_v25 = vpop.permute.xlu0 %297 }
  0x8d   : > { %v300_v26 = vsel %vm299_vm5, %v296_v23, %v298_v25  ;;  %v292_v28 = vpop.permute.xlu1 %291 }
  0x8e   : > { %v307_v27 = vsel %vm305_vm2, %v300_v26, 0 }
  0x8f   : > { %907 = vmatpush3.bf16.msra.mxu0 %v307_v27 }
  0x90   : > { %v416_v29 = vpop.permute.xlu0 %415  ;;  %918 = vmatprep.subr.bf16.mxu0 %v1016_v5 }
  0x91   : > { %v418_v30 = vsel %vm417_vm6, %v414_v24, %v416_v29  ;;  %v487_v32 = vpop.permute.xlu1 %486  ;;  %v773_v29 = vld [vmem:[%s264_s23] sm:$0x1] }
  0x92   : > { %v423_v31 = vsel %vm305_vm2, %v418_v30, 0  ;;  %909 = vmatmul.mubr.msk.bf16.vlgmr.msra.gmra.mrb[0].mxu0 %vm301_vm4, %v292_v28  ;;  %v764_v28 = vand.u32 127, %v280_v1 }
  0x93   : > { %919 = vmatpush3.bf16.msra.mxu0 %v423_v31  ;;  %920 = vmatprep.mubr.msk.bf16.mxu0 %vm1017_vm0, %v1016_v5 }
  0x94   : > { %v485_v33 = vpop.permute.xlu0 %484  ;;  %930 = vmatprep.subr.bf16.mxu0 %v1016_v5  ;;  %vm767_vm11 = vcmp.lt.s32.totalorder %v764_v28, 32 }
  0x95   : > { %v489_v34 = vsel %vm488_vm7, %v485_v33, %v487_v32  ;;  %v558_v36 = vpop.permute.xlu1 %557 }
  0x96   : > { %v494_v35 = vsel %vm305_vm2, %v489_v34, 0 }
  0x97   : > { %925 = vmatpush3.bf16.msra.mxu1 %v494_v35 }
  0x98   : > { %v556_v37 = vpop.permute.xlu0 %555  ;;  %936 = vmatprep.subr.bf16.mxu1 %v1016_v5 }
  0x99   : > { %v560_v38 = vsel %vm559_vm8, %v556_v37, %v558_v36  ;;  %v554_v40 = vpop.permute.xlu1 %553 }
  0x9a   : > { %v565_v39 = vsel %vm305_vm2, %v560_v38, 0  ;;  %921 = vmatmul.mubr.msk.bf16.vlgmr.msra.gmra.mrb[4].mxu0 %vm301_vm4, %v412_v22 }
  0x9b   : > { %931 = vmatpush3.bf16.msra.mxu0 %v565_v39  ;;  %932 = vmatprep.mubr.msk.bf16.mxu0 %vm1017_vm0, %v1016_v5 }
  0x9c   : > { %v483_v41 = vpop.permute.xlu0 %482  ;;  %942 = vmatprep.subr.bf16.mxu0 %v1016_v5 }
  0x9d   : > { %927 = vmatmul.mubr.msk.bf16.vlgmr.msra.gmra.mrb[4].mxu1 %vm301_vm4, %v483_v41  ;;  %v629_v42 = vpop.permute.xlu1 %628 }
  0x9e   : > { %938 = vmatprep.mubr.msk.bf16.mxu1 %vm1017_vm0, %v1016_v5 }
  0xa0   : > { %v627_v43 = vpop.permute.xlu0 %626 }
  0xa1   : > { %v631_v44 = vsel %vm630_vm9, %v627_v43, %v629_v42  ;;  %v700_v46 = vpop.permute.xlu1 %699 }
  0xa2   : > { %v636_v45 = vsel %vm305_vm2, %v631_v44, 0  ;;  %933 = vmatmul.mubr.msk.bf16.vlgmr.msra.gmra.mrb[8].mxu0 %vm301_vm4, %v554_v40 }
  0xa3   : > { %937 = vmatpush3.bf16.msra.mxu1 %v636_v45  ;;  %944 = vmatprep.mubr.msk.bf16.mxu0 %vm1017_vm0, %v1016_v5 }
  0xa4   : > { %v698_v47 = vpop.permute.xlu0 %697 }
  0xa5   : > { %v702_v48 = vsel %vm701_vm10, %v698_v47, %v700_v46  ;;  %v696_v50 = vpop.permute.xlu1 %695 }
  0xa6   : > { %v707_v49 = vsel %vm305_vm2, %v702_v48, 0 }
  0xa7   : > { %943 = vmatpush3.bf16.msra.mxu0 %v707_v49 }
  0xa8   : > { %v625_v51 = vpop.permute.xlu0 %624 }
  0xa9   : > { %939 = vmatmul.mubr.msk.bf16.vlgmr.msra.gmra.mrb[8].mxu1 %vm301_vm4, %v625_v51 }
  0xaa   : > { %945 = vmatmul.mubr.msk.bf16.vlgmr.msra.gmra.mrb[12].mxu0 %vm301_vm4, %v696_v50 }
  0xb9   : > { %v754_v15 = vpop.permute.xlu0 %753 }
  0xba   : > { %v759_v19 = vrot.slane %v754_v15, %v758_v14 }
  0xed   : > { %v389_v52 = vpop.f32.mrb[0].mxu1 }
  0xee   : > { %v916_v53 = vpop.f32.mrb[1].mxu1 }
  0xef   : > { %v392_v54 = vpop.f32.mrb[2].mxu1 }
  0xf0   : > { %v917_v55 = vpop.f32.mrb[3].mxu1 }
 0x165   : > { %v343_v56 = vpop.f32.mrb[0].mxu0 }
 0x166   : > { %v390_v57 = vadd.f32 %v389_v52, %v343_v56  ;;  %v910_v58 = vpop.f32.mrb[1].mxu0 }
 0x167   : > { %v346_v59 = vpop.f32.mrb[2].mxu0 }
 0x168   : > { %v911_v60 = vpop.f32.mrb[3].mxu0 }
 0x16d   : > { %v459_v61 = vpop.f32.mrb[4].mxu0 }
 0x16e   : > { %v465_v62 = vadd.f32 %v459_v61, %v390_v57  ;;  %v922_v63 = vpop.f32.mrb[5].mxu0 }
 0x16f   : > { %v462_v0 = vpop.f32.mrb[6].mxu0 }
 0x170   : > { %v923_v2 = vpop.f32.mrb[7].mxu0  ;;  %v530_v3 = vpop.f32.mrb[4].mxu1 }
 0x171   : > { %v536_v5 = vadd.f32 %v530_v3, %v465_v62  ;;  %v928_v6 = vpop.f32.mrb[5].mxu1 }
 0x172   : > { %v533_v7 = vpop.f32.mrb[6].mxu1 }
 0x173   : > { %v929_v8 = vpop.f32.mrb[7].mxu1 }
 0x175   : > { %v601_v9 = vpop.f32.mrb[8].mxu0 }
 0x176   : > { %v607_v10 = vadd.f32 %v601_v9, %v536_v5  ;;  %v934_v11 = vpop.f32.mrb[9].mxu0 }
 0x177   : > { %v604_v12 = vpop.f32.mrb[10].mxu0 }
 0x178   : > { %v935_v13 = vpop.f32.mrb[11].mxu0 }
 0x17c   : > { %v672_v16 = vpop.f32.mrb[8].mxu1 }
 0x17d   : > { %v678_v17 = vadd.f32 %v672_v16, %v607_v10  ;;  %v743_v18 = vpop.f32.mrb[12].mxu0  ;;  %v940_v20 = vpop.f32.mrb[9].mxu1 }
 0x17e   : > { %v675_v21 = vpop.f32.mrb[10].mxu1  ;;  %v946_v22 = vpop.f32.mrb[13].mxu0 }
 0x17f   : > { %v749_v23 = vadd.f32 %v743_v18, %v678_v17  ;;  %v941_v24 = vpop.f32.mrb[11].mxu1  ;;  %v746_v25 = vpop.f32.mrb[14].mxu0 }
 0x180   : > { %v947_v26 = vpop.f32.mrb[15].mxu0 }
 0x181   : > { %v760_v27 = vadd.f32 %v759_v19, %v749_v23 }
 0x183   : > { %989 = vtanh.f32 %v760_v27 }
 0x18d   : > { %v990_v4 = vpop.eup %989 }
 0x18e   : > { %v768_v30 = vsel %vm767_vm11, %v990_v4, 0.0 }
 0x18f   : > { %v769_v31 = vpack.c.bf16 %v768_v30, %v768_v30 }
 0x191   : > { %v774_v32 = vsel %vm772_vm14, %v769_v31, %v773_v29 }
 0x192   : > { %775 = vst [vmem:[%s264_s23] sm:$0x1] %v774_v32 }
 0x193 PF: > { %s16_s19 = sadd.s32 1, %s1013_s19   ;;  %s1151_s17 = smov %s1009_s18 }
 0x194   : > { %p13_p5 = scmp.ge.s32.totalorder %s16_s19, 4   ;;  %s1152_s18 = smov %s1154_s3 }
 0x196   :  { %15 = sbr.rel (!%p13_p5) target bundleno = 3 (0x3), region = 69 }

</bundles_post_ra>
